<compile_context>
chip_gen: v6e
topology: v6e:2x2x1
jax: 0.10.0
libtpu: 0.0.40
codegen_flags: <defaults>
</compile_context>

<pallas_src>
import functools
import math

import jax
import jax.numpy as jnp
from jax import lax
from jax.experimental import pallas as pl
from jax.experimental.pallas import tpu as pltpu


# ----------------------------------------------------------------------------
# Kernel 1: Conv1d (kernel=3, pad=1, stride=1) + bias + ReLU, NLC layout.
# Whole (padded) activation lives in VMEM; one invocation per layer.
# ----------------------------------------------------------------------------
def conv1d_k3_relu_kernel(x_ref, w_ref, b_ref, o_ref):
    # x_ref: (B, L+2, Cin)  zero-padded along L (pad=1 each side)
    # w_ref: (3, Cin, Cout) conv taps
    # b_ref: (1, Cout)
    # o_ref: (B, L, Cout)
    B = x_ref.shape[0]
    L = o_ref.shape[1]
    w0 = w_ref[0]
    w1 = w_ref[1]
    w2 = w_ref[2]
    b = b_ref[...]
    for bi in range(B):  # static unroll: per-batch shifted dots inside ONE invocation
        acc = jnp.dot(x_ref[bi, pl.ds(0, L), :], w0,
                      preferred_element_type=jnp.float32)
        acc = acc + jnp.dot(x_ref[bi, pl.ds(1, L), :], w1,
                            preferred_element_type=jnp.float32)
        acc = acc + jnp.dot(x_ref[bi, pl.ds(2, L), :], w2,
                            preferred_element_type=jnp.float32)
        o_ref[bi] = jnp.maximum(acc + b, 0.0)


def conv1d_relu(xp, w_kio, b):
    # xp: (B, L+2, Cin) already zero-padded, w_kio: (3, Cin, Cout), b: (1, Cout)
    B, Lp2, _ = xp.shape
    L = Lp2 - 2
    Cout = w_kio.shape[-1]
    return pl.pallas_call(
        conv1d_k3_relu_kernel,
        out_shape=jax.ShapeDtypeStruct((B, L, Cout), jnp.float32),
    )(xp, w_kio, b)


# ----------------------------------------------------------------------------
# Kernel 2: single-layer unidirectional GRU (PyTorch gate order r, z, n).
# One invocation: hoisted input projection + in-kernel fori_loop recurrence.
# Only the final hidden state is written out.
# ----------------------------------------------------------------------------
def gru_kernel(x_ref, h0_ref, wih_ref, whh_ref, bih_ref, bhh_ref, hT_ref, gi_scr):
    # x_ref:   (T*BP, Cin)  time-major flattened input (batch padded to BP rows/step)
    # h0_ref:  (BP, H)      initial hidden (padded rows are zero / don't matter)
    # wih_ref: (Cin, 3H)    packed [r|z|n];  whh_ref: (H, 3H)
    # bih_ref, bhh_ref: (1, 3H)
    # hT_ref:  (B, H)       final hidden state (only consumer downstream)
    # gi_scr:  (T*BP, 3H)   VMEM scratch holding the hoisted input projection
    TBP, _ = x_ref.shape
    BP, H = h0_ref.shape
    B = hT_ref.shape[0]
    T = TBP // BP

    # Hoisted input projection for ALL timesteps: one MXU matmul (M = T*BP, N = 3H).
    gi_scr[...] = (jnp.dot(x_ref[...], wih_ref[...],
                           preferred_element_type=jnp.float32) + bih_ref[...])

    whh = whh_ref[...]
    bhh = bhh_ref[...]

    def step(t, h):
        start = pl.multiple_of(t * BP, 8)              # aligned sublane offset
        g_i = gi_scr[pl.ds(start, BP), :]              # (BP, 3H) precomputed
        g_h = jnp.dot(h, whh, preferred_element_type=jnp.float32) + bhh  # (BP, 3H)
        r = jax.nn.sigmoid(g_i[:, 0:H] + g_h[:, 0:H])
        z = jax.nn.sigmoid(g_i[:, H:2 * H] + g_h[:, H:2 * H])
        n = jnp.tanh(g_i[:, 2 * H:3 * H] + r * g_h[:, 2 * H:3 * H])
        return (1.0 - z) * n + z * h

    h_fin = lax.fori_loop(0, T, step, h0_ref[...])
    hT_ref[...] = h_fin[0:B, :]


def gru_forward(seq_tbD, h0, wih, whh, bih, bhh):
    # seq_tbD: (T, B, D) time-major; h0: (B, H).  Returns final hidden (B, H).
    T, B, D = seq_tbD.shape
    H = h0.shape[-1]
    BP = ((B + 7) // 8) * 8                            # pad batch rows to sublane multiple
    seq_pad = jnp.pad(seq_tbD, ((0, 0), (0, BP - B), (0, 0)))
    x_flat = seq_pad.reshape(T * BP, D)
    h0_pad = jnp.pad(h0, ((0, BP - B), (0, 0)))
    return pl.pallas_call(
        gru_kernel,
        out_shape=jax.ShapeDtypeStruct((B, H), jnp.float32),
        scratch_shapes=[pltpu.VMEM((T * BP, 3 * H), jnp.float32)],
    )(x_flat, h0_pad, wih, whh, bih, bhh)


# ----------------------------------------------------------------------------
# Kernel 3: Wk linear (all steps in one lane-dense matmul) + CPC NCE / accuracy.
# ----------------------------------------------------------------------------
def nce_kernel(enc_ref, ct_ref, wk_ref, bk_ref, nce_ref, corr_ref):
    # enc_ref: (T, B, D)   encode_samples
    # ct_ref:  (B, H)      GRU context
    # wk_ref:  (H, T*D)    packed Wk[i].weight^T ;  bk_ref: (1, T*D)
    # nce_ref: (1, 1)      sum over all steps of sum(diag(log_softmax(total, dim=1)))
    # corr_ref:(T, 1)      per-step correct count (int32)
    T, B, D = enc_ref.shape
    c_t = ct_ref[...]
    # All timestep predictions with a single lane-dense matmul (N = T*D).
    pred_all = jnp.dot(c_t, wk_ref[...],
                       preferred_element_type=jnp.float32) + bk_ref[...]   # (B, T*D)

    rid = lax.broadcasted_iota(jnp.int32, (B, B), 0)
    cid = lax.broadcasted_iota(jnp.int32, (B, B), 1)
    col_ids = lax.broadcasted_iota(jnp.int32, (1, B), 1)

    nce_acc = jnp.zeros((1, 1), jnp.float32)
    for i in range(T):                                   # static unroll (timestep is small)
        pred = pred_all[:, i * D:(i + 1) * D]            # (B, D) lane-aligned slice
        enc = enc_ref[i]                                 # (B, D)
        # total[a, b] = enc[a] . pred[b]  ( == torch.mm(enc, pred.T) )
        total = lax.dot_general(enc, pred, (((1,), (1,)), ((), ())),
                                preferred_element_type=jnp.float32)        # (B, B)

        # NCE contribution: sum_a ( total[a, a] - logsumexp_b total[a, b] )
        row_max = jnp.max(total, axis=1, keepdims=True)
        lse = jnp.log(jnp.sum(jnp.exp(total - row_max), axis=1,
                              keepdims=True)) + row_max                    # (B, 1)
        diag = jnp.sum(jnp.where(rid == cid, total, 0.0),
                       axis=1, keepdims=True)                              # (B, 1)
        nce_acc = nce_acc + jnp.sum(diag - lse, axis=0, keepdims=True)     # (1, 1)

        # accuracy: argmax(softmax(total), dim=0) == arange(B)
        col_max = jnp.max(total, axis=0, keepdims=True)                    # (1, B)
        first_max_row = jnp.min(jnp.where(total >= col_max, rid, B),
                                axis=0, keepdims=True)                     # (1, B)
        cnt = jnp.sum((first_max_row == col_ids).astype(jnp.int32),
                      axis=1, keepdims=True)                               # (1, 1)
        corr_ref[pl.ds(i, 1), :] = cnt

    nce_ref[...] = nce_acc


def nce_head(encode_samples, c_t, wk_w, wk_b):
    T = encode_samples.shape[0]
    return pl.pallas_call(
        nce_kernel,
        out_shape=(jax.ShapeDtypeStruct((1, 1), jnp.float32),
                   jax.ShapeDtypeStruct((T, 1), jnp.int32)),
    )(encode_samples, c_t, wk_w, wk_b)


# ----------------------------------------------------------------------------
# Parameter init (deterministic, kaiming-normal fan_out style like the module)
# ----------------------------------------------------------------------------
def init_params(key, in_ch, conv_arch, hidden_gru, timestep, gru_in=256):
    keys = list(jax.random.split(key, 8))
    ki = iter(keys)
    params = {}

    conv = []
    c_in = in_ch
    for (num_convs, c_out) in conv_arch:
        for _ in range(num_convs):
            std = math.sqrt(2.0 / (c_out * 3))           # kaiming fan_out, k=3
            w = jax.random.normal(next(ki), (3, c_in, c_out), jnp.float32) * std
            b = jnp.zeros((1, c_out), jnp.float32)
            conv.append((w, b))
            c_in = c_out
    params["conv"] = conv

    H = hidden_gru
    g_std = math.sqrt(2.0 / (3 * H))                     # kaiming fan_out on (3H, in)
    params["gru_wih"] = jax.random.normal(next(ki), (gru_in, 3 * H), jnp.float32) * g_std
    params["gru_whh"] = jax.random.normal(next(ki), (H, 3 * H), jnp.float32) * g_std
    params["gru_bih"] = jnp.zeros((1, 3 * H), jnp.float32)
    params["gru_bhh"] = jnp.zeros((1, 3 * H), jnp.float32)

    wk_std = math.sqrt(2.0 / gru_in)                     # kaiming fan_out on (256, H)
    params["wk_w"] = jax.random.normal(next(ki), (H, timestep * gru_in), jnp.float32) * wk_std
    params["wk_b"] = jnp.zeros((1, timestep * gru_in), jnp.float32)
    return params


# ----------------------------------------------------------------------------
# Full G_enc.forward
# ----------------------------------------------------------------------------
@functools.partial(jax.jit, static_argnums=(3, 4))
def g_enc_forward(x, hidden, params, timestep, t_samples):
    """x: (B, 12, L) NCL (PyTorch layout). hidden: (1, B, H)."""
    batch = x.shape[0]

    # ----- encoder: vgg-style Conv1d+ReLU (Pallas) + MaxPool1d(2) (glue) -----
    h = jnp.transpose(x, (0, 2, 1))                     # NCL -> NLC
    for (w, b) in params["conv"]:
        xp = jnp.pad(h, ((0, 0), (1, 1), (0, 0)))       # conv padding=1 halo
        h = conv1d_relu(xp, w, b)                       # Pallas conv+bias+ReLU
        B, L, C = h.shape
        h = h.reshape(B, L // 2, 2, C).max(axis=2)      # MaxPool1d(2) glue
    z = h                                               # (B, T_out, 256) == encoder(x).transpose(1,2)

    encode_samples = jnp.stack(
        [z[:, t_samples + i, :] for i in range(1, timestep + 1)], axis=0)  # (T, B, D)
    forward_seq = z[:, : t_samples + 1, :]              # (B, t_samples+1, D)

    # ----- GRU (Pallas, in-kernel time loop, final hidden only) -----
    seq_tbD = jnp.transpose(forward_seq, (1, 0, 2))     # time-major (T_seq, B, D)
    c_t = gru_forward(seq_tbD, hidden[0],
                      params["gru_wih"], params["gru_whh"],
                      params["gru_bih"], params["gru_bhh"])   # (B, H) == output[:, t_samples, :]
    hidden_out = c_t[None]                              # final hidden (1, B, H), 1-layer unidirectional

    # ----- Wk linear + NCE + accuracy (Pallas, single invocation) -----
    nce_sum, correct = nce_head(encode_samples, c_t, params["wk_w"], params["wk_b"])
    nce = nce_sum[0, 0] / (-1.0 * batch * timestep)
    # device arrays (no host round-trip in the forward path)
    accuracies = correct[:, 0].astype(jnp.float32) / batch
    accuracy = accuracies[-1]
    return accuracy, nce, hidden_out, accuracies


# ----------------------------------------------------------------------------
if __name__ == "__main__":
    # Small shapes consistent with the module: x is (batch, 12, L)
    batch, in_ch, L = 2, 12, 64
    timestep, hidden_gru = 4, 32
    # conv_arch is a constructor argument; lane-dense channel counts, ending at 256
    # (the GRU input size required by the module). 3 pools -> T_out = L // 8 = 8.
    conv_arch = ((1, 128), (1, 128), (1, 256))

    key = jax.random.PRNGKey(0)
    k_x, k_p, k_t = jax.random.split(key, 3)

    x = jax.random.normal(k_x, (batch, in_ch, L), jnp.float32)
    hidden0 = jnp.zeros((1, batch, hidden_gru), jnp.float32)
    params = init_params(k_p, in_ch, conv_arch, hidden_gru, timestep)

    T_out = L // (2 ** len(conv_arch))
    # deterministic host-side stand-in for torch.randint(z.shape[-1] - timestep, size=(1,))
    t_samples = int(jax.random.randint(k_t, (), 0, T_out - timestep))

    accuracy, nce, hidden_out, accuracies = g_enc_forward(
        x, hidden0, params, timestep, t_samples)

    jax.block_until_ready((accuracy, nce, hidden_out, accuracies))
    print("KERNEL_OK")
</pallas_src>

<mosaic_0001>
module attributes {stable_mosaic.version = 11 : i64} {
  func.func @conv1d_k3_relu_kernel(%arg0: memref<2x66x12xf32, #tpu.memory_space<vmem>>, %arg1: memref<3x12x128xf32, #tpu.memory_space<vmem>>, %arg2: memref<1x128xf32, #tpu.memory_space<vmem>>, %arg3: memref<2x64x128xf32, #tpu.memory_space<vmem>>) attributes {dimension_semantics = [], scalar_prefetch = 0 : i64, scratch_operands = 0 : i64, tpu.core_type = #tpu.core_type<tc>} {
    %c0 = arith.constant 0 : index
    %c0_0 = arith.constant 0 : index
    %c0_1 = arith.constant 0 : index
    %0 = vector.load %arg1[%c0, %c0_0, %c0_1] : memref<3x12x128xf32, #tpu.memory_space<vmem>>, vector<1x12x128xf32>
    %1 = vector.shape_cast %0 : vector<1x12x128xf32> to vector<12x128xf32>
    %c1 = arith.constant 1 : index
    %c0_2 = arith.constant 0 : index
    %c0_3 = arith.constant 0 : index
    %2 = vector.load %arg1[%c1, %c0_2, %c0_3] : memref<3x12x128xf32, #tpu.memory_space<vmem>>, vector<1x12x128xf32>
    %3 = vector.shape_cast %2 : vector<1x12x128xf32> to vector<12x128xf32>
    %c2 = arith.constant 2 : index
    %c0_4 = arith.constant 0 : index
    %c0_5 = arith.constant 0 : index
    %4 = vector.load %arg1[%c2, %c0_4, %c0_5] : memref<3x12x128xf32, #tpu.memory_space<vmem>>, vector<1x12x128xf32>
    %5 = vector.shape_cast %4 : vector<1x12x128xf32> to vector<12x128xf32>
    %c0_6 = arith.constant 0 : index
    %c0_7 = arith.constant 0 : index
    %6 = vector.load %arg2[%c0_6, %c0_7] : memref<1x128xf32, #tpu.memory_space<vmem>>, vector<1x128xf32>
    %c0_8 = arith.constant 0 : index
    %c0_9 = arith.constant 0 : index
    %c0_10 = arith.constant 0 : index
    %7 = vector.load %arg0[%c0_8, %c0_9, %c0_10] : memref<2x66x12xf32, #tpu.memory_space<vmem>>, vector<1x64x12xf32>
    %8 = vector.shape_cast %7 : vector<1x64x12xf32> to vector<64x12xf32>
    %cst = arith.constant dense<0.000000e+00> : vector<64x128xf32>
    %9 = tpu.matmul %8, %1, %cst {dimension_numbers = #tpu.dot_dimension_numbers<[1], [0], [0], [1], [0, 0, 1, 1], [], []>} : vector<64x12xf32>, vector<12x128xf32>, vector<64x128xf32> -> vector<64x128xf32>
    %c0_11 = arith.constant 0 : index
    %c1_12 = arith.constant 1 : index
    %c0_13 = arith.constant 0 : index
    %10 = vector.load %arg0[%c0_11, %c1_12, %c0_13] : memref<2x66x12xf32, #tpu.memory_space<vmem>>, vector<1x64x12xf32>
    %11 = vector.shape_cast %10 : vector<1x64x12xf32> to vector<64x12xf32>
    %cst_14 = arith.constant dense<0.000000e+00> : vector<64x128xf32>
    %12 = tpu.matmul %11, %3, %cst_14 {dimension_numbers = #tpu.dot_dimension_numbers<[1], [0], [0], [1], [0, 0, 1, 1], [], []>} : vector<64x12xf32>, vector<12x128xf32>, vector<64x128xf32> -> vector<64x128xf32>
    %13 = arith.addf %9, %12 : vector<64x128xf32>
    %c0_15 = arith.constant 0 : index
    %c2_16 = arith.constant 2 : index
    %c0_17 = arith.constant 0 : index
    %14 = vector.load %arg0[%c0_15, %c2_16, %c0_17] : memref<2x66x12xf32, #tpu.memory_space<vmem>>, vector<1x64x12xf32>
    %15 = vector.shape_cast %14 : vector<1x64x12xf32> to vector<64x12xf32>
    %cst_18 = arith.constant dense<0.000000e+00> : vector<64x128xf32>
    %16 = tpu.matmul %15, %5, %cst_18 {dimension_numbers = #tpu.dot_dimension_numbers<[1], [0], [0], [1], [0, 0, 1, 1], [], []>} : vector<64x12xf32>, vector<12x128xf32>, vector<64x128xf32> -> vector<64x128xf32>
    %17 = arith.addf %13, %16 : vector<64x128xf32>
    %18 = vector.broadcast %6 : vector<1x128xf32> to vector<64x128xf32>
    %19 = arith.addf %17, %18 : vector<64x128xf32>
    %cst_19 = arith.constant 0.000000e+00 : f32
    %20 = vector.broadcast %cst_19 : f32 to vector<64x128xf32>
    %21 = arith.maximumf %19, %20 : vector<64x128xf32>
    %c0_20 = arith.constant 0 : index
    %c0_21 = arith.constant 0 : index
    %c0_22 = arith.constant 0 : index
    %22 = vector.load %arg3[%c0_20, %c0_21, %c0_22] : memref<2x64x128xf32, #tpu.memory_space<vmem>>, vector<1x64x128xf32>
    %23 = vector.shape_cast %22 : vector<1x64x128xf32> to vector<64x128xf32>
    %24 = vector.shape_cast %21 : vector<64x128xf32> to vector<1x64x128xf32>
    tpu.vector_store %arg3[%c0_20, %c0_21, %c0_22], %24 {strides = array<i32>} : memref<2x64x128xf32, #tpu.memory_space<vmem>>, vector<1x64x128xf32>,
    %c1_23 = arith.constant 1 : index
    %c0_24 = arith.constant 0 : index
    %c0_25 = arith.constant 0 : index
    %25 = vector.load %arg0[%c1_23, %c0_24, %c0_25] : memref<2x66x12xf32, #tpu.memory_space<vmem>>, vector<1x64x12xf32>
    %26 = vector.shape_cast %25 : vector<1x64x12xf32> to vector<64x12xf32>
    %cst_26 = arith.constant dense<0.000000e+00> : vector<64x128xf32>
    %27 = tpu.matmul %26, %1, %cst_26 {dimension_numbers = #tpu.dot_dimension_numbers<[1], [0], [0], [1], [0, 0, 1, 1], [], []>} : vector<64x12xf32>, vector<12x128xf32>, vector<64x128xf32> -> vector<64x128xf32>
    %c1_27 = arith.constant 1 : index
    %c1_28 = arith.constant 1 : index
    %c0_29 = arith.constant 0 : index
    %28 = vector.load %arg0[%c1_27, %c1_28, %c0_29] : memref<2x66x12xf32, #tpu.memory_space<vmem>>, vector<1x64x12xf32>
    %29 = vector.shape_cast %28 : vector<1x64x12xf32> to vector<64x12xf32>
    %cst_30 = arith.constant dense<0.000000e+00> : vector<64x128xf32>
    %30 = tpu.matmul %29, %3, %cst_30 {dimension_numbers = #tpu.dot_dimension_numbers<[1], [0], [0], [1], [0, 0, 1, 1], [], []>} : vector<64x12xf32>, vector<12x128xf32>, vector<64x128xf32> -> vector<64x128xf32>
    %31 = arith.addf %27, %30 : vector<64x128xf32>
    %c1_31 = arith.constant 1 : index
    %c2_32 = arith.constant 2 : index
    %c0_33 = arith.constant 0 : index
    %32 = vector.load %arg0[%c1_31, %c2_32, %c0_33] : memref<2x66x12xf32, #tpu.memory_space<vmem>>, vector<1x64x12xf32>
    %33 = vector.shape_cast %32 : vector<1x64x12xf32> to vector<64x12xf32>
    %cst_34 = arith.constant dense<0.000000e+00> : vector<64x128xf32>
    %34 = tpu.matmul %33, %5, %cst_34 {dimension_numbers = #tpu.dot_dimension_numbers<[1], [0], [0], [1], [0, 0, 1, 1], [], []>} : vector<64x12xf32>, vector<12x128xf32>, vector<64x128xf32> -> vector<64x128xf32>
    %35 = arith.addf %31, %34 : vector<64x128xf32>
    %36 = vector.broadcast %6 : vector<1x128xf32> to vector<64x128xf32>
    %37 = arith.addf %35, %36 : vector<64x128xf32>
    %cst_35 = arith.constant 0.000000e+00 : f32
    %38 = vector.broadcast %cst_35 : f32 to vector<64x128xf32>
    %39 = arith.maximumf %37, %38 : vector<64x128xf32>
    %c1_36 = arith.constant 1 : index
    %c0_37 = arith.constant 0 : index
    %c0_38 = arith.constant 0 : index
    %40 = vector.load %arg3[%c1_36, %c0_37, %c0_38] : memref<2x64x128xf32, #tpu.memory_space<vmem>>, vector<1x64x128xf32>
    %41 = vector.shape_cast %40 : vector<1x64x128xf32> to vector<64x128xf32>
    %42 = vector.shape_cast %39 : vector<64x128xf32> to vector<1x64x128xf32>
    tpu.vector_store %arg3[%c1_36, %c0_37, %c0_38], %42 {strides = array<i32>} : memref<2x64x128xf32, #tpu.memory_space<vmem>>, vector<1x64x128xf32>,
    return
  }
}

module attributes {stable_mosaic.version = 11 : i64} {
  func.func @conv1d_k3_relu_kernel(%arg0: memref<2x34x128xf32, #tpu.memory_space<vmem>>, %arg1: memref<3x128x128xf32, #tpu.memory_space<vmem>>, %arg2: memref<1x128xf32, #tpu.memory_space<vmem>>, %arg3: memref<2x32x128xf32, #tpu.memory_space<vmem>>) attributes {dimension_semantics = [], scalar_prefetch = 0 : i64, scratch_operands = 0 : i64, tpu.core_type = #tpu.core_type<tc>} {
    %c0 = arith.constant 0 : index
    %c0_0 = arith.constant 0 : index
    %c0_1 = arith.constant 0 : index
    %0 = vector.load %arg1[%c0, %c0_0, %c0_1] : memref<3x128x128xf32, #tpu.memory_space<vmem>>, vector<1x128x128xf32>
    %1 = vector.shape_cast %0 : vector<1x128x128xf32> to vector<128x128xf32>
    %c1 = arith.constant 1 : index
    %c0_2 = arith.constant 0 : index
    %c0_3 = arith.constant 0 : index
    %2 = vector.load %arg1[%c1, %c0_2, %c0_3] : memref<3x128x128xf32, #tpu.memory_space<vmem>>, vector<1x128x128xf32>
    %3 = vector.shape_cast %2 : vector<1x128x128xf32> to vector<128x128xf32>
    %c2 = arith.constant 2 : index
    %c0_4 = arith.constant 0 : index
    %c0_5 = arith.constant 0 : index
    %4 = vector.load %arg1[%c2, %c0_4, %c0_5] : memref<3x128x128xf32, #tpu.memory_space<vmem>>, vector<1x128x128xf32>
    %5 = vector.shape_cast %4 : vector<1x128x128xf32> to vector<128x128xf32>
    %c0_6 = arith.constant 0 : index
    %c0_7 = arith.constant 0 : index
    %6 = vector.load %arg2[%c0_6, %c0_7] : memref<1x128xf32, #tpu.memory_space<vmem>>, vector<1x128xf32>
    %c0_8 = arith.constant 0 : index
    %c0_9 = arith.constant 0 : index
    %c0_10 = arith.constant 0 : index
    %7 = vector.load %arg0[%c0_8, %c0_9, %c0_10] : memref<2x34x128xf32, #tpu.memory_space<vmem>>, vector<1x32x128xf32>
    %8 = vector.shape_cast %7 : vector<1x32x128xf32> to vector<32x128xf32>
    %cst = arith.constant dense<0.000000e+00> : vector<32x128xf32>
    %9 = tpu.matmul %8, %1, %cst {dimension_numbers = #tpu.dot_dimension_numbers<[1], [0], [0], [1], [0, 0, 1, 1], [], []>} : vector<32x128xf32>, vector<128x128xf32>, vector<32x128xf32> -> vector<32x128xf32>
    %c0_11 = arith.constant 0 : index
    %c1_12 = arith.constant 1 : index
    %c0_13 = arith.constant 0 : index
    %10 = vector.load %arg0[%c0_11, %c1_12, %c0_13] : memref<2x34x128xf32, #tpu.memory_space<vmem>>, vector<1x32x128xf32>
    %11 = vector.shape_cast %10 : vector<1x32x128xf32> to vector<32x128xf32>
    %cst_14 = arith.constant dense<0.000000e+00> : vector<32x128xf32>
    %12 = tpu.matmul %11, %3, %cst_14 {dimension_numbers = #tpu.dot_dimension_numbers<[1], [0], [0], [1], [0, 0, 1, 1], [], []>} : vector<32x128xf32>, vector<128x128xf32>, vector<32x128xf32> -> vector<32x128xf32>
    %13 = arith.addf %9, %12 : vector<32x128xf32>
    %c0_15 = arith.constant 0 : index
    %c2_16 = arith.constant 2 : index
    %c0_17 = arith.constant 0 : index
    %14 = vector.load %arg0[%c0_15, %c2_16, %c0_17] : memref<2x34x128xf32, #tpu.memory_space<vmem>>, vector<1x32x128xf32>
    %15 = vector.shape_cast %14 : vector<1x32x128xf32> to vector<32x128xf32>
    %cst_18 = arith.constant dense<0.000000e+00> : vector<32x128xf32>
    %16 = tpu.matmul %15, %5, %cst_18 {dimension_numbers = #tpu.dot_dimension_numbers<[1], [0], [0], [1], [0, 0, 1, 1], [], []>} : vector<32x128xf32>, vector<128x128xf32>, vector<32x128xf32> -> vector<32x128xf32>
    %17 = arith.addf %13, %16 : vector<32x128xf32>
    %18 = vector.broadcast %6 : vector<1x128xf32> to vector<32x128xf32>
    %19 = arith.addf %17, %18 : vector<32x128xf32>
    %cst_19 = arith.constant 0.000000e+00 : f32
    %20 = vector.broadcast %cst_19 : f32 to vector<32x128xf32>
    %21 = arith.maximumf %19, %20 : vector<32x128xf32>
    %c0_20 = arith.constant 0 : index
    %c0_21 = arith.constant 0 : index
    %c0_22 = arith.constant 0 : index
    %22 = vector.load %arg3[%c0_20, %c0_21, %c0_22] : memref<2x32x128xf32, #tpu.memory_space<vmem>>, vector<1x32x128xf32>
    %23 = vector.shape_cast %22 : vector<1x32x128xf32> to vector<32x128xf32>
    %24 = vector.shape_cast %21 : vector<32x128xf32> to vector<1x32x128xf32>
    tpu.vector_store %arg3[%c0_20, %c0_21, %c0_22], %24 {strides = array<i32>} : memref<2x32x128xf32, #tpu.memory_space<vmem>>, vector<1x32x128xf32>,
    %c1_23 = arith.constant 1 : index
    %c0_24 = arith.constant 0 : index
    %c0_25 = arith.constant 0 : index
    %25 = vector.load %arg0[%c1_23, %c0_24, %c0_25] : memref<2x34x128xf32, #tpu.memory_space<vmem>>, vector<1x32x128xf32>
    %26 = vector.shape_cast %25 : vector<1x32x128xf32> to vector<32x128xf32>
    %cst_26 = arith.constant dense<0.000000e+00> : vector<32x128xf32>
    %27 = tpu.matmul %26, %1, %cst_26 {dimension_numbers = #tpu.dot_dimension_numbers<[1], [0], [0], [1], [0, 0, 1, 1], [], []>} : vector<32x128xf32>, vector<128x128xf32>, vector<32x128xf32> -> vector<32x128xf32>
    %c1_27 = arith.constant 1 : index
    %c1_28 = arith.constant 1 : index
    %c0_29 = arith.constant 0 : index
    %28 = vector.load %arg0[%c1_27, %c1_28, %c0_29] : memref<2x34x128xf32, #tpu.memory_space<vmem>>, vector<1x32x128xf32>
    %29 = vector.shape_cast %28 : vector<1x32x128xf32> to vector<32x128xf32>
    %cst_30 = arith.constant dense<0.000000e+00> : vector<32x128xf32>
    %30 = tpu.matmul %29, %3, %cst_30 {dimension_numbers = #tpu.dot_dimension_numbers<[1], [0], [0], [1], [0, 0, 1, 1], [], []>} : vector<32x128xf32>, vector<128x128xf32>, vector<32x128xf32> -> vector<32x128xf32>
    %31 = arith.addf %27, %30 : vector<32x128xf32>
    %c1_31 = arith.constant 1 : index
    %c2_32 = arith.constant 2 : index
    %c0_33 = arith.constant 0 : index
    %32 = vector.load %arg0[%c1_31, %c2_32, %c0_33] : memref<2x34x128xf32, #tpu.memory_space<vmem>>, vector<1x32x128xf32>
    %33 = vector.shape_cast %32 : vector<1x32x128xf32> to vector<32x128xf32>
    %cst_34 = arith.constant dense<0.000000e+00> : vector<32x128xf32>
    %34 = tpu.matmul %33, %5, %cst_34 {dimension_numbers = #tpu.dot_dimension_numbers<[1], [0], [0], [1], [0, 0, 1, 1], [], []>} : vector<32x128xf32>, vector<128x128xf32>, vector<32x128xf32> -> vector<32x128xf32>
    %35 = arith.addf %31, %34 : vector<32x128xf32>
    %36 = vector.broadcast %6 : vector<1x128xf32> to vector<32x128xf32>
    %37 = arith.addf %35, %36 : vector<32x128xf32>
    %cst_35 = arith.constant 0.000000e+00 : f32
    %38 = vector.broadcast %cst_35 : f32 to vector<32x128xf32>
    %39 = arith.maximumf %37, %38 : vector<32x128xf32>
    %c1_36 = arith.constant 1 : index
    %c0_37 = arith.constant 0 : index
    %c0_38 = arith.constant 0 : index
    %40 = vector.load %arg3[%c1_36, %c0_37, %c0_38] : memref<2x32x128xf32, #tpu.memory_space<vmem>>, vector<1x32x128xf32>
    %41 = vector.shape_cast %40 : vector<1x32x128xf32> to vector<32x128xf32>
    %42 = vector.shape_cast %39 : vector<32x128xf32> to vector<1x32x128xf32>
    tpu.vector_store %arg3[%c1_36, %c0_37, %c0_38], %42 {strides = array<i32>} : memref<2x32x128xf32, #tpu.memory_space<vmem>>, vector<1x32x128xf32>,
    return
  }
}

module attributes {stable_mosaic.version = 11 : i64} {
  func.func @conv1d_k3_relu_kernel(%arg0: memref<2x18x128xf32, #tpu.memory_space<vmem>>, %arg1: memref<3x128x256xf32, #tpu.memory_space<vmem>>, %arg2: memref<1x256xf32, #tpu.memory_space<vmem>>, %arg3: memref<2x16x256xf32, #tpu.memory_space<vmem>>) attributes {dimension_semantics = [], scalar_prefetch = 0 : i64, scratch_operands = 0 : i64, tpu.core_type = #tpu.core_type<tc>} {
    %c0 = arith.constant 0 : index
    %c0_0 = arith.constant 0 : index
    %c0_1 = arith.constant 0 : index
    %0 = vector.load %arg1[%c0, %c0_0, %c0_1] : memref<3x128x256xf32, #tpu.memory_space<vmem>>, vector<1x128x256xf32>
    %1 = vector.shape_cast %0 : vector<1x128x256xf32> to vector<128x256xf32>
    %c1 = arith.constant 1 : index
    %c0_2 = arith.constant 0 : index
    %c0_3 = arith.constant 0 : index
    %2 = vector.load %arg1[%c1, %c0_2, %c0_3] : memref<3x128x256xf32, #tpu.memory_space<vmem>>, vector<1x128x256xf32>
    %3 = vector.shape_cast %2 : vector<1x128x256xf32> to vector<128x256xf32>
    %c2 = arith.constant 2 : index
    %c0_4 = arith.constant 0 : index
    %c0_5 = arith.constant 0 : index
    %4 = vector.load %arg1[%c2, %c0_4, %c0_5] : memref<3x128x256xf32, #tpu.memory_space<vmem>>, vector<1x128x256xf32>
    %5 = vector.shape_cast %4 : vector<1x128x256xf32> to vector<128x256xf32>
    %c0_6 = arith.constant 0 : index
    %c0_7 = arith.constant 0 : index
    %6 = vector.load %arg2[%c0_6, %c0_7] : memref<1x256xf32, #tpu.memory_space<vmem>>, vector<1x256xf32>
    %c0_8 = arith.constant 0 : index
    %c0_9 = arith.constant 0 : index
    %c0_10 = arith.constant 0 : index
    %7 = vector.load %arg0[%c0_8, %c0_9, %c0_10] : memref<2x18x128xf32, #tpu.memory_space<vmem>>, vector<1x16x128xf32>
    %8 = vector.shape_cast %7 : vector<1x16x128xf32> to vector<16x128xf32>
    %cst = arith.constant dense<0.000000e+00> : vector<16x256xf32>
    %9 = tpu.matmul %8, %1, %cst {dimension_numbers = #tpu.dot_dimension_numbers<[1], [0], [0], [1], [0, 0, 1, 1], [], []>} : vector<16x128xf32>, vector<128x256xf32>, vector<16x256xf32> -> vector<16x256xf32>
    %c0_11 = arith.constant 0 : index
    %c1_12 = arith.constant 1 : index
    %c0_13 = arith.constant 0 : index
    %10 = vector.load %arg0[%c0_11, %c1_12, %c0_13] : memref<2x18x128xf32, #tpu.memory_space<vmem>>, vector<1x16x128xf32>
    %11 = vector.shape_cast %10 : vector<1x16x128xf32> to vector<16x128xf32>
    %cst_14 = arith.constant dense<0.000000e+00> : vector<16x256xf32>
    %12 = tpu.matmul %11, %3, %cst_14 {dimension_numbers = #tpu.dot_dimension_numbers<[1], [0], [0], [1], [0, 0, 1, 1], [], []>} : vector<16x128xf32>, vector<128x256xf32>, vector<16x256xf32> -> vector<16x256xf32>
    %13 = arith.addf %9, %12 : vector<16x256xf32>
    %c0_15 = arith.constant 0 : index
    %c2_16 = arith.constant 2 : index
    %c0_17 = arith.constant 0 : index
    %14 = vector.load %arg0[%c0_15, %c2_16, %c0_17] : memref<2x18x128xf32, #tpu.memory_space<vmem>>, vector<1x16x128xf32>
    %15 = vector.shape_cast %14 : vector<1x16x128xf32> to vector<16x128xf32>
    %cst_18 = arith.constant dense<0.000000e+00> : vector<16x256xf32>
    %16 = tpu.matmul %15, %5, %cst_18 {dimension_numbers = #tpu.dot_dimension_numbers<[1], [0], [0], [1], [0, 0, 1, 1], [], []>} : vector<16x128xf32>, vector<128x256xf32>, vector<16x256xf32> -> vector<16x256xf32>
    %17 = arith.addf %13, %16 : vector<16x256xf32>
    %18 = vector.broadcast %6 : vector<1x256xf32> to vector<16x256xf32>
    %19 = arith.addf %17, %18 : vector<16x256xf32>
    %cst_19 = arith.constant 0.000000e+00 : f32
    %20 = vector.broadcast %cst_19 : f32 to vector<16x256xf32>
    %21 = arith.maximumf %19, %20 : vector<16x256xf32>
    %c0_20 = arith.constant 0 : index
    %c0_21 = arith.constant 0 : index
    %c0_22 = arith.constant 0 : index
    %22 = vector.load %arg3[%c0_20, %c0_21, %c0_22] : memref<2x16x256xf32, #tpu.memory_space<vmem>>, vector<1x16x256xf32>
    %23 = vector.shape_cast %22 : vector<1x16x256xf32> to vector<16x256xf32>
    %24 = vector.shape_cast %21 : vector<16x256xf32> to vector<1x16x256xf32>
    tpu.vector_store %arg3[%c0_20, %c0_21, %c0_22], %24 {strides = array<i32>} : memref<2x16x256xf32, #tpu.memory_space<vmem>>, vector<1x16x256xf32>,
    %c1_23 = arith.constant 1 : index
    %c0_24 = arith.constant 0 : index
    %c0_25 = arith.constant 0 : index
    %25 = vector.load %arg0[%c1_23, %c0_24, %c0_25] : memref<2x18x128xf32, #tpu.memory_space<vmem>>, vector<1x16x128xf32>
    %26 = vector.shape_cast %25 : vector<1x16x128xf32> to vector<16x128xf32>
    %cst_26 = arith.constant dense<0.000000e+00> : vector<16x256xf32>
    %27 = tpu.matmul %26, %1, %cst_26 {dimension_numbers = #tpu.dot_dimension_numbers<[1], [0], [0], [1], [0, 0, 1, 1], [], []>} : vector<16x128xf32>, vector<128x256xf32>, vector<16x256xf32> -> vector<16x256xf32>
    %c1_27 = arith.constant 1 : index
    %c1_28 = arith.constant 1 : index
    %c0_29 = arith.constant 0 : index
    %28 = vector.load %arg0[%c1_27, %c1_28, %c0_29] : memref<2x18x128xf32, #tpu.memory_space<vmem>>, vector<1x16x128xf32>
    %29 = vector.shape_cast %28 : vector<1x16x128xf32> to vector<16x128xf32>
    %cst_30 = arith.constant dense<0.000000e+00> : vector<16x256xf32>
    %30 = tpu.matmul %29, %3, %cst_30 {dimension_numbers = #tpu.dot_dimension_numbers<[1], [0], [0], [1], [0, 0, 1, 1], [], []>} : vector<16x128xf32>, vector<128x256xf32>, vector<16x256xf32> -> vector<16x256xf32>
    %31 = arith.addf %27, %30 : vector<16x256xf32>
    %c1_31 = arith.constant 1 : index
    %c2_32 = arith.constant 2 : index
    %c0_33 = arith.constant 0 : index
    %32 = vector.load %arg0[%c1_31, %c2_32, %c0_33] : memref<2x18x128xf32, #tpu.memory_space<vmem>>, vector<1x16x128xf32>
    %33 = vector.shape_cast %32 : vector<1x16x128xf32> to vector<16x128xf32>
    %cst_34 = arith.constant dense<0.000000e+00> : vector<16x256xf32>
    %34 = tpu.matmul %33, %5, %cst_34 {dimension_numbers = #tpu.dot_dimension_numbers<[1], [0], [0], [1], [0, 0, 1, 1], [], []>} : vector<16x128xf32>, vector<128x256xf32>, vector<16x256xf32> -> vector<16x256xf32>
    %35 = arith.addf %31, %34 : vector<16x256xf32>
    %36 = vector.broadcast %6 : vector<1x256xf32> to vector<16x256xf32>
    %37 = arith.addf %35, %36 : vector<16x256xf32>
    %cst_35 = arith.constant 0.000000e+00 : f32
    %38 = vector.broadcast %cst_35 : f32 to vector<16x256xf32>
    %39 = arith.maximumf %37, %38 : vector<16x256xf32>
    %c1_36 = arith.constant 1 : index
    %c0_37 = arith.constant 0 : index
    %c0_38 = arith.constant 0 : index
    %40 = vector.load %arg3[%c1_36, %c0_37, %c0_38] : memref<2x16x256xf32, #tpu.memory_space<vmem>>, vector<1x16x256xf32>
    %41 = vector.shape_cast %40 : vector<1x16x256xf32> to vector<16x256xf32>
    %42 = vector.shape_cast %39 : vector<16x256xf32> to vector<1x16x256xf32>
    tpu.vector_store %arg3[%c1_36, %c0_37, %c0_38], %42 {strides = array<i32>} : memref<2x16x256xf32, #tpu.memory_space<vmem>>, vector<1x16x256xf32>,
    return
  }
}

module attributes {stable_mosaic.version = 11 : i64} {
  func.func @gru_kernel(%arg0: memref<32x256xf32, #tpu.memory_space<vmem>>, %arg1: memref<8x32xf32, #tpu.memory_space<vmem>>, %arg2: memref<256x96xf32, #tpu.memory_space<vmem>>, %arg3: memref<32x96xf32, #tpu.memory_space<vmem>>, %arg4: memref<1x96xf32, #tpu.memory_space<vmem>>, %arg5: memref<1x96xf32, #tpu.memory_space<vmem>>, %arg6: memref<2x32xf32, #tpu.memory_space<vmem>>, %arg7: memref<32x96xf32, #tpu.memory_space<vmem>>) attributes {dimension_semantics = [], scalar_prefetch = 0 : i64, scratch_operands = 1 : i64, tpu.core_type = #tpu.core_type<tc>} {
    %c0 = arith.constant 0 : index
    %c0_0 = arith.constant 0 : index
    %0 = vector.load %arg0[%c0, %c0_0] : memref<32x256xf32, #tpu.memory_space<vmem>>, vector<32x256xf32>
    %c0_1 = arith.constant 0 : index
    %c0_2 = arith.constant 0 : index
    %1 = vector.load %arg2[%c0_1, %c0_2] : memref<256x96xf32, #tpu.memory_space<vmem>>, vector<256x96xf32>
    %cst = arith.constant dense<0.000000e+00> : vector<32x96xf32>
    %2 = tpu.matmul %0, %1, %cst {dimension_numbers = #tpu.dot_dimension_numbers<[1], [0], [0], [1], [0, 0, 1, 1], [], []>} : vector<32x256xf32>, vector<256x96xf32>, vector<32x96xf32> -> vector<32x96xf32>
    %c0_3 = arith.constant 0 : index
    %c0_4 = arith.constant 0 : index
    %3 = vector.load %arg4[%c0_3, %c0_4] : memref<1x96xf32, #tpu.memory_space<vmem>>, vector<1x96xf32>
    %4 = vector.broadcast %3 : vector<1x96xf32> to vector<32x96xf32>
    %5 = arith.addf %2, %4 : vector<32x96xf32>
    %c0_5 = arith.constant 0 : index
    %c0_6 = arith.constant 0 : index
    %6 = vector.load %arg7[%c0_5, %c0_6] : memref<32x96xf32, #tpu.memory_space<vmem>>, vector<32x96xf32>
    tpu.vector_store %arg7[%c0_5, %c0_6], %5 {strides = array<i32>} : memref<32x96xf32, #tpu.memory_space<vmem>>, vector<32x96xf32>,
    %c0_7 = arith.constant 0 : index
    %c0_8 = arith.constant 0 : index
    %7 = vector.load %arg3[%c0_7, %c0_8] : memref<32x96xf32, #tpu.memory_space<vmem>>, vector<32x96xf32>
    %c0_9 = arith.constant 0 : index
    %c0_10 = arith.constant 0 : index
    %8 = vector.load %arg5[%c0_9, %c0_10] : memref<1x96xf32, #tpu.memory_space<vmem>>, vector<1x96xf32>
    %c0_11 = arith.constant 0 : index
    %c0_12 = arith.constant 0 : index
    %9 = vector.load %arg1[%c0_11, %c0_12] : memref<8x32xf32, #tpu.memory_space<vmem>>, vector<8x32xf32>
    %c0_i32 = arith.constant 0 : i32
    %c4_i32 = arith.constant 4 : i32
    %10 = arith.addi %c0_i32, %c4_i32 : i32
    %c1_i32 = arith.constant 1 : i32
    %11 = scf.for %arg8 = %c0_i32 to %10 step %c1_i32 iter_args(%arg9 = %9) -> (vector<8x32xf32>)  : i32 {
      %c8_i32 = arith.constant 8 : i32
      %14 = arith.muli %arg8, %c8_i32 : i32
      %15 = tpu.assume_multiple %14, 8 : i32
      %16 = arith.index_cast %15 : i32 to index
      %c0_16 = arith.constant 0 : index
      %17 = vector.load %arg7[%16, %c0_16] : memref<32x96xf32, #tpu.memory_space<vmem>>, vector<8x96xf32>
      %cst_17 = arith.constant dense<0.000000e+00> : vector<8x96xf32>
      %18 = tpu.matmul %arg9, %7, %cst_17 {dimension_numbers = #tpu.dot_dimension_numbers<[1], [0], [0], [1], [0, 0, 1, 1], [], []>} : vector<8x32xf32>, vector<32x96xf32>, vector<8x96xf32> -> vector<8x96xf32>
      %19 = vector.broadcast %8 : vector<1x96xf32> to vector<8x96xf32>
      %20 = arith.addf %18, %19 : vector<8x96xf32>
      %21 = vector.extract_strided_slice %17 {offsets = [0, 0], sizes = [8, 32], strides = [1, 1]} : vector<8x96xf32> to vector<8x32xf32>
      %22 = vector.extract_strided_slice %20 {offsets = [0, 0], sizes = [8, 32], strides = [1, 1]} : vector<8x96xf32> to vector<8x32xf32>
      %23 = arith.addf %21, %22 : vector<8x32xf32>
      %24 = arith.negf %23 : vector<8x32xf32>
      %25 = math.exp %24 : vector<8x32xf32>
      %cst_18 = arith.constant 1.000000e+00 : f32
      %26 = vector.broadcast %cst_18 : f32 to vector<8x32xf32>
      %27 = arith.addf %26, %25 : vector<8x32xf32>
      %28 = arith.divf %26, %27 : vector<8x32xf32>
      %29 = vector.extract_strided_slice %17 {offsets = [0, 32], sizes = [8, 32], strides = [1, 1]} : vector<8x96xf32> to vector<8x32xf32>
      %30 = vector.extract_strided_slice %20 {offsets = [0, 32], sizes = [8, 32], strides = [1, 1]} : vector<8x96xf32> to vector<8x32xf32>
      %31 = arith.addf %29, %30 : vector<8x32xf32>
      %32 = arith.negf %31 : vector<8x32xf32>
      %33 = math.exp %32 : vector<8x32xf32>
      %cst_19 = arith.constant 1.000000e+00 : f32
      %34 = vector.broadcast %cst_19 : f32 to vector<8x32xf32>
      %35 = arith.addf %34, %33 : vector<8x32xf32>
      %36 = arith.divf %34, %35 : vector<8x32xf32>
      %37 = vector.extract_strided_slice %17 {offsets = [0, 64], sizes = [8, 32], strides = [1, 1]} : vector<8x96xf32> to vector<8x32xf32>
      %38 = vector.extract_strided_slice %20 {offsets = [0, 64], sizes = [8, 32], strides = [1, 1]} : vector<8x96xf32> to vector<8x32xf32>
      %39 = arith.mulf %28, %38 : vector<8x32xf32>
      %40 = arith.addf %37, %39 : vector<8x32xf32>
      %41 = math.tanh %40 : vector<8x32xf32>
      %cst_20 = arith.constant 1.000000e+00 : f32
      %42 = vector.broadcast %cst_20 : f32 to vector<8x32xf32>
      %43 = arith.subf %42, %36 : vector<8x32xf32>
      %44 = arith.mulf %43, %41 : vector<8x32xf32>
      %45 = arith.mulf %36, %arg9 : vector<8x32xf32>
      %46 = arith.addf %44, %45 : vector<8x32xf32>
      scf.yield %46 : vector<8x32xf32>
    }
    %c4_i32_13 = arith.constant 4 : i32
    %12 = vector.extract_strided_slice %11 {offsets = [0, 0], sizes = [2, 32], strides = [1, 1]} : vector<8x32xf32> to vector<2x32xf32>
    %c0_14 = arith.constant 0 : index
    %c0_15 = arith.constant 0 : index
    %13 = vector.load %arg6[%c0_14, %c0_15] : memref<2x32xf32, #tpu.memory_space<vmem>>, vector<2x32xf32>
    tpu.vector_store %arg6[%c0_14, %c0_15], %12 {strides = array<i32>} : memref<2x32xf32, #tpu.memory_space<vmem>>, vector<2x32xf32>,
    return
  }
}

module attributes {stable_mosaic.version = 11 : i64} {
  func.func @nce_kernel(%arg0: memref<4x2x256xf32, #tpu.memory_space<vmem>>, %arg1: memref<2x32xf32, #tpu.memory_space<vmem>>, %arg2: memref<32x1024xf32, #tpu.memory_space<vmem>>, %arg3: memref<1x1024xf32, #tpu.memory_space<vmem>>, %arg4: memref<1x1xf32, #tpu.memory_space<vmem>>, %arg5: memref<4x1xi32, #tpu.memory_space<vmem>>) attributes {dimension_semantics = [], scalar_prefetch = 0 : i64, scratch_operands = 0 : i64, tpu.core_type = #tpu.core_type<tc>} {
    %c0 = arith.constant 0 : index
    %c0_0 = arith.constant 0 : index
    %0 = vector.load %arg1[%c0, %c0_0] : memref<2x32xf32, #tpu.memory_space<vmem>>, vector<2x32xf32>
    %c0_1 = arith.constant 0 : index
    %c0_2 = arith.constant 0 : index
    %1 = vector.load %arg2[%c0_1, %c0_2] : memref<32x1024xf32, #tpu.memory_space<vmem>>, vector<32x1024xf32>
    %cst = arith.constant dense<0.000000e+00> : vector<2x1024xf32>
    %2 = tpu.matmul %0, %1, %cst {dimension_numbers = #tpu.dot_dimension_numbers<[1], [0], [0], [1], [0, 0, 1, 1], [], []>} : vector<2x32xf32>, vector<32x1024xf32>, vector<2x1024xf32> -> vector<2x1024xf32>
    %c0_3 = arith.constant 0 : index
    %c0_4 = arith.constant 0 : index
    %3 = vector.load %arg3[%c0_3, %c0_4] : memref<1x1024xf32, #tpu.memory_space<vmem>>, vector<1x1024xf32>
    %4 = vector.broadcast %3 : vector<1x1024xf32> to vector<2x1024xf32>
    %5 = arith.addf %2, %4 : vector<2x1024xf32>
    %6 = tpu.iota {dimensions = array<i32: 0>} : vector<2x2xi32>
    %7 = tpu.iota {dimensions = array<i32: 1>} : vector<2x2xi32>
    %8 = tpu.iota {dimensions = array<i32: 1>} : vector<1x2xi32>
    %cst_5 = arith.constant 0.000000e+00 : f32
    %9 = vector.broadcast %cst_5 : f32 to vector<1x1xf32>
    %10 = vector.extract_strided_slice %5 {offsets = [0, 0], sizes = [2, 256], strides = [1, 1]} : vector<2x1024xf32> to vector<2x256xf32>
    %c0_6 = arith.constant 0 : index
    %c0_7 = arith.constant 0 : index
    %c0_8 = arith.constant 0 : index
    %11 = vector.load %arg0[%c0_6, %c0_7, %c0_8] : memref<4x2x256xf32, #tpu.memory_space<vmem>>, vector<1x2x256xf32>
    %12 = vector.shape_cast %11 : vector<1x2x256xf32> to vector<2x256xf32>
    %cst_9 = arith.constant dense<0.000000e+00> : vector<2x2xf32>
    %13 = tpu.matmul %12, %10, %cst_9 {dimension_numbers = #tpu.dot_dimension_numbers<[1], [1], [0], [0], [0, 0, 1, 0], [], []>} : vector<2x256xf32>, vector<2x256xf32>, vector<2x2xf32> -> vector<2x2xf32>
    %cst_10 = arith.constant dense<0xFF800000> : vector<2xf32>
    %14 = vector.multi_reduction <maximumf>, %13, %cst_10 [1] : vector<2x2xf32> to vector<2xf32>
    %15 = vector.shape_cast %14 : vector<2xf32> to vector<2x1xf32>
    %16 = vector.broadcast %15 : vector<2x1xf32> to vector<2x2xf32>
    %17 = arith.subf %13, %16 : vector<2x2xf32>
    %18 = math.exp %17 : vector<2x2xf32>
    %cst_11 = arith.constant dense<0.000000e+00> : vector<2xf32>
    %19 = vector.multi_reduction <add>, %18, %cst_11 [1] : vector<2x2xf32> to vector<2xf32>
    %20 = vector.shape_cast %19 : vector<2xf32> to vector<2x1xf32>
    %21 = math.log %20 : vector<2x1xf32>
    %22 = arith.addf %21, %15 : vector<2x1xf32>
    %23 = arith.cmpi eq, %6, %7 : vector<2x2xi32>
    %cst_12 = arith.constant 0.000000e+00 : f32
    %24 = vector.broadcast %cst_12 : f32 to vector<2x2xf32>
    %25 = arith.select %23, %13, %24 : vector<2x2xi1>, vector<2x2xf32>
    %cst_13 = arith.constant dense<0.000000e+00> : vector<2xf32>
    %26 = vector.multi_reduction <add>, %25, %cst_13 [1] : vector<2x2xf32> to vector<2xf32>
    %27 = vector.shape_cast %26 : vector<2xf32> to vector<2x1xf32>
    %28 = arith.subf %27, %22 : vector<2x1xf32>
    %cst_14 = arith.constant dense<0.000000e+00> : vector<1xf32>
    %29 = vector.multi_reduction <add>, %28, %cst_14 [0] : vector<2x1xf32> to vector<1xf32>
    %30 = vector.shape_cast %29 : vector<1xf32> to vector<1x1xf32>
    %31 = arith.addf %9, %30 : vector<1x1xf32>
    %cst_15 = arith.constant dense<0xFF800000> : vector<2xf32>
    %32 = vector.multi_reduction <maximumf>, %13, %cst_15 [0] : vector<2x2xf32> to vector<2xf32>
    %33 = vector.shape_cast %32 : vector<2xf32> to vector<1x2xf32>
    %34 = vector.broadcast %33 : vector<1x2xf32> to vector<2x2xf32>
    %35 = arith.cmpf oge, %13, %34 : vector<2x2xf32>
    %c2_i32 = arith.constant 2 : i32
    %36 = vector.broadcast %c2_i32 : i32 to vector<2x2xi32>
    %37 = arith.select %35, %6, %36 : vector<2x2xi1>, vector<2x2xi32>
    %cst_16 = arith.constant dense<2147483647> : vector<2xi32>
    %38 = vector.multi_reduction <minsi>, %37, %cst_16 [0] : vector<2x2xi32> to vector<2xi32>
    %39 = vector.shape_cast %38 : vector<2xi32> to vector<1x2xi32>
    %40 = arith.cmpi eq, %39, %8 : vector<1x2xi32>
    %41 = arith.extui %40 : vector<1x2xi1> to vector<1x2xi32>
    %cst_17 = arith.constant dense<0> : vector<1xi32>
    %42 = vector.multi_reduction <add>, %41, %cst_17 [1] : vector<1x2xi32> to vector<1xi32>
    %43 = vector.shape_cast %42 : vector<1xi32> to vector<1x1xi32>
    %c0_18 = arith.constant 0 : index
    %c0_19 = arith.constant 0 : index
    %44 = vector.load %arg5[%c0_18, %c0_19] : memref<4x1xi32, #tpu.memory_space<vmem>>, vector<1x1xi32>
    tpu.vector_store %arg5[%c0_18, %c0_19], %43 {strides = array<i32>} : memref<4x1xi32, #tpu.memory_space<vmem>>, vector<1x1xi32>,
    %45 = vector.extract_strided_slice %5 {offsets = [0, 256], sizes = [2, 256], strides = [1, 1]} : vector<2x1024xf32> to vector<2x256xf32>
    %c1 = arith.constant 1 : index
    %c0_20 = arith.constant 0 : index
    %c0_21 = arith.constant 0 : index
    %46 = vector.load %arg0[%c1, %c0_20, %c0_21] : memref<4x2x256xf32, #tpu.memory_space<vmem>>, vector<1x2x256xf32>
    %47 = vector.shape_cast %46 : vector<1x2x256xf32> to vector<2x256xf32>
    %cst_22 = arith.constant dense<0.000000e+00> : vector<2x2xf32>
    %48 = tpu.matmul %47, %45, %cst_22 {dimension_numbers = #tpu.dot_dimension_numbers<[1], [1], [0], [0], [0, 0, 1, 0], [], []>} : vector<2x256xf32>, vector<2x256xf32>, vector<2x2xf32> -> vector<2x2xf32>
    %cst_23 = arith.constant dense<0xFF800000> : vector<2xf32>
    %49 = vector.multi_reduction <maximumf>, %48, %cst_23 [1] : vector<2x2xf32> to vector<2xf32>
    %50 = vector.shape_cast %49 : vector<2xf32> to vector<2x1xf32>
    %51 = vector.broadcast %50 : vector<2x1xf32> to vector<2x2xf32>
    %52 = arith.subf %48, %51 : vector<2x2xf32>
    %53 = math.exp %52 : vector<2x2xf32>
    %cst_24 = arith.constant dense<0.000000e+00> : vector<2xf32>
    %54 = vector.multi_reduction <add>, %53, %cst_24 [1] : vector<2x2xf32> to vector<2xf32>
    %55 = vector.shape_cast %54 : vector<2xf32> to vector<2x1xf32>
    %56 = math.log %55 : vector<2x1xf32>
    %57 = arith.addf %56, %50 : vector<2x1xf32>
    %58 = arith.cmpi eq, %6, %7 : vector<2x2xi32>
    %cst_25 = arith.constant 0.000000e+00 : f32
    %59 = vector.broadcast %cst_25 : f32 to vector<2x2xf32>
    %60 = arith.select %58, %48, %59 : vector<2x2xi1>, vector<2x2xf32>
    %cst_26 = arith.constant dense<0.000000e+00> : vector<2xf32>
    %61 = vector.multi_reduction <add>, %60, %cst_26 [1] : vector<2x2xf32> to vector<2xf32>
    %62 = vector.shape_cast %61 : vector<2xf32> to vector<2x1xf32>
    %63 = arith.subf %62, %57 : vector<2x1xf32>
    %cst_27 = arith.constant dense<0.000000e+00> : vector<1xf32>
    %64 = vector.multi_reduction <add>, %63, %cst_27 [0] : vector<2x1xf32> to vector<1xf32>
    %65 = vector.shape_cast %64 : vector<1xf32> to vector<1x1xf32>
    %66 = arith.addf %31, %65 : vector<1x1xf32>
    %cst_28 = arith.constant dense<0xFF800000> : vector<2xf32>
    %67 = vector.multi_reduction <maximumf>, %48, %cst_28 [0] : vector<2x2xf32> to vector<2xf32>
    %68 = vector.shape_cast %67 : vector<2xf32> to vector<1x2xf32>
    %69 = vector.broadcast %68 : vector<1x2xf32> to vector<2x2xf32>
    %70 = arith.cmpf oge, %48, %69 : vector<2x2xf32>
    %c2_i32_29 = arith.constant 2 : i32
    %71 = vector.broadcast %c2_i32_29 : i32 to vector<2x2xi32>
    %72 = arith.select %70, %6, %71 : vector<2x2xi1>, vector<2x2xi32>
    %cst_30 = arith.constant dense<2147483647> : vector<2xi32>
    %73 = vector.multi_reduction <minsi>, %72, %cst_30 [0] : vector<2x2xi32> to vector<2xi32>
    %74 = vector.shape_cast %73 : vector<2xi32> to vector<1x2xi32>
    %75 = arith.cmpi eq, %74, %8 : vector<1x2xi32>
    %76 = arith.extui %75 : vector<1x2xi1> to vector<1x2xi32>
    %cst_31 = arith.constant dense<0> : vector<1xi32>
    %77 = vector.multi_reduction <add>, %76, %cst_31 [1] : vector<1x2xi32> to vector<1xi32>
    %78 = vector.shape_cast %77 : vector<1xi32> to vector<1x1xi32>
    %c1_32 = arith.constant 1 : index
    %c0_33 = arith.constant 0 : index
    %79 = vector.load %arg5[%c1_32, %c0_33] : memref<4x1xi32, #tpu.memory_space<vmem>>, vector<1x1xi32>
    tpu.vector_store %arg5[%c1_32, %c0_33], %78 {strides = array<i32>} : memref<4x1xi32, #tpu.memory_space<vmem>>, vector<1x1xi32>,
    %80 = vector.extract_strided_slice %5 {offsets = [0, 512], sizes = [2, 256], strides = [1, 1]} : vector<2x1024xf32> to vector<2x256xf32>
    %c2 = arith.constant 2 : index
    %c0_34 = arith.constant 0 : index
    %c0_35 = arith.constant 0 : index
    %81 = vector.load %arg0[%c2, %c0_34, %c0_35] : memref<4x2x256xf32, #tpu.memory_space<vmem>>, vector<1x2x256xf32>
    %82 = vector.shape_cast %81 : vector<1x2x256xf32> to vector<2x256xf32>
    %cst_36 = arith.constant dense<0.000000e+00> : vector<2x2xf32>
    %83 = tpu.matmul %82, %80, %cst_36 {dimension_numbers = #tpu.dot_dimension_numbers<[1], [1], [0], [0], [0, 0, 1, 0], [], []>} : vector<2x256xf32>, vector<2x256xf32>, vector<2x2xf32> -> vector<2x2xf32>
    %cst_37 = arith.constant dense<0xFF800000> : vector<2xf32>
    %84 = vector.multi_reduction <maximumf>, %83, %cst_37 [1] : vector<2x2xf32> to vector<2xf32>
    %85 = vector.shape_cast %84 : vector<2xf32> to vector<2x1xf32>
    %86 = vector.broadcast %85 : vector<2x1xf32> to vector<2x2xf32>
    %87 = arith.subf %83, %86 : vector<2x2xf32>
    %88 = math.exp %87 : vector<2x2xf32>
    %cst_38 = arith.constant dense<0.000000e+00> : vector<2xf32>
    %89 = vector.multi_reduction <add>, %88, %cst_38 [1] : vector<2x2xf32> to vector<2xf32>
    %90 = vector.shape_cast %89 : vector<2xf32> to vector<2x1xf32>
    %91 = math.log %90 : vector<2x1xf32>
    %92 = arith.addf %91, %85 : vector<2x1xf32>
    %93 = arith.cmpi eq, %6, %7 : vector<2x2xi32>
    %cst_39 = arith.constant 0.000000e+00 : f32
    %94 = vector.broadcast %cst_39 : f32 to vector<2x2xf32>
    %95 = arith.select %93, %83, %94 : vector<2x2xi1>, vector<2x2xf32>
    %cst_40 = arith.constant dense<0.000000e+00> : vector<2xf32>
    %96 = vector.multi_reduction <add>, %95, %cst_40 [1] : vector<2x2xf32> to vector<2xf32>
    %97 = vector.shape_cast %96 : vector<2xf32> to vector<2x1xf32>
    %98 = arith.subf %97, %92 : vector<2x1xf32>
    %cst_41 = arith.constant dense<0.000000e+00> : vector<1xf32>
    %99 = vector.multi_reduction <add>, %98, %cst_41 [0] : vector<2x1xf32> to vector<1xf32>
    %100 = vector.shape_cast %99 : vector<1xf32> to vector<1x1xf32>
    %101 = arith.addf %66, %100 : vector<1x1xf32>
    %cst_42 = arith.constant dense<0xFF800000> : vector<2xf32>
    %102 = vector.multi_reduction <maximumf>, %83, %cst_42 [0] : vector<2x2xf32> to vector<2xf32>
    %103 = vector.shape_cast %102 : vector<2xf32> to vector<1x2xf32>
    %104 = vector.broadcast %103 : vector<1x2xf32> to vector<2x2xf32>
    %105 = arith.cmpf oge, %83, %104 : vector<2x2xf32>
    %c2_i32_43 = arith.constant 2 : i32
    %106 = vector.broadcast %c2_i32_43 : i32 to vector<2x2xi32>
    %107 = arith.select %105, %6, %106 : vector<2x2xi1>, vector<2x2xi32>
    %cst_44 = arith.constant dense<2147483647> : vector<2xi32>
    %108 = vector.multi_reduction <minsi>, %107, %cst_44 [0] : vector<2x2xi32> to vector<2xi32>
    %109 = vector.shape_cast %108 : vector<2xi32> to vector<1x2xi32>
    %110 = arith.cmpi eq, %109, %8 : vector<1x2xi32>
    %111 = arith.extui %110 : vector<1x2xi1> to vector<1x2xi32>
    %cst_45 = arith.constant dense<0> : vector<1xi32>
    %112 = vector.multi_reduction <add>, %111, %cst_45 [1] : vector<1x2xi32> to vector<1xi32>
    %113 = vector.shape_cast %112 : vector<1xi32> to vector<1x1xi32>
    %c2_46 = arith.constant 2 : index
    %c0_47 = arith.constant 0 : index
    %114 = vector.load %arg5[%c2_46, %c0_47] : memref<4x1xi32, #tpu.memory_space<vmem>>, vector<1x1xi32>
    tpu.vector_store %arg5[%c2_46, %c0_47], %113 {strides = array<i32>} : memref<4x1xi32, #tpu.memory_space<vmem>>, vector<1x1xi32>,
    %115 = vector.extract_strided_slice %5 {offsets = [0, 768], sizes = [2, 256], strides = [1, 1]} : vector<2x1024xf32> to vector<2x256xf32>
    %c3 = arith.constant 3 : index
    %c0_48 = arith.constant 0 : index
    %c0_49 = arith.constant 0 : index
    %116 = vector.load %arg0[%c3, %c0_48, %c0_49] : memref<4x2x256xf32, #tpu.memory_space<vmem>>, vector<1x2x256xf32>
    %117 = vector.shape_cast %116 : vector<1x2x256xf32> to vector<2x256xf32>
    %cst_50 = arith.constant dense<0.000000e+00> : vector<2x2xf32>
    %118 = tpu.matmul %117, %115, %cst_50 {dimension_numbers = #tpu.dot_dimension_numbers<[1], [1], [0], [0], [0, 0, 1, 0], [], []>} : vector<2x256xf32>, vector<2x256xf32>, vector<2x2xf32> -> vector<2x2xf32>
    %cst_51 = arith.constant dense<0xFF800000> : vector<2xf32>
    %119 = vector.multi_reduction <maximumf>, %118, %cst_51 [1] : vector<2x2xf32> to vector<2xf32>
    %120 = vector.shape_cast %119 : vector<2xf32> to vector<2x1xf32>
    %121 = vector.broadcast %120 : vector<2x1xf32> to vector<2x2xf32>
    %122 = arith.subf %118, %121 : vector<2x2xf32>
    %123 = math.exp %122 : vector<2x2xf32>
    %cst_52 = arith.constant dense<0.000000e+00> : vector<2xf32>
    %124 = vector.multi_reduction <add>, %123, %cst_52 [1] : vector<2x2xf32> to vector<2xf32>
    %125 = vector.shape_cast %124 : vector<2xf32> to vector<2x1xf32>
    %126 = math.log %125 : vector<2x1xf32>
    %127 = arith.addf %126, %120 : vector<2x1xf32>
    %128 = arith.cmpi eq, %6, %7 : vector<2x2xi32>
    %cst_53 = arith.constant 0.000000e+00 : f32
    %129 = vector.broadcast %cst_53 : f32 to vector<2x2xf32>
    %130 = arith.select %128, %118, %129 : vector<2x2xi1>, vector<2x2xf32>
    %cst_54 = arith.constant dense<0.000000e+00> : vector<2xf32>
    %131 = vector.multi_reduction <add>, %130, %cst_54 [1] : vector<2x2xf32> to vector<2xf32>
    %132 = vector.shape_cast %131 : vector<2xf32> to vector<2x1xf32>
    %133 = arith.subf %132, %127 : vector<2x1xf32>
    %cst_55 = arith.constant dense<0.000000e+00> : vector<1xf32>
    %134 = vector.multi_reduction <add>, %133, %cst_55 [0] : vector<2x1xf32> to vector<1xf32>
    %135 = vector.shape_cast %134 : vector<1xf32> to vector<1x1xf32>
    %136 = arith.addf %101, %135 : vector<1x1xf32>
    %cst_56 = arith.constant dense<0xFF800000> : vector<2xf32>
    %137 = vector.multi_reduction <maximumf>, %118, %cst_56 [0] : vector<2x2xf32> to vector<2xf32>
    %138 = vector.shape_cast %137 : vector<2xf32> to vector<1x2xf32>
    %139 = vector.broadcast %138 : vector<1x2xf32> to vector<2x2xf32>
    %140 = arith.cmpf oge, %118, %139 : vector<2x2xf32>
    %c2_i32_57 = arith.constant 2 : i32
    %141 = vector.broadcast %c2_i32_57 : i32 to vector<2x2xi32>
    %142 = arith.select %140, %6, %141 : vector<2x2xi1>, vector<2x2xi32>
    %cst_58 = arith.constant dense<2147483647> : vector<2xi32>
    %143 = vector.multi_reduction <minsi>, %142, %cst_58 [0] : vector<2x2xi32> to vector<2xi32>
    %144 = vector.shape_cast %143 : vector<2xi32> to vector<1x2xi32>
    %145 = arith.cmpi eq, %144, %8 : vector<1x2xi32>
    %146 = arith.extui %145 : vector<1x2xi1> to vector<1x2xi32>
    %cst_59 = arith.constant dense<0> : vector<1xi32>
    %147 = vector.multi_reduction <add>, %146, %cst_59 [1] : vector<1x2xi32> to vector<1xi32>
    %148 = vector.shape_cast %147 : vector<1xi32> to vector<1x1xi32>
    %c3_60 = arith.constant 3 : index
    %c0_61 = arith.constant 0 : index
    %149 = vector.load %arg5[%c3_60, %c0_61] : memref<4x1xi32, #tpu.memory_space<vmem>>, vector<1x1xi32>
    tpu.vector_store %arg5[%c3_60, %c0_61], %148 {strides = array<i32>} : memref<4x1xi32, #tpu.memory_space<vmem>>, vector<1x1xi32>,
    %c0_62 = arith.constant 0 : index
    %c0_63 = arith.constant 0 : index
    %150 = vector.load %arg4[%c0_62, %c0_63] : memref<1x1xf32, #tpu.memory_space<vmem>>, vector<1x1xf32>
    tpu.vector_store %arg4[%c0_62, %c0_63], %136 {strides = array<i32>} : memref<1x1xf32, #tpu.memory_space<vmem>>, vector<1x1xf32>,
    return
  }
}

</mosaic_0001>

<bundles_post_ra>
// kernel: g_enc_forward.5
= control target key start
LH: loop header
LB: loop body
LE: loop exit
PB: predicated region body
PF: predicated region fallthrough
CT: control target
= control target key end

     0   :  { %vm64_vm0 = vcmask 1043456   ;;  %vm39_vm1 = vcmask 97280   ;;  %s1502_s1 = inlined_call_operand.vmem [shape: f32[3,12,128], index: 1, kind: input, shape index: {}]   ;;  %s1503_s0 = inlined_call_operand.vmem [shape: f32[2,66,12], index: 0, kind: input, shape index: {}]   ;;  %s1504_s2 = inlined_call_operand.vmem [shape: f32[1,128], index: 2, kind: input, shape index: {}]   ;;  %s1505_s3 = inlined_call_operand.vmem [shape: f32[2,64,128], index: 3, kind: output, shape index: {}]  }
   0x1   :  { %v933_v0 = vld [vmem:[%s1502_s1 + $0x18] sm:$0xf]  ;;  %v1205_v1 = vld [vmem:[%s1502_s1 + $0x8] sm:$0xf]  ;;  %v932_v2 = vld [vmem:[%s1502_s1 + $0x10] sm:$0xff] }
   0x2   :  { %1083 = vmatprep.subr.msk.mxu0 %vm64_vm0, %v933_v0  ;;  %1099 = vmatprep.subr.msk.mxu1 %vm64_vm0, %v1205_v1  ;;  %v1216_v3 = vld [vmem:[%s1502_s1] sm:$0xff]  ;;  %v32_v6 = vld [vmem:[%s1503_s0 + $0x9] sm:$0xff]  ;;  %v33_v9 = vld [vmem:[%s1503_s0 + $0x11] sm:$0xff] }
   0x3   :  { %v31_v4 = vld [vmem:[%s1503_s0 + $0x1] sm:$0xff]  ;;  %1084 = vmatpush3.msk.msra.mxu0 %vm64_vm0, %v933_v0  ;;  %1100 = vmatpush3.msk.msra.mxu1 %vm64_vm0, %v1205_v1  ;;  %v25_v10 = vld [vmem:[%s1503_s0 + $0x10] sm:$0xff]  ;;  %v34_v11 = vld [vmem:[%s1503_s0 + $0x19] sm:$0xff] }
   0x4   :  { %v23_v5 = vld [vmem:[%s1503_s0] sm:$0xff]  ;;  %1085 = vmatprep.subr.mxu0 %v932_v2  ;;  %1101 = vmatprep.subr.mxu1 %v1216_v3  ;;  %v24_v7 = vld [vmem:[%s1503_s0 + $0x8] sm:$0xff]  ;;  %v26_v12 = vld [vmem:[%s1503_s0 + $0x18] sm:$0xff] }
   0x5   :  { %1086 = vmatpush3.msra.mxu0 %v932_v2  ;;  %1087 = vmatprep.mubr.msk.f32.mxu0 %vm39_vm1, %v31_v4  ;;  %v935_v8 = vld [vmem:[%s1502_s1 + $0x28] sm:$0xf]  ;;  %v27_v14 = vld [vmem:[%s1503_s0 + $0x20] sm:$0xff]  ;;  %v37_v18 = vld [vmem:[%s1503_s0 + $0x31] sm:$0xff] }
   0x6   :  { %1102 = vmatpush3.msra.mxu1 %v1216_v3  ;;  %1103 = vmatprep.mubr.msk.f32.mxu1 %vm39_vm1, %v23_v5  ;;  %v35_v13 = vld [vmem:[%s1503_s0 + $0x21] sm:$0xff]  ;;  %v36_v16 = vld [vmem:[%s1503_s0 + $0x29] sm:$0xff]  ;;  %v38_v20 = vld [vmem:[%s1503_s0 + $0x39] sm:$0xff] }
   0x7   :  { %1088 = vmatmul.mubr.msk.f32.vlgmr.msra.gmra.mxu0 %vm39_vm1, %v32_v6  ;;  %1104 = vmatmul.mubr.msk.f32.vlgmr.msra.gmra.mxu1 %vm39_vm1, %v24_v7  ;;  %v934_v15 = vld [vmem:[%s1502_s1 + $0x20] sm:$0xff]  ;;  %v28_v17 = vld [vmem:[%s1503_s0 + $0x28] sm:$0xff]  ;;  %v29_v19 = vld [vmem:[%s1503_s0 + $0x30] sm:$0xff] }
   0x8   :  { %1115 = vmatprep.subr.msk.mxu0 %vm64_vm0, %v935_v8  ;;  %1131 = vmatprep.subr.msk.mxu1 %vm64_vm0, %v933_v0  ;;  %v30_v21 = vld [vmem:[%s1503_s0 + $0x38] sm:$0xff]  ;;  %v305_v22 = vld [vmem:[%s1503_s0 + $0x2] sm:$0xff]  ;;  %v306_v24 = vld [vmem:[%s1503_s0 + $0xa] sm:$0xff] }
   0x9   :  { %1116 = vmatpush3.msk.msra.mxu0 %vm64_vm0, %v935_v8  ;;  %1090 = vmatprep.mubr.msk.f32.mxu0 %vm39_vm1, %v33_v9  ;;  %v972_v23 = vld [vmem:[%s1503_s0 + $0x49] sm:$0xff]  ;;  %v973_v25 = vld [vmem:[%s1503_s0 + $0x51] sm:$0xff]  ;;  %v974_v27 = vld [vmem:[%s1503_s0 + $0x59] sm:$0xff] }
   0xa   :  { %1106 = vmatprep.mubr.msk.f32.mxu1 %vm39_vm1, %v25_v10  ;;  %1132 = vmatpush3.msk.msra.mxu1 %vm64_vm0, %v933_v0  ;;  %v307_v26 = vld [vmem:[%s1503_s0 + $0x12] sm:$0xff]  ;;  %v308_v28 = vld [vmem:[%s1503_s0 + $0x1a] sm:$0xff]  ;;  %v309_v30 = vld [vmem:[%s1503_s0 + $0x22] sm:$0xff] }
   0xb   :  { %1091 = vmatmul.mubr.msk.f32.gmra.mxu0 %vm39_vm1, %v34_v11  ;;  %1107 = vmatmul.mubr.msk.f32.gmra.mxu1 %vm39_vm1, %v26_v12  ;;  %v975_v29 = vld [vmem:[%s1503_s0 + $0x61] sm:$0xff]  ;;  %v976_v31 = vld [vmem:[%s1503_s0 + $0x69] sm:$0xff]  ;;  %v977_v33 = vld [vmem:[%s1503_s0 + $0x71] sm:$0xff] }
   0xc   :  { %1093 = vmatprep.mubr.msk.f32.mxu0 %vm39_vm1, %v35_v13  ;;  %1109 = vmatprep.mubr.msk.f32.mxu1 %vm39_vm1, %v27_v14  ;;  %v310_v32 = vld [vmem:[%s1503_s0 + $0x2a] sm:$0xff]  ;;  %v311_v34 = vld [vmem:[%s1503_s0 + $0x32] sm:$0xff]  ;;  %v312_v36 = vld [vmem:[%s1503_s0 + $0x3a] sm:$0xff] }
   0xd   :  { %1117 = vmatprep.subr.mxu0 %v934_v15  ;;  %1133 = vmatprep.subr.mxu1 %v932_v2  ;;  %v978_v35 = vld [vmem:[%s1503_s0 + $0x79] sm:$0xff]  ;;  %v979_v37 = vld [vmem:[%s1503_s0 + $0x81] sm:$0xff]  ;;  %v998_v39 = vld [vmem:[%s1503_s0 + $0x4a] sm:$0xff] }
   0xe   :  { %1118 = vmatpush3.msra.mxu0 %v934_v15  ;;  %1134 = vmatpush3.msra.mxu1 %v932_v2  ;;  %v964_v38 = vld [vmem:[%s1503_s0 + $0x48] sm:$0xff]  ;;  %v965_v40 = vld [vmem:[%s1503_s0 + $0x50] sm:$0xff]  ;;  %v966_v42 = vld [vmem:[%s1503_s0 + $0x58] sm:$0xff] }
   0xf   :  { %1094 = vmatmul.mubr.msk.f32.gmra.mxu0 %vm39_vm1, %v36_v16  ;;  %1110 = vmatmul.mubr.msk.f32.gmra.mxu1 %vm39_vm1, %v28_v17  ;;  %v999_v41 = vld [vmem:[%s1503_s0 + $0x52] sm:$0xff]  ;;  %v1000_v43 = vld [vmem:[%s1503_s0 + $0x5a] sm:$0xff]  ;;  %v1001_v45 = vld [vmem:[%s1503_s0 + $0x62] sm:$0xff] }
  0x10   :  { %1096 = vmatprep.mubr.msk.f32.mxu0 %vm39_vm1, %v37_v18  ;;  %1112 = vmatprep.mubr.msk.f32.mxu1 %vm39_vm1, %v29_v19  ;;  %v967_v44 = vld [vmem:[%s1503_s0 + $0x60] sm:$0xff]  ;;  %v968_v46 = vld [vmem:[%s1503_s0 + $0x68] sm:$0xff]  ;;  %v969_v48 = vld [vmem:[%s1503_s0 + $0x70] sm:$0xff] }
  0x11   :  { %1147 = vmatprep.subr.msk.mxu0 %vm64_vm0, %v1205_v1  ;;  %1163 = vmatprep.subr.msk.mxu1 %vm64_vm0, %v935_v8  ;;  %v1002_v47 = vld [vmem:[%s1503_s0 + $0x6a] sm:$0xff]  ;;  %v1003_v49 = vld [vmem:[%s1503_s0 + $0x72] sm:$0xff]  ;;  %v1004_v51 = vld [vmem:[%s1503_s0 + $0x7a] sm:$0xff] }
  0x12   :  { %v970_v50 = vld [vmem:[%s1503_s0 + $0x78] sm:$0xff]  ;;  %v971_v52 = vld [vmem:[%s1503_s0 + $0x80] sm:$0xff] }
  0x13   :  { %1097 = vmatmul.mubr.msk.f32.gmra.mxu0 %vm39_vm1, %v38_v20  ;;  %1113 = vmatmul.mubr.msk.f32.gmra.mxu1 %vm39_vm1, %v30_v21  ;;  %v1005_v53 = vld [vmem:[%s1503_s0 + $0x82] sm:$0xff]  ;;  %v1436_v7 = vld [vmem:[%s1504_s2] ss:$0 sm:$0xff] }
  0x14   :  { %1119 = vmatprep.mubr.msk.f32.mxu0 %vm39_vm1, %v305_v22  ;;  %1135 = vmatprep.mubr.msk.f32.mxu1 %vm39_vm1, %v972_v23 }
  0x17   :  { %1120 = vmatmul.mubr.msk.f32.vlgmr.msra.gmra.mxu0 %vm39_vm1, %v306_v24  ;;  %1136 = vmatmul.mubr.msk.f32.vlgmr.msra.gmra.mxu1 %vm39_vm1, %v973_v25 }
  0x18   :  { %1148 = vmatpush3.msk.msra.mxu0 %vm64_vm0, %v1205_v1  ;;  %1122 = vmatprep.mubr.msk.f32.mxu0 %vm39_vm1, %v307_v26 }
  0x19   :  { %1164 = vmatpush3.msk.msra.mxu1 %vm64_vm0, %v935_v8  ;;  %1138 = vmatprep.mubr.msk.f32.mxu1 %vm39_vm1, %v974_v27 }
  0x1a   :  { %1149 = vmatprep.subr.mxu0 %v1216_v3  ;;  %1165 = vmatprep.subr.mxu1 %v934_v15 }
  0x1b   :  { %1123 = vmatmul.mubr.msk.f32.gmra.mxu0 %vm39_vm1, %v308_v28  ;;  %1139 = vmatmul.mubr.msk.f32.gmra.mxu1 %vm39_vm1, %v975_v29 }
  0x1c   :  { %1125 = vmatprep.mubr.msk.f32.mxu0 %vm39_vm1, %v309_v30  ;;  %1141 = vmatprep.mubr.msk.f32.mxu1 %vm39_vm1, %v976_v31 }
  0x1d   :  { %1150 = vmatpush3.msra.mxu0 %v1216_v3  ;;  %1166 = vmatpush3.msra.mxu1 %v934_v15 }
  0x1f   :  { %1126 = vmatmul.mubr.msk.f32.gmra.mxu0 %vm39_vm1, %v310_v32  ;;  %1142 = vmatmul.mubr.msk.f32.gmra.mxu1 %vm39_vm1, %v977_v33 }
  0x20   :  { %1128 = vmatprep.mubr.msk.f32.mxu0 %vm39_vm1, %v311_v34  ;;  %1144 = vmatprep.mubr.msk.f32.mxu1 %vm39_vm1, %v978_v35 }
  0x23   :  { %1129 = vmatmul.mubr.msk.f32.gmra.mxu0 %vm39_vm1, %v312_v36  ;;  %1145 = vmatmul.mubr.msk.f32.gmra.mxu1 %vm39_vm1, %v979_v37 }
  0x24   :  { %1151 = vmatprep.mubr.msk.f32.mxu0 %vm39_vm1, %v964_v38  ;;  %1167 = vmatprep.mubr.msk.f32.mxu1 %vm39_vm1, %v998_v39 }
  0x27   :  { %1152 = vmatmul.mubr.msk.f32.vlgmr.msra.gmra.mxu0 %vm39_vm1, %v965_v40  ;;  %1168 = vmatmul.mubr.msk.f32.vlgmr.msra.gmra.mxu1 %vm39_vm1, %v999_v41 }
  0x28   :  { %1154 = vmatprep.mubr.msk.f32.mxu0 %vm39_vm1, %v966_v42  ;;  %1170 = vmatprep.mubr.msk.f32.mxu1 %vm39_vm1, %v1000_v43 }
  0x2b   :  { %1155 = vmatmul.mubr.msk.f32.gmra.mxu0 %vm39_vm1, %v967_v44  ;;  %1171 = vmatmul.mubr.msk.f32.gmra.mxu1 %vm39_vm1, %v1001_v45 }
  0x2c   :  { %1157 = vmatprep.mubr.msk.f32.mxu0 %vm39_vm1, %v968_v46  ;;  %1173 = vmatprep.mubr.msk.f32.mxu1 %vm39_vm1, %v1002_v47 }
  0x2f   :  { %1158 = vmatmul.mubr.msk.f32.gmra.mxu0 %vm39_vm1, %v969_v48  ;;  %1174 = vmatmul.mubr.msk.f32.gmra.mxu1 %vm39_vm1, %v1003_v49 }
  0x30   :  { %1160 = vmatprep.mubr.msk.f32.mxu0 %vm39_vm1, %v970_v50  ;;  %1176 = vmatprep.mubr.msk.f32.mxu1 %vm39_vm1, %v1004_v51 }
  0x33   :  { %1161 = vmatmul.mubr.msk.f32.gmra.mxu0 %vm39_vm1, %v971_v52  ;;  %1177 = vmatmul.mubr.msk.f32.gmra.mxu1 %vm39_vm1, %v1005_v53 }
  0xc7   :  { %v1089_v54 = vpop.f32.mrf.mxu0  ;;  %v1105_v55 = vpop.f32.mrf.mxu1 }
  0xc8   :  { %v272_v6 = vadd.f32 %v1105_v55, %v1089_v54 }
  0xc9   :  { %v134_v56 = vpop.f32.mrf.mxu0  ;;  %v266_v57 = vpop.f32.mrf.mxu1 }
  0xca   :  { %v267_v10 = vadd.f32 %v266_v57, %v134_v56 }
  0xcb   :  { %v1092_v58 = vpop.f32.mrf.mxu0  ;;  %v1108_v59 = vpop.f32.mrf.mxu1 }
  0xcc   :  { %v282_v14 = vadd.f32 %v1108_v59, %v1092_v58 }
  0xcd   :  { %v144_v60 = vpop.f32.mrf.mxu0  ;;  %v276_v61 = vpop.f32.mrf.mxu1 }
  0xce   :  { %v277_v19 = vadd.f32 %v276_v61, %v144_v60 }
  0xcf   :  { %v1095_v62 = vpop.f32.mrf.mxu0  ;;  %v1111_v63 = vpop.f32.mrf.mxu1 }
  0xd0   :  { %v292_v25 = vadd.f32 %v1111_v63, %v1095_v62 }
  0xd1   :  { %v154_v0 = vpop.f32.mrf.mxu0  ;;  %v286_v1 = vpop.f32.mrf.mxu1 }
  0xd2   :  { %v287_v31 = vadd.f32 %v286_v1, %v154_v0 }
  0xd3   :  { %v1098_v2 = vpop.f32.mrf.mxu0  ;;  %v1114_v3 = vpop.f32.mrf.mxu1 }
  0xd4   :  { %v302_v37 = vadd.f32 %v1114_v3, %v1098_v2 }
  0xd5   :  { %v164_v4 = vpop.f32.mrf.mxu0  ;;  %v296_v5 = vpop.f32.mrf.mxu1 }
  0xd6   :  { %v297_v43 = vadd.f32 %v296_v5, %v164_v4 }
  0xd7   :  { %v1121_v8 = vpop.f32.mrf.mxu0  ;;  %v1137_v9 = vpop.f32.mrf.mxu1 }
  0xd8   :  { %v446_v11 = vadd.f32 %v1121_v8, %v272_v6 }
  0xd9   :  { %v406_v12 = vpop.f32.mrf.mxu0  ;;  %v590_v13 = vpop.f32.mrf.mxu1 }
  0xda   :  { %v460_v15 = vadd.f32 %v1436_v7, %v446_v11  ;;  %v445_v16 = vadd.f32 %v406_v12, %v267_v10 }
  0xdb   :  { %v1124_v17 = vpop.f32.mrf.mxu0  ;;  %v1140_v18 = vpop.f32.mrf.mxu1 }
  0xdc   :  { %v468_v20 = vmax.f32 %v460_v15, 0.0  ;;  %v459_v21 = vadd.f32 %v1436_v7, %v445_v16  ;;  %v448_v22 = vadd.f32 %v1124_v17, %v282_v14 }
  0xdd   :  { %v416_v23 = vpop.f32.mrf.mxu0  ;;  %v600_v24 = vpop.f32.mrf.mxu1 }
  0xde   :  { %476 = vst [vmem:[%s1505_s3 + $0x8] sm:$0xff] %v468_v20  ;;  %v467_v26 = vmax.f32 %v459_v21, 0.0  ;;  %v462_v27 = vadd.f32 %v1436_v7, %v448_v22  ;;  %v447_v28 = vadd.f32 %v416_v23, %v277_v19 }
  0xdf   :  { %v1127_v29 = vpop.f32.mrf.mxu0  ;;  %v1143_v30 = vpop.f32.mrf.mxu1 }
  0xe0   :  { %475 = vst [vmem:[%s1505_s3] sm:$0xff] %v467_v26  ;;  %v470_v32 = vmax.f32 %v462_v27, 0.0  ;;  %v461_v33 = vadd.f32 %v1436_v7, %v447_v28  ;;  %v450_v34 = vadd.f32 %v1127_v29, %v292_v25 }
  0xe1   :  { %v426_v35 = vpop.f32.mrf.mxu0  ;;  %v610_v36 = vpop.f32.mrf.mxu1 }
  0xe2   :  { %478 = vst [vmem:[%s1505_s3 + $0x18] sm:$0xff] %v470_v32  ;;  %v469_v38 = vmax.f32 %v461_v33, 0.0  ;;  %v464_v39 = vadd.f32 %v1436_v7, %v450_v34  ;;  %v449_v40 = vadd.f32 %v426_v35, %v287_v31 }
  0xe3   :  { %v1130_v41 = vpop.f32.mrf.mxu0  ;;  %v1146_v42 = vpop.f32.mrf.mxu1 }
  0xe4   :  { %477 = vst [vmem:[%s1505_s3 + $0x10] sm:$0xff] %v469_v38  ;;  %v472_v44 = vmax.f32 %v464_v39, 0.0  ;;  %v463_v45 = vadd.f32 %v1436_v7, %v449_v40  ;;  %v452_v46 = vadd.f32 %v1130_v41, %v302_v37 }
  0xe5   :  { %v436_v47 = vpop.f32.mrf.mxu0  ;;  %v620_v48 = vpop.f32.mrf.mxu1 }
  0xe6   :  { %480 = vst [vmem:[%s1505_s3 + $0x28] sm:$0xff] %v472_v44  ;;  %v471_v49 = vmax.f32 %v463_v45, 0.0  ;;  %v466_v50 = vadd.f32 %v1436_v7, %v452_v46  ;;  %v451_v51 = vadd.f32 %v436_v47, %v297_v43 }
  0xe7   :  { %v1153_v52 = vpop.f32.mrf.mxu0  ;;  %v1169_v53 = vpop.f32.mrf.mxu1 }
  0xe8   :  { %479 = vst [vmem:[%s1505_s3 + $0x20] sm:$0xff] %v471_v49  ;;  %v474_v54 = vmax.f32 %v466_v50, 0.0  ;;  %v465_v55 = vadd.f32 %v1436_v7, %v451_v51  ;;  %v725_v56 = vadd.f32 %v1153_v52, %v1137_v9 }
  0xe9   :  { %v719_v57 = vpop.f32.mrf.mxu0  ;;  %v856_v58 = vpop.f32.mrf.mxu1 }
  0xea   :  { %482 = vst [vmem:[%s1505_s3 + $0x38] sm:$0xff] %v474_v54  ;;  %v473_v59 = vmax.f32 %v465_v55, 0.0  ;;  %v896_v60 = vadd.f32 %v1169_v53, %v725_v56  ;;  %v720_v61 = vadd.f32 %v719_v57, %v590_v13 }
  0xeb   :  { %v1156_v62 = vpop.f32.mrf.mxu0  ;;  %v1172_v63 = vpop.f32.mrf.mxu1 }
  0xec   :  { %481 = vst [vmem:[%s1505_s3 + $0x30] sm:$0xff] %v473_v59  ;;  %v904_v0 = vadd.f32 %v1436_v7, %v896_v60  ;;  %v895_v1 = vadd.f32 %v856_v58, %v720_v61  ;;  %v735_v2 = vadd.f32 %v1156_v62, %v1140_v18 }
  0xed   :  { %v729_v3 = vpop.f32.mrf.mxu0  ;;  %v866_v4 = vpop.f32.mrf.mxu1 }
  0xee   :  { %v912_v5 = vmax.f32 %v904_v0, 0.0  ;;  %v903_v6 = vadd.f32 %v1436_v7, %v895_v1  ;;  %v898_v8 = vadd.f32 %v1172_v63, %v735_v2  ;;  %v730_v9 = vadd.f32 %v729_v3, %v600_v24 }
  0xef   :  { %v1159_v10 = vpop.f32.mrf.mxu0  ;;  %v1175_v11 = vpop.f32.mrf.mxu1 }
  0xf0   :  { %1016 = vst [vmem:[%s1505_s3 + $0x48] sm:$0xff] %v912_v5  ;;  %v911_v12 = vmax.f32 %v903_v6, 0.0  ;;  %v906_v13 = vadd.f32 %v1436_v7, %v898_v8  ;;  %v897_v14 = vadd.f32 %v866_v4, %v730_v9  ;;  %v745_v15 = vadd.f32 %v1159_v10, %v1143_v30 }
  0xf1   :  { %v739_v16 = vpop.f32.mrf.mxu0  ;;  %v876_v17 = vpop.f32.mrf.mxu1 }
  0xf2   :  { %1015 = vst [vmem:[%s1505_s3 + $0x40] sm:$0xff] %v911_v12  ;;  %v914_v18 = vmax.f32 %v906_v13, 0.0  ;;  %v905_v19 = vadd.f32 %v1436_v7, %v897_v14  ;;  %v900_v20 = vadd.f32 %v1175_v11, %v745_v15  ;;  %v740_v21 = vadd.f32 %v739_v16, %v610_v36 }
  0xf3   :  { %v1162_v22 = vpop.f32.mrf.mxu0  ;;  %v1178_v23 = vpop.f32.mrf.mxu1 }
  0xf4   :  { %1018 = vst [vmem:[%s1505_s3 + $0x58] sm:$0xff] %v914_v18  ;;  %v913_v24 = vmax.f32 %v905_v19, 0.0  ;;  %v908_v25 = vadd.f32 %v1436_v7, %v900_v20  ;;  %v899_v26 = vadd.f32 %v876_v17, %v740_v21  ;;  %v755_v27 = vadd.f32 %v1162_v22, %v1146_v42 }
  0xf5   :  { %v749_v28 = vpop.f32.mrf.mxu0  ;;  %v886_v33 = vpop.f32.mrf.mxu1 }
  0xf6   :  { %1017 = vst [vmem:[%s1505_s3 + $0x50] sm:$0xff] %v913_v24  ;;  %v916_v29 = vmax.f32 %v908_v25, 0.0  ;;  %v907_v30 = vadd.f32 %v1436_v7, %v899_v26  ;;  %v902_v31 = vadd.f32 %v1178_v23, %v755_v27  ;;  %v750_v32 = vadd.f32 %v749_v28, %v620_v48 }
  0xf8   :  { %1020 = vst [vmem:[%s1505_s3 + $0x68] sm:$0xff] %v916_v29  ;;  %v915_v34 = vmax.f32 %v907_v30, 0.0  ;;  %v910_v35 = vadd.f32 %v1436_v7, %v902_v31  ;;  %v901_v36 = vadd.f32 %v886_v33, %v750_v32 }
  0xfa   :  { %1019 = vst [vmem:[%s1505_s3 + $0x60] sm:$0xff] %v915_v34  ;;  %v918_v37 = vmax.f32 %v910_v35, 0.0  ;;  %v909_v38 = vadd.f32 %v1436_v7, %v901_v36 }
  0xfc   :  { %1022 = vst [vmem:[%s1505_s3 + $0x78] sm:$0xff] %v918_v37  ;;  %v917_v39 = vmax.f32 %v909_v38, 0.0 }
  0xfe   :  { %1021 = vst [vmem:[%s1505_s3 + $0x70] sm:$0xff] %v917_v39 }

// kernel: g_enc_forward.6
= control target key start
LH: loop header
LB: loop body
LE: loop exit
PB: predicated region body
PF: predicated region fallthrough
CT: control target
= control target key end

     0   :  { %s1591_s1 = inlined_call_operand.vmem [shape: f32[3,128,128], index: 1, kind: input, shape index: {}]   ;;  %s1592_s0 = inlined_call_operand.vmem [shape: f32[2,34,128], index: 0, kind: input, shape index: {}]   ;;  %s1593_s2 = inlined_call_operand.vmem [shape: f32[1,128], index: 2, kind: input, shape index: {}]   ;;  %s1594_s3 = inlined_call_operand.vmem [shape: f32[2,32,128], index: 3, kind: output, shape index: {}]  }
   0x1   :  { %v1063_v0 = vld [vmem:[%s1591_s1 + $0xf8] sm:$0xff]  ;;  %v1073_v2 = vld [vmem:[%s1591_s1 + $0xf0] sm:$0xff]  ;;  %v1087_v4 = vld [vmem:[%s1591_s1 + $0xe8] sm:$0xff] }
   0x2   :  { %v1068_v1 = vld [vmem:[%s1591_s1 + $0x78] sm:$0xff]  ;;  %812 = vmatprep.subr.mxu0 %v1063_v0  ;;  %v1080_v3 = vld [vmem:[%s1591_s1 + $0x70] sm:$0xff]  ;;  %v1092_v5 = vld [vmem:[%s1591_s1 + $0x68] sm:$0xff] }
   0x3   :  { %850 = vmatprep.subr.mxu1 %v1068_v1  ;;  %813 = vmatpush3.msra.mxu0 %v1063_v0  ;;  %v1101_v6 = vld [vmem:[%s1591_s1 + $0xe0] sm:$0xff]  ;;  %v1115_v8 = vld [vmem:[%s1591_s1 + $0xd8] sm:$0xff]  ;;  %v1129_v10 = vld [vmem:[%s1591_s1 + $0xd0] sm:$0xff] }
   0x4   :  { %851 = vmatpush3.msra.mxu1 %v1068_v1  ;;  %814 = vmatprep.subr.mxu0 %v1073_v2  ;;  %v1106_v7 = vld [vmem:[%s1591_s1 + $0x60] sm:$0xff]  ;;  %v1120_v9 = vld [vmem:[%s1591_s1 + $0x58] sm:$0xff]  ;;  %v1134_v11 = vld [vmem:[%s1591_s1 + $0x50] sm:$0xff] }
   0x5   :  { %852 = vmatprep.subr.mxu1 %v1080_v3  ;;  %815 = vmatpush3.msra.mxu0 %v1073_v2  ;;  %v1143_v12 = vld [vmem:[%s1591_s1 + $0xc8] sm:$0xff]  ;;  %v1157_v14 = vld [vmem:[%s1591_s1 + $0xc0] sm:$0xff]  ;;  %v1171_v16 = vld [vmem:[%s1591_s1 + $0xb8] sm:$0xff] }
   0x6   :  { %853 = vmatpush3.msra.mxu1 %v1080_v3  ;;  %816 = vmatprep.subr.mxu0 %v1087_v4  ;;  %v1148_v13 = vld [vmem:[%s1591_s1 + $0x48] sm:$0xff]  ;;  %v1162_v15 = vld [vmem:[%s1591_s1 + $0x40] sm:$0xff]  ;;  %v1176_v17 = vld [vmem:[%s1591_s1 + $0x38] sm:$0xff] }
   0x7   :  { %854 = vmatprep.subr.mxu1 %v1092_v5  ;;  %817 = vmatpush3.msra.mxu0 %v1087_v4  ;;  %v1185_v18 = vld [vmem:[%s1591_s1 + $0xb0] sm:$0xff]  ;;  %v1199_v20 = vld [vmem:[%s1591_s1 + $0xa8] sm:$0xff]  ;;  %v1213_v22 = vld [vmem:[%s1591_s1 + $0xa0] sm:$0xff] }
   0x8   :  { %855 = vmatpush3.msra.mxu1 %v1092_v5  ;;  %818 = vmatprep.subr.mxu0 %v1101_v6  ;;  %v1190_v19 = vld [vmem:[%s1591_s1 + $0x30] sm:$0xff]  ;;  %v1204_v21 = vld [vmem:[%s1591_s1 + $0x28] sm:$0xff]  ;;  %v1218_v23 = vld [vmem:[%s1591_s1 + $0x20] sm:$0xff] }
   0x9   :  { %856 = vmatprep.subr.mxu1 %v1106_v7  ;;  %819 = vmatpush3.msra.mxu0 %v1101_v6  ;;  %v1227_v24 = vld [vmem:[%s1591_s1 + $0x98] sm:$0xff]  ;;  %v1241_v26 = vld [vmem:[%s1591_s1 + $0x90] sm:$0xff]  ;;  %v1255_v28 = vld [vmem:[%s1591_s1 + $0x88] sm:$0xff] }
   0xa   :  { %857 = vmatpush3.msra.mxu1 %v1106_v7  ;;  %820 = vmatprep.subr.mxu0 %v1115_v8  ;;  %v1232_v25 = vld [vmem:[%s1591_s1 + $0x18] sm:$0xff]  ;;  %v1246_v27 = vld [vmem:[%s1591_s1 + $0x10] sm:$0xff]  ;;  %v1260_v29 = vld [vmem:[%s1591_s1 + $0x8] sm:$0xff] }
   0xb   :  { %858 = vmatprep.subr.mxu1 %v1120_v9  ;;  %821 = vmatpush3.msra.mxu0 %v1115_v8  ;;  %v1269_v30 = vld [vmem:[%s1591_s1 + $0x80] sm:$0xff]  ;;  %v70_v34 = vld [vmem:[%s1592_s0 + $0x9] sm:$0xff]  ;;  %v1298_v36 = vld [vmem:[%s1591_s1 + $0x178] sm:$0xff] }
   0xc   :  { %859 = vmatpush3.msra.mxu1 %v1120_v9  ;;  %822 = vmatprep.subr.mxu0 %v1129_v10  ;;  %v1274_v31 = vld [vmem:[%s1591_s1] sm:$0xff]  ;;  %v66_v35 = vld [vmem:[%s1592_s0 + $0x8] sm:$0xff]  ;;  %v1304_v37 = vld [vmem:[%s1591_s1 + $0x170] sm:$0xff] }
   0xd   :  { %860 = vmatprep.subr.mxu1 %v1134_v11  ;;  %823 = vmatpush3.msra.mxu0 %v1129_v10  ;;  %v69_v32 = vld [vmem:[%s1592_s0 + $0x1] sm:$0xff]  ;;  %v1331_v40 = vld [vmem:[%s1591_s1 + $0x158] sm:$0xff]  ;;  %v1340_v41 = vld [vmem:[%s1591_s1 + $0x150] sm:$0xff] }
   0xe   :  { %861 = vmatpush3.msra.mxu1 %v1134_v11  ;;  %824 = vmatprep.subr.mxu0 %v1143_v12  ;;  %v65_v33 = vld [vmem:[%s1592_s0] sm:$0xff]  ;;  %v1313_v38 = vld [vmem:[%s1591_s1 + $0x168] sm:$0xff]  ;;  %v1367_v44 = vld [vmem:[%s1591_s1 + $0x138] sm:$0xff] }
   0xf   :  { %862 = vmatprep.subr.mxu1 %v1148_v13  ;;  %825 = vmatpush3.msra.mxu0 %v1143_v12  ;;  %v1322_v39 = vld [vmem:[%s1591_s1 + $0x160] sm:$0xff]  ;;  %v1349_v42 = vld [vmem:[%s1591_s1 + $0x148] sm:$0xff]  ;;  %v1376_v45 = vld [vmem:[%s1591_s1 + $0x130] sm:$0xff] }
  0x10   :  { %863 = vmatpush3.msra.mxu1 %v1148_v13  ;;  %826 = vmatprep.subr.mxu0 %v1157_v14  ;;  %v1358_v43 = vld [vmem:[%s1591_s1 + $0x140] sm:$0xff]  ;;  %v1385_v46 = vld [vmem:[%s1591_s1 + $0x128] sm:$0xff]  ;;  %v1403_v48 = vld [vmem:[%s1591_s1 + $0x118] sm:$0xff] }
  0x11   :  { %864 = vmatprep.subr.mxu1 %v1162_v15  ;;  %827 = vmatpush3.msra.mxu0 %v1157_v14  ;;  %v1394_v47 = vld [vmem:[%s1591_s1 + $0x120] sm:$0xff]  ;;  %v71_v49 = vld [vmem:[%s1592_s0 + $0x11] sm:$0xff]  ;;  %v1435_v54 = vld [vmem:[%s1591_s1 + $0x108] sm:$0xff] }
  0x12   :  { %865 = vmatpush3.msra.mxu1 %v1162_v15  ;;  %828 = vmatprep.subr.mxu0 %v1171_v16  ;;  %v67_v50 = vld [vmem:[%s1592_s0 + $0x10] sm:$0xff]  ;;  %v72_v52 = vld [vmem:[%s1592_s0 + $0x19] sm:$0xff]  ;;  %v243_v56 = vld [vmem:[%s1592_s0 + $0x2] sm:$0xff] }
  0x13   :  { %866 = vmatprep.subr.mxu1 %v1176_v17  ;;  %829 = vmatpush3.msra.mxu0 %v1171_v16  ;;  %v1420_v51 = vld [vmem:[%s1591_s1 + $0x110] sm:$0xff]  ;;  %v68_v53 = vld [vmem:[%s1592_s0 + $0x18] sm:$0xff]  ;;  %v1442_v55 = vld [vmem:[%s1591_s1 + $0x100] sm:$0xff] }
  0x14   :  { %867 = vmatpush3.msra.mxu1 %v1176_v17  ;;  %830 = vmatprep.subr.mxu0 %v1185_v18  ;;  %v244_v57 = vld [vmem:[%s1592_s0 + $0xa] sm:$0xff]  ;;  %v245_v60 = vld [vmem:[%s1592_s0 + $0x12] sm:$0xff]  ;;  %v246_v61 = vld [vmem:[%s1592_s0 + $0x1a] sm:$0xff] }
  0x15   :  { %868 = vmatprep.subr.mxu1 %v1190_v19  ;;  %831 = vmatpush3.msra.mxu0 %v1185_v18  ;;  %v680_v58 = vld [vmem:[%s1592_s0 + $0x29] sm:$0xff]  ;;  %v681_v59 = vld [vmem:[%s1592_s0 + $0x31] sm:$0xff]  ;;  %v682_v62 = vld [vmem:[%s1592_s0 + $0x39] sm:$0xff] }
  0x16   :  { %869 = vmatpush3.msra.mxu1 %v1190_v19  ;;  %832 = vmatprep.subr.mxu0 %v1199_v20  ;;  %v683_v63 = vld [vmem:[%s1592_s0 + $0x41] sm:$0xff] }
  0x17   :  { %870 = vmatprep.subr.mxu1 %v1204_v21  ;;  %833 = vmatpush3.msra.mxu0 %v1199_v20 }
  0x18   :  { %871 = vmatpush3.msra.mxu1 %v1204_v21  ;;  %834 = vmatprep.subr.mxu0 %v1213_v22 }
  0x19   :  { %872 = vmatprep.subr.mxu1 %v1218_v23  ;;  %835 = vmatpush3.msra.mxu0 %v1213_v22 }
  0x1a   :  { %873 = vmatpush3.msra.mxu1 %v1218_v23  ;;  %836 = vmatprep.subr.mxu0 %v1227_v24 }
  0x1b   :  { %874 = vmatprep.subr.mxu1 %v1232_v25  ;;  %837 = vmatpush3.msra.mxu0 %v1227_v24 }
  0x1c   :  { %875 = vmatpush3.msra.mxu1 %v1232_v25  ;;  %838 = vmatprep.subr.mxu0 %v1241_v26 }
  0x1d   :  { %876 = vmatprep.subr.mxu1 %v1246_v27  ;;  %839 = vmatpush3.msra.mxu0 %v1241_v26 }
  0x1e   :  { %877 = vmatpush3.msra.mxu1 %v1246_v27  ;;  %840 = vmatprep.subr.mxu0 %v1255_v28 }
  0x1f   :  { %878 = vmatprep.subr.mxu1 %v1260_v29  ;;  %841 = vmatpush3.msra.mxu0 %v1255_v28 }
  0x20   :  { %879 = vmatpush3.msra.mxu1 %v1260_v29  ;;  %842 = vmatprep.subr.mxu0 %v1269_v30 }
  0x21   :  { %880 = vmatprep.subr.mxu1 %v1274_v31  ;;  %843 = vmatpush3.msra.mxu0 %v1269_v30 }
  0x22   :  { %844 = vmatprep.mubr.f32.mxu0 %v69_v32  ;;  %881 = vmatpush3.msra.mxu1 %v1274_v31 }
  0x23   :  { %882 = vmatprep.mubr.f32.mxu1 %v65_v33  ;;  %845 = vmatmul.mubr.f32.vlgmr.msra.gmra.mxu0 %v70_v34 }
  0x24   :  { %883 = vmatmul.mubr.f32.vlgmr.msra.gmra.mxu1 %v66_v35  ;;  %888 = vmatprep.subr.mxu0 %v1298_v36 }
  0x25   :  { %926 = vmatprep.subr.mxu1 %v1063_v0  ;;  %889 = vmatpush3.msra.mxu0 %v1298_v36 }
  0x26   :  { %927 = vmatpush3.msra.mxu1 %v1063_v0  ;;  %890 = vmatprep.subr.mxu0 %v1304_v37  ;;  %v676_v0 = vld [vmem:[%s1592_s0 + $0x28] sm:$0xff] }
  0x27   :  { %928 = vmatprep.subr.mxu1 %v1073_v2  ;;  %891 = vmatpush3.msra.mxu0 %v1304_v37 }
  0x28   :  { %929 = vmatpush3.msra.mxu1 %v1073_v2  ;;  %892 = vmatprep.subr.mxu0 %v1313_v38  ;;  %v677_v2 = vld [vmem:[%s1592_s0 + $0x30] sm:$0xff] }
  0x29   :  { %930 = vmatprep.subr.mxu1 %v1087_v4  ;;  %893 = vmatpush3.msra.mxu0 %v1313_v38 }
  0x2a   :  { %931 = vmatpush3.msra.mxu1 %v1087_v4  ;;  %894 = vmatprep.subr.mxu0 %v1322_v39  ;;  %v678_v4 = vld [vmem:[%s1592_s0 + $0x38] sm:$0xff] }
  0x2b   :  { %932 = vmatprep.subr.mxu1 %v1101_v6  ;;  %895 = vmatpush3.msra.mxu0 %v1322_v39 }
  0x2c   :  { %933 = vmatpush3.msra.mxu1 %v1101_v6  ;;  %896 = vmatprep.subr.mxu0 %v1331_v40  ;;  %v679_v6 = vld [vmem:[%s1592_s0 + $0x40] sm:$0xff] }
  0x2d   :  { %934 = vmatprep.subr.mxu1 %v1115_v8  ;;  %897 = vmatpush3.msra.mxu0 %v1331_v40 }
  0x2e   :  { %935 = vmatpush3.msra.mxu1 %v1115_v8  ;;  %898 = vmatprep.subr.mxu0 %v1340_v41 }
  0x2f   :  { %936 = vmatprep.subr.mxu1 %v1129_v10  ;;  %899 = vmatpush3.msra.mxu0 %v1340_v41 }
  0x30   :  { %937 = vmatpush3.msra.mxu1 %v1129_v10  ;;  %900 = vmatprep.subr.mxu0 %v1349_v42 }
  0x31   :  { %938 = vmatprep.subr.mxu1 %v1143_v12  ;;  %901 = vmatpush3.msra.mxu0 %v1349_v42 }
  0x32   :  { %939 = vmatpush3.msra.mxu1 %v1143_v12  ;;  %902 = vmatprep.subr.mxu0 %v1358_v43 }
  0x33   :  { %940 = vmatprep.subr.mxu1 %v1157_v14  ;;  %903 = vmatpush3.msra.mxu0 %v1358_v43 }
  0x34   :  { %941 = vmatpush3.msra.mxu1 %v1157_v14  ;;  %904 = vmatprep.subr.mxu0 %v1367_v44 }
  0x35   :  { %942 = vmatprep.subr.mxu1 %v1171_v16  ;;  %905 = vmatpush3.msra.mxu0 %v1367_v44 }
  0x36   :  { %943 = vmatpush3.msra.mxu1 %v1171_v16  ;;  %906 = vmatprep.subr.mxu0 %v1376_v45  ;;  %v675_v16 = vld [vmem:[%s1593_s2] ss:$0 sm:$0xff] }
  0x37   :  { %944 = vmatprep.subr.mxu1 %v1185_v18  ;;  %907 = vmatpush3.msra.mxu0 %v1376_v45 }
  0x38   :  { %945 = vmatpush3.msra.mxu1 %v1185_v18  ;;  %908 = vmatprep.subr.mxu0 %v1385_v46 }
  0x39   :  { %946 = vmatprep.subr.mxu1 %v1199_v20  ;;  %909 = vmatpush3.msra.mxu0 %v1385_v46 }
  0x3a   :  { %947 = vmatpush3.msra.mxu1 %v1199_v20  ;;  %910 = vmatprep.subr.mxu0 %v1394_v47 }
  0x3b   :  { %948 = vmatprep.subr.mxu1 %v1213_v22  ;;  %911 = vmatpush3.msra.mxu0 %v1394_v47 }
  0x3c   :  { %949 = vmatpush3.msra.mxu1 %v1213_v22  ;;  %912 = vmatprep.subr.mxu0 %v1403_v48 }
  0x3d   :  { %950 = vmatprep.subr.mxu1 %v1227_v24  ;;  %913 = vmatpush3.msra.mxu0 %v1403_v48 }
  0x3e   :  { %951 = vmatpush3.msra.mxu1 %v1227_v24  ;;  %847 = vmatprep.mubr.f32.mxu0 %v71_v49 }
  0x3f   :  { %885 = vmatprep.mubr.f32.mxu1 %v67_v50  ;;  %914 = vmatprep.subr.mxu0 %v1420_v51 }
  0x40   :  { %952 = vmatprep.subr.mxu1 %v1241_v26  ;;  %848 = vmatmul.mubr.f32.gmra.mxu0 %v72_v52 }
  0x41   :  { %886 = vmatmul.mubr.f32.gmra.mxu1 %v68_v53  ;;  %915 = vmatpush3.msra.mxu0 %v1420_v51 }
  0x42   :  { %953 = vmatpush3.msra.mxu1 %v1241_v26  ;;  %916 = vmatprep.subr.mxu0 %v1435_v54 }
  0x43   :  { %954 = vmatprep.subr.mxu1 %v1255_v28  ;;  %917 = vmatpush3.msra.mxu0 %v1435_v54 }
  0x44   :  { %955 = vmatpush3.msra.mxu1 %v1255_v28  ;;  %918 = vmatprep.subr.mxu0 %v1442_v55 }
  0x45   :  { %956 = vmatprep.subr.mxu1 %v1269_v30  ;;  %919 = vmatpush3.msra.mxu0 %v1442_v55 }
  0x46   :  { %920 = vmatprep.mubr.f32.mxu0 %v243_v56  ;;  %957 = vmatpush3.msra.mxu1 %v1269_v30 }
  0x47   :  { %921 = vmatmul.mubr.f32.vlgmr.msra.gmra.mxu0 %v244_v57  ;;  %958 = vmatprep.mubr.f32.mxu1 %v680_v58 }
  0x48   :  { %964 = vmatprep.subr.mxu0 %v1068_v1  ;;  %1002 = vmatprep.subr.mxu1 %v1298_v36 }
  0x49   :  { %959 = vmatmul.mubr.f32.vlgmr.msra.gmra.mxu1 %v681_v59  ;;  %965 = vmatpush3.msra.mxu0 %v1068_v1  ;;  %v684_v1 = vld [vmem:[%s1592_s0 + $0x2a] sm:$0xff] }
  0x4a   :  { %1003 = vmatpush3.msra.mxu1 %v1298_v36  ;;  %966 = vmatprep.subr.mxu0 %v1080_v3 }
  0x4b   :  { %1004 = vmatprep.subr.mxu1 %v1304_v37  ;;  %923 = vmatprep.mubr.f32.mxu0 %v245_v60 }
  0x4c   :  { %967 = vmatpush3.msra.mxu0 %v1080_v3  ;;  %1005 = vmatpush3.msra.mxu1 %v1304_v37  ;;  %v685_v3 = vld [vmem:[%s1592_s0 + $0x32] sm:$0xff] }
  0x4d   :  { %924 = vmatmul.mubr.f32.gmra.mxu0 %v246_v61  ;;  %968 = vmatprep.subr.mxu0 %v1092_v5 }
  0x4e   :  { %1006 = vmatprep.subr.mxu1 %v1313_v38  ;;  %969 = vmatpush3.msra.mxu0 %v1092_v5  ;;  %v686_v5 = vld [vmem:[%s1592_s0 + $0x3a] sm:$0xff] }
  0x4f   :  { %1007 = vmatpush3.msra.mxu1 %v1313_v38  ;;  %970 = vmatprep.subr.mxu0 %v1106_v7 }
  0x50   :  { %1008 = vmatprep.subr.mxu1 %v1322_v39  ;;  %971 = vmatpush3.msra.mxu0 %v1106_v7  ;;  %v687_v7 = vld [vmem:[%s1592_s0 + $0x42] sm:$0xff] }
  0x51   :  { %1009 = vmatpush3.msra.mxu1 %v1322_v39  ;;  %972 = vmatprep.subr.mxu0 %v1120_v9 }
  0x52   :  { %1010 = vmatprep.subr.mxu1 %v1331_v40  ;;  %973 = vmatpush3.msra.mxu0 %v1120_v9 }
  0x53   :  { %1011 = vmatpush3.msra.mxu1 %v1331_v40  ;;  %974 = vmatprep.subr.mxu0 %v1134_v11 }
  0x54   :  { %1012 = vmatprep.subr.mxu1 %v1340_v41  ;;  %975 = vmatpush3.msra.mxu0 %v1134_v11 }
  0x55   :  { %1013 = vmatpush3.msra.mxu1 %v1340_v41  ;;  %976 = vmatprep.subr.mxu0 %v1148_v13 }
  0x56   :  { %1014 = vmatprep.subr.mxu1 %v1349_v42  ;;  %977 = vmatpush3.msra.mxu0 %v1148_v13 }
  0x57   :  { %1015 = vmatpush3.msra.mxu1 %v1349_v42  ;;  %978 = vmatprep.subr.mxu0 %v1162_v15 }
  0x58   :  { %1016 = vmatprep.subr.mxu1 %v1358_v43  ;;  %979 = vmatpush3.msra.mxu0 %v1162_v15 }
  0x59   :  { %1017 = vmatpush3.msra.mxu1 %v1358_v43  ;;  %980 = vmatprep.subr.mxu0 %v1176_v17 }
  0x5a   :  { %1018 = vmatprep.subr.mxu1 %v1367_v44  ;;  %981 = vmatpush3.msra.mxu0 %v1176_v17 }
  0x5b   :  { %1019 = vmatpush3.msra.mxu1 %v1367_v44  ;;  %982 = vmatprep.subr.mxu0 %v1190_v19 }
  0x5c   :  { %1020 = vmatprep.subr.mxu1 %v1376_v45  ;;  %983 = vmatpush3.msra.mxu0 %v1190_v19 }
  0x5d   :  { %1021 = vmatpush3.msra.mxu1 %v1376_v45  ;;  %984 = vmatprep.subr.mxu0 %v1204_v21 }
  0x5e   :  { %1022 = vmatprep.subr.mxu1 %v1385_v46  ;;  %985 = vmatpush3.msra.mxu0 %v1204_v21 }
  0x5f   :  { %1023 = vmatpush3.msra.mxu1 %v1385_v46  ;;  %986 = vmatprep.subr.mxu0 %v1218_v23 }
  0x60   :  { %1024 = vmatprep.subr.mxu1 %v1394_v47  ;;  %987 = vmatpush3.msra.mxu0 %v1218_v23 }
  0x61   :  { %1025 = vmatpush3.msra.mxu1 %v1394_v47  ;;  %988 = vmatprep.subr.mxu0 %v1232_v25 }
  0x62   :  { %1026 = vmatprep.subr.mxu1 %v1403_v48  ;;  %989 = vmatpush3.msra.mxu0 %v1232_v25 }
  0x63   :  { %1027 = vmatpush3.msra.mxu1 %v1403_v48  ;;  %990 = vmatprep.subr.mxu0 %v1246_v27 }
  0x64   :  { %1028 = vmatprep.subr.mxu1 %v1420_v51  ;;  %961 = vmatprep.mubr.f32.mxu1 %v682_v62 }
  0x65   :  { %991 = vmatpush3.msra.mxu0 %v1246_v27  ;;  %1029 = vmatpush3.msra.mxu1 %v1420_v51 }
  0x66   :  { %992 = vmatprep.subr.mxu0 %v1260_v29  ;;  %962 = vmatmul.mubr.f32.gmra.mxu1 %v683_v63 }
  0x67   :  { %1030 = vmatprep.subr.mxu1 %v1435_v54  ;;  %993 = vmatpush3.msra.mxu0 %v1260_v29 }
  0x68   :  { %1031 = vmatpush3.msra.mxu1 %v1435_v54  ;;  %994 = vmatprep.subr.mxu0 %v1274_v31 }
  0x69   :  { %1032 = vmatprep.subr.mxu1 %v1442_v55  ;;  %995 = vmatpush3.msra.mxu0 %v1274_v31 }
  0x6a   :  { %996 = vmatprep.mubr.f32.mxu0 %v676_v0  ;;  %1033 = vmatpush3.msra.mxu1 %v1442_v55 }
  0x6b   :  { %1034 = vmatprep.mubr.f32.mxu1 %v684_v1  ;;  %997 = vmatmul.mubr.f32.vlgmr.msra.gmra.mxu0 %v677_v2 }
  0x6c   :  { %1035 = vmatmul.mubr.f32.vlgmr.msra.gmra.mxu1 %v685_v3  ;;  %999 = vmatprep.mubr.f32.mxu0 %v678_v4 }
  0x6d   :  { %1037 = vmatprep.mubr.f32.mxu1 %v686_v5 }
  0x6f   :  { %1000 = vmatmul.mubr.f32.gmra.mxu0 %v679_v6 }
  0x70   :  { %1038 = vmatmul.mubr.f32.gmra.mxu1 %v687_v7 }
  0xe3   :  { %v846_v8 = vpop.f32.mrf.mxu0 }
  0xe4   :  { %v884_v10 = vpop.f32.mrf.mxu1 }
  0xe5   :  { %v139_v9 = vpop.f32.mrf.mxu0  ;;  %v230_v14 = vadd.f32 %v884_v10, %v846_v8 }
  0xe6   :  { %v224_v13 = vpop.f32.mrf.mxu1 }
  0xe7   :  { %v225_v18 = vadd.f32 %v224_v13, %v139_v9 }
 0x100   :  { %v849_v11 = vpop.f32.mrf.mxu0 }
 0x101   :  { %v887_v15 = vpop.f32.mrf.mxu1 }
 0x102   :  { %v149_v12 = vpop.f32.mrf.mxu0  ;;  %v240_v24 = vadd.f32 %v887_v15, %v849_v11 }
 0x103   :  { %v234_v23 = vpop.f32.mrf.mxu1 }
 0x104   :  { %v235_v28 = vadd.f32 %v234_v23, %v149_v12 }
 0x107   :  { %v922_v17 = vpop.f32.mrf.mxu0 }
 0x108   :  { %v333_v19 = vadd.f32 %v922_v17, %v230_v14 }
 0x109   :  { %v313_v20 = vpop.f32.mrf.mxu0  ;;  %v960_v37 = vpop.f32.mrf.mxu1 }
 0x10a   :  { %v343_v21 = vadd.f32 %v675_v16, %v333_v19  ;;  %v332_v22 = vadd.f32 %v313_v20, %v225_v18 }
 0x10b   :  { %v429_v38 = vpop.f32.mrf.mxu1 }
 0x10c   :  { %v347_v25 = vmax.f32 %v343_v21, 0.0  ;;  %v342_v26 = vadd.f32 %v675_v16, %v332_v22 }
 0x10d   :  { %v925_v27 = vpop.f32.mrf.mxu0 }
 0x10e   :  { %351 = vst [vmem:[%s1594_s3 + $0x8] sm:$0xff] %v347_v25  ;;  %v346_v29 = vmax.f32 %v342_v26, 0.0  ;;  %v335_v30 = vadd.f32 %v925_v27, %v240_v24 }
 0x10f   :  { %v323_v31 = vpop.f32.mrf.mxu0 }
 0x110   :  { %350 = vst [vmem:[%s1594_s3] sm:$0xff] %v346_v29  ;;  %v345_v32 = vadd.f32 %v675_v16, %v335_v30  ;;  %v334_v33 = vadd.f32 %v323_v31, %v235_v28 }
 0x112   :  { %v349_v34 = vmax.f32 %v345_v32, 0.0  ;;  %v344_v35 = vadd.f32 %v675_v16, %v334_v33 }
 0x114   :  { %353 = vst [vmem:[%s1594_s3 + $0x18] sm:$0xff] %v349_v34  ;;  %v348_v36 = vmax.f32 %v344_v35, 0.0 }
 0x116   :  { %352 = vst [vmem:[%s1594_s3 + $0x10] sm:$0xff] %v348_v36 }
 0x126   :  { %v963_v39 = vpop.f32.mrf.mxu1 }
 0x128   :  { %v439_v40 = vpop.f32.mrf.mxu1 }
 0x12b   :  { %v998_v41 = vpop.f32.mrf.mxu0 }
 0x12c   :  { %v1036_v42 = vpop.f32.mrf.mxu1  ;;  %v520_v43 = vadd.f32 %v998_v41, %v960_v37 }
 0x12d   :  { %v514_v44 = vpop.f32.mrf.mxu0 }
 0x12e   :  { %v603_v45 = vpop.f32.mrf.mxu1  ;;  %v623_v46 = vadd.f32 %v1036_v42, %v520_v43  ;;  %v515_v47 = vadd.f32 %v514_v44, %v429_v38 }
 0x12f   :  { %v1001_v48 = vpop.f32.mrf.mxu0 }
 0x130   :  { %v1039_v49 = vpop.f32.mrf.mxu1  ;;  %v627_v50 = vadd.f32 %v675_v16, %v623_v46  ;;  %v622_v51 = vadd.f32 %v603_v45, %v515_v47  ;;  %v530_v52 = vadd.f32 %v1001_v48, %v963_v39 }
 0x131   :  { %v524_v53 = vpop.f32.mrf.mxu0 }
 0x132   :  { %v631_v54 = vmax.f32 %v627_v50, 0.0  ;;  %v626_v55 = vadd.f32 %v675_v16, %v622_v51  ;;  %v625_v56 = vadd.f32 %v1039_v49, %v530_v52  ;;  %v525_v57 = vadd.f32 %v524_v53, %v439_v40  ;;  %v613_v58 = vpop.f32.mrf.mxu1 }
 0x134   :  { %689 = vst [vmem:[%s1594_s3 + $0x28] sm:$0xff] %v631_v54  ;;  %v630_v59 = vmax.f32 %v626_v55, 0.0  ;;  %v629_v60 = vadd.f32 %v675_v16, %v625_v56  ;;  %v624_v61 = vadd.f32 %v613_v58, %v525_v57 }
 0x136   :  { %688 = vst [vmem:[%s1594_s3 + $0x20] sm:$0xff] %v630_v59  ;;  %v633_v62 = vmax.f32 %v629_v60, 0.0  ;;  %v628_v63 = vadd.f32 %v675_v16, %v624_v61 }
 0x138   :  { %691 = vst [vmem:[%s1594_s3 + $0x38] sm:$0xff] %v633_v62  ;;  %v632_v0 = vmax.f32 %v628_v63, 0.0 }
 0x13a   :  { %690 = vst [vmem:[%s1594_s3 + $0x30] sm:$0xff] %v632_v0 }

// kernel: g_enc_forward.7
= control target key start
LH: loop header
LB: loop body
LE: loop exit
PB: predicated region body
PF: predicated region fallthrough
CT: control target
= control target key end

     0   :  { %v1483_v3 = vmov 0.0   ;;  %s1479_s1 = inlined_call_operand.vmem [shape: f32[3,128,256], index: 1, kind: input, shape index: {}]   ;;  %s1480_s0 = inlined_call_operand.vmem [shape: f32[2,18,128], index: 0, kind: input, shape index: {}]   ;;  %s1481_s2 = inlined_call_operand.vmem [shape: f32[1,256], index: 2, kind: input, shape index: {}]   ;;  %s1482_s3 = inlined_call_operand.vmem [shape: f32[2,16,256], index: 3, kind: output, shape index: {}]  }
   0x1   :  { %v735_v0 = vld [vmem:[%s1479_s1 + $0x1f8] sm:$0xff]  ;;  %v745_v2 = vld [vmem:[%s1479_s1 + $0x1f0] sm:$0xff]  ;;  %181 = vmatprep.mubr.f32.mxu0 %v1483_v3  ;;  %258 = vmatprep.mubr.f32.mxu1 %v1483_v3  ;;  %v759_v5 = vld [vmem:[%s1479_s1 + $0x1e8] sm:$0xff] }
   0x2   :  { %v740_v1 = vld [vmem:[%s1479_s1 + $0xf8] sm:$0xff]  ;;  %117 = vmatprep.subr.mxu0 %v735_v0  ;;  %v754_v4 = vld [vmem:[%s1479_s1 + $0xf0] sm:$0xff]  ;;  %v764_v6 = vld [vmem:[%s1479_s1 + $0xe8] sm:$0xff] }
   0x3   :  { %194 = vmatprep.subr.mxu1 %v740_v1  ;;  %118 = vmatpush1.msra.mxu0 %v745_v2  ;;  %v771_v7 = vld [vmem:[%s1479_s1 + $0x1e0] sm:$0xff]  ;;  %v781_v9 = vld [vmem:[%s1479_s1 + $0x1d8] sm:$0xff]  ;;  %v793_v11 = vld [vmem:[%s1479_s1 + $0x1d0] sm:$0xff] }
   0x4   :  { %195 = vmatpush1.msra.mxu1 %v754_v4  ;;  %v776_v8 = vld [vmem:[%s1479_s1 + $0xe0] sm:$0xff]  ;;  %119 = vmatprep.subr.mxu0 %v759_v5  ;;  %v788_v10 = vld [vmem:[%s1479_s1 + $0xd8] sm:$0xff]  ;;  %v798_v12 = vld [vmem:[%s1479_s1 + $0xd0] sm:$0xff] }
   0x5   :  { %196 = vmatprep.subr.mxu1 %v764_v6  ;;  %120 = vmatpush1.msra.mxu0 %v771_v7  ;;  %v805_v13 = vld [vmem:[%s1479_s1 + $0x1c8] sm:$0xff]  ;;  %v817_v15 = vld [vmem:[%s1479_s1 + $0x1c0] sm:$0xff]  ;;  %v829_v17 = vld [vmem:[%s1479_s1 + $0x1b8] sm:$0xff] }
   0x6   :  { %197 = vmatpush1.msra.mxu1 %v776_v8  ;;  %v810_v14 = vld [vmem:[%s1479_s1 + $0xc8] sm:$0xff]  ;;  %121 = vmatprep.subr.mxu0 %v781_v9  ;;  %v822_v16 = vld [vmem:[%s1479_s1 + $0xc0] sm:$0xff]  ;;  %v834_v18 = vld [vmem:[%s1479_s1 + $0xb8] sm:$0xff] }
   0x7   :  { %198 = vmatprep.subr.mxu1 %v788_v10  ;;  %122 = vmatpush1.msra.mxu0 %v793_v11  ;;  %v841_v19 = vld [vmem:[%s1479_s1 + $0x1b0] sm:$0xff]  ;;  %v853_v21 = vld [vmem:[%s1479_s1 + $0x1a8] sm:$0xff]  ;;  %v865_v23 = vld [vmem:[%s1479_s1 + $0x1a0] sm:$0xff] }
   0x8   :  { %199 = vmatpush1.msra.mxu1 %v798_v12  ;;  %123 = vmatprep.subr.mxu0 %v805_v13  ;;  %v846_v20 = vld [vmem:[%s1479_s1 + $0xb0] sm:$0xff]  ;;  %v858_v22 = vld [vmem:[%s1479_s1 + $0xa8] sm:$0xff]  ;;  %v870_v24 = vld [vmem:[%s1479_s1 + $0xa0] sm:$0xff] }
   0x9   :  { %200 = vmatprep.subr.mxu1 %v810_v14  ;;  %124 = vmatpush1.msra.mxu0 %v817_v15  ;;  %v877_v25 = vld [vmem:[%s1479_s1 + $0x198] sm:$0xff]  ;;  %v889_v27 = vld [vmem:[%s1479_s1 + $0x190] sm:$0xff]  ;;  %v901_v29 = vld [vmem:[%s1479_s1 + $0x188] sm:$0xff] }
   0xa   :  { %201 = vmatpush1.msra.mxu1 %v822_v16  ;;  %125 = vmatprep.subr.mxu0 %v829_v17  ;;  %v882_v26 = vld [vmem:[%s1479_s1 + $0x98] sm:$0xff]  ;;  %v894_v28 = vld [vmem:[%s1479_s1 + $0x90] sm:$0xff]  ;;  %v906_v30 = vld [vmem:[%s1479_s1 + $0x88] sm:$0xff] }
   0xb   :  { %202 = vmatprep.subr.mxu1 %v834_v18  ;;  %126 = vmatpush1.msra.mxu0 %v841_v19  ;;  %v913_v31 = vld [vmem:[%s1479_s1 + $0x180] sm:$0xff]  ;;  %v925_v33 = vld [vmem:[%s1479_s1 + $0x178] sm:$0xff]  ;;  %v937_v35 = vld [vmem:[%s1479_s1 + $0x170] sm:$0xff] }
   0xc   :  { %203 = vmatpush1.msra.mxu1 %v846_v20  ;;  %127 = vmatprep.subr.mxu0 %v853_v21  ;;  %v918_v32 = vld [vmem:[%s1479_s1 + $0x80] sm:$0xff]  ;;  %v930_v34 = vld [vmem:[%s1479_s1 + $0x78] sm:$0xff]  ;;  %v942_v36 = vld [vmem:[%s1479_s1 + $0x70] sm:$0xff] }
   0xd   :  { %204 = vmatprep.subr.mxu1 %v858_v22  ;;  %128 = vmatpush1.msra.mxu0 %v865_v23  ;;  %v949_v37 = vld [vmem:[%s1479_s1 + $0x168] sm:$0xff]  ;;  %v961_v39 = vld [vmem:[%s1479_s1 + $0x160] sm:$0xff]  ;;  %v973_v41 = vld [vmem:[%s1479_s1 + $0x158] sm:$0xff] }
   0xe   :  { %205 = vmatpush1.msra.mxu1 %v870_v24  ;;  %129 = vmatprep.subr.mxu0 %v877_v25  ;;  %v954_v38 = vld [vmem:[%s1479_s1 + $0x68] sm:$0xff]  ;;  %v966_v40 = vld [vmem:[%s1479_s1 + $0x60] sm:$0xff]  ;;  %v978_v42 = vld [vmem:[%s1479_s1 + $0x58] sm:$0xff] }
   0xf   :  { %206 = vmatprep.subr.mxu1 %v882_v26  ;;  %130 = vmatpush1.msra.mxu0 %v889_v27  ;;  %v985_v43 = vld [vmem:[%s1479_s1 + $0x150] sm:$0xff]  ;;  %v997_v45 = vld [vmem:[%s1479_s1 + $0x148] sm:$0xff]  ;;  %v1009_v47 = vld [vmem:[%s1479_s1 + $0x140] sm:$0xff] }
  0x10   :  { %207 = vmatpush1.msra.mxu1 %v894_v28  ;;  %131 = vmatprep.subr.mxu0 %v901_v29  ;;  %v990_v44 = vld [vmem:[%s1479_s1 + $0x50] sm:$0xff]  ;;  %v1002_v46 = vld [vmem:[%s1479_s1 + $0x48] sm:$0xff]  ;;  %v1014_v48 = vld [vmem:[%s1479_s1 + $0x40] sm:$0xff] }
  0x11   :  { %208 = vmatprep.subr.mxu1 %v906_v30  ;;  %132 = vmatpush1.msra.mxu0 %v913_v31  ;;  %v1021_v49 = vld [vmem:[%s1479_s1 + $0x138] sm:$0xff]  ;;  %v1033_v51 = vld [vmem:[%s1479_s1 + $0x130] sm:$0xff]  ;;  %v1045_v53 = vld [vmem:[%s1479_s1 + $0x128] sm:$0xff] }
  0x12   :  { %209 = vmatpush1.msra.mxu1 %v918_v32  ;;  %133 = vmatprep.subr.mxu0 %v925_v33  ;;  %v1026_v50 = vld [vmem:[%s1479_s1 + $0x38] sm:$0xff]  ;;  %v1038_v52 = vld [vmem:[%s1479_s1 + $0x30] sm:$0xff]  ;;  %v1050_v54 = vld [vmem:[%s1479_s1 + $0x28] sm:$0xff] }
  0x13   :  { %210 = vmatprep.subr.mxu1 %v930_v34  ;;  %134 = vmatpush1.msra.mxu0 %v937_v35  ;;  %1492 = vst [vmem:[#allocation2_spill] sm:$0xff] %v1050_v54  ;;  %v1057_v55 = vld [vmem:[%s1479_s1 + $0x120] sm:$0xff]  ;;  %v1069_v57 = vld [vmem:[%s1479_s1 + $0x118] sm:$0xff]  ;;  %v1081_v59 = vld [vmem:[%s1479_s1 + $0x110] sm:$0xff] }
  0x14   :  { %211 = vmatpush1.msra.mxu1 %v942_v36  ;;  %135 = vmatprep.subr.mxu0 %v949_v37  ;;  %v1062_v56 = vld [vmem:[%s1479_s1 + $0x20] sm:$0xff]  ;;  %v1074_v58 = vld [vmem:[%s1479_s1 + $0x18] sm:$0xff]  ;;  %v1086_v60 = vld [vmem:[%s1479_s1 + $0x10] sm:$0xff] }
  0x15   :  { %212 = vmatprep.subr.mxu1 %v954_v38  ;;  %136 = vmatpush1.msra.mxu0 %v961_v39  ;;  %1493 = vst [vmem:[#allocation3_spill] sm:$0xff] %v1062_v56  ;;  %1494 = vst [vmem:[#allocation4_spill] sm:$0xff] %v1074_v58  ;;  %v1093_v61 = vld [vmem:[%s1479_s1 + $0x108] sm:$0xff]  ;;  %v1105_v63 = vld [vmem:[%s1479_s1 + $0x100] sm:$0xff] }
  0x16   :  { %213 = vmatpush1.msra.mxu1 %v966_v40  ;;  %137 = vmatprep.subr.mxu0 %v973_v41  ;;  %1495 = vst [vmem:[#allocation5_spill] sm:$0xff] %v1086_v60  ;;  %v1098_v62 = vld [vmem:[%s1479_s1 + $0x8] sm:$0xff]  ;;  %v1110_v3 = vld [vmem:[%s1479_s1] sm:$0xff] }
  0x17   :  { %214 = vmatprep.subr.mxu1 %v978_v42  ;;  %138 = vmatpush1.msra.mxu0 %v985_v43  ;;  %1496 = vst [vmem:[#allocation6_spill] sm:$0xff] %v1098_v62  ;;  %1497 = vst [vmem:[#allocation7_spill] sm:$0xff] %v1110_v3 }
  0x18   :  { %215 = vmatpush1.msra.mxu1 %v990_v44  ;;  %139 = vmatprep.subr.mxu0 %v997_v45 }
  0x19   :  { %216 = vmatprep.subr.mxu1 %v1002_v46  ;;  %140 = vmatpush1.msra.mxu0 %v1009_v47 }
  0x1a   :  { %217 = vmatpush1.msra.mxu1 %v1014_v48  ;;  %141 = vmatprep.subr.mxu0 %v1021_v49 }
  0x1b   :  { %218 = vmatprep.subr.mxu1 %v1026_v50  ;;  %142 = vmatpush1.msra.mxu0 %v1033_v51 }
  0x1c   :  { %219 = vmatpush1.msra.mxu1 %v1038_v52  ;;  %143 = vmatprep.subr.mxu0 %v1045_v53 }
  0x1d   :  { %220 = vmatprep.subr.mxu1 %v1050_v54  ;;  %144 = vmatpush1.msra.mxu0 %v1057_v55  ;;  %v1125_v54 = vld [vmem:[%s1479_s1 + $0x2f8] sm:$0xff] }
  0x1e   :  { %221 = vmatpush1.msra.mxu1 %v1062_v56  ;;  %145 = vmatprep.subr.mxu0 %v1069_v57  ;;  %v115_v56 = vld [vmem:[%s1480_s0 + $0x1] sm:$0xff] }
  0x1f   :  { %222 = vmatprep.subr.mxu1 %v1074_v58  ;;  %146 = vmatpush1.msra.mxu0 %v1081_v59  ;;  %v113_v58 = vld [vmem:[%s1480_s0] sm:$0xff] }
  0x20   :  { %223 = vmatpush1.msra.mxu1 %v1086_v60  ;;  %147 = vmatprep.subr.mxu0 %v1093_v61  ;;  %v1132_v60 = vld [vmem:[%s1479_s1 + $0x2f0] sm:$0xff] }
  0x21   :  { %224 = vmatprep.subr.mxu1 %v1098_v62  ;;  %148 = vmatpush1.msra.mxu0 %v1105_v63  ;;  %v1137_v62 = vld [vmem:[%s1479_s1 + $0x2e8] sm:$0xff] }
  0x22   :  { %225 = vmatpush1.msra.mxu1 %v1110_v3  ;;  %182 = vmatmul.mubr.f32.vlgmr.msra.gmra.mxu0 %v115_v56  ;;  %v1144_v3 = vld [vmem:[%s1479_s1 + $0x2e0] sm:$0xff]  ;;  %v1151_v56 = vld [vmem:[%s1479_s1 + $0x2d8] sm:$0xff] }
  0x23   :  { %259 = vmatmul.mubr.f32.vlgmr.msra.gmra.mxu1 %v113_v58  ;;  %273 = vmatprep.subr.mxu0 %v1125_v54  ;;  %v1499_v58 = vmov 0.0  }
  0x24   :  { %382 = vmatprep.subr.mxu1 %v735_v0  ;;  %274 = vmatpush1.msra.mxu0 %v1132_v60  ;;  %v1158_v0 = vld [vmem:[%s1479_s1 + $0x2d0] sm:$0xff] }
  0x25   :  { %383 = vmatpush1.msra.mxu1 %v745_v2  ;;  %275 = vmatprep.subr.mxu0 %v1137_v62  ;;  %v1165_v2 = vld [vmem:[%s1479_s1 + $0x2c8] sm:$0xff] }
  0x26   :  { %384 = vmatprep.subr.mxu1 %v759_v5  ;;  %276 = vmatpush1.msra.mxu0 %v1144_v3  ;;  %v1172_v5 = vld [vmem:[%s1479_s1 + $0x2c0] sm:$0xff] }
  0x27   :  { %385 = vmatpush1.msra.mxu1 %v771_v7  ;;  %277 = vmatprep.subr.mxu0 %v1151_v56  ;;  %v1179_v7 = vld [vmem:[%s1479_s1 + $0x2b8] sm:$0xff] }
  0x28   :  { %386 = vmatprep.subr.mxu1 %v781_v9  ;;  %278 = vmatpush1.msra.mxu0 %v1158_v0  ;;  %v1186_v9 = vld [vmem:[%s1479_s1 + $0x2b0] sm:$0xff] }
  0x29   :  { %387 = vmatpush1.msra.mxu1 %v793_v11  ;;  %279 = vmatprep.subr.mxu0 %v1165_v2  ;;  %v1193_v11 = vld [vmem:[%s1479_s1 + $0x2a8] sm:$0xff] }
  0x2a   :  { %388 = vmatprep.subr.mxu1 %v805_v13  ;;  %280 = vmatpush1.msra.mxu0 %v1172_v5  ;;  %v1200_v13 = vld [vmem:[%s1479_s1 + $0x2a0] sm:$0xff] }
  0x2b   :  { %389 = vmatpush1.msra.mxu1 %v817_v15  ;;  %281 = vmatprep.subr.mxu0 %v1179_v7  ;;  %v1207_v15 = vld [vmem:[%s1479_s1 + $0x298] sm:$0xff] }
  0x2c   :  { %390 = vmatprep.subr.mxu1 %v829_v17  ;;  %282 = vmatpush1.msra.mxu0 %v1186_v9  ;;  %v1214_v17 = vld [vmem:[%s1479_s1 + $0x290] sm:$0xff] }
  0x2d   :  { %391 = vmatpush1.msra.mxu1 %v841_v19  ;;  %283 = vmatprep.subr.mxu0 %v1193_v11  ;;  %v1221_v19 = vld [vmem:[%s1479_s1 + $0x288] sm:$0xff] }
  0x2e   :  { %392 = vmatprep.subr.mxu1 %v853_v21  ;;  %284 = vmatpush1.msra.mxu0 %v1200_v13  ;;  %v1228_v21 = vld [vmem:[%s1479_s1 + $0x280] sm:$0xff] }
  0x2f   :  { %393 = vmatpush1.msra.mxu1 %v865_v23  ;;  %285 = vmatprep.subr.mxu0 %v1207_v15  ;;  %v1235_v23 = vld [vmem:[%s1479_s1 + $0x278] sm:$0xff] }
  0x30   :  { %394 = vmatprep.subr.mxu1 %v877_v25  ;;  %286 = vmatpush1.msra.mxu0 %v1214_v17  ;;  %v1242_v25 = vld [vmem:[%s1479_s1 + $0x270] sm:$0xff] }
  0x31   :  { %395 = vmatpush1.msra.mxu1 %v889_v27  ;;  %287 = vmatprep.subr.mxu0 %v1221_v19  ;;  %v1249_v27 = vld [vmem:[%s1479_s1 + $0x268] sm:$0xff] }
  0x32   :  { %396 = vmatprep.subr.mxu1 %v901_v29  ;;  %288 = vmatpush1.msra.mxu0 %v1228_v21  ;;  %v1256_v29 = vld [vmem:[%s1479_s1 + $0x260] sm:$0xff] }
  0x33   :  { %397 = vmatpush1.msra.mxu1 %v913_v31  ;;  %289 = vmatprep.subr.mxu0 %v1235_v23  ;;  %v1263_v31 = vld [vmem:[%s1479_s1 + $0x258] sm:$0xff] }
  0x34   :  { %398 = vmatprep.subr.mxu1 %v925_v33  ;;  %290 = vmatpush1.msra.mxu0 %v1242_v25  ;;  %v1270_v33 = vld [vmem:[%s1479_s1 + $0x250] sm:$0xff] }
  0x35   :  { %399 = vmatpush1.msra.mxu1 %v937_v35  ;;  %291 = vmatprep.subr.mxu0 %v1249_v27  ;;  %v1277_v35 = vld [vmem:[%s1479_s1 + $0x248] sm:$0xff] }
  0x36   :  { %400 = vmatprep.subr.mxu1 %v949_v37  ;;  %292 = vmatpush1.msra.mxu0 %v1256_v29  ;;  %v1284_v37 = vld [vmem:[%s1479_s1 + $0x240] sm:$0xff] }
  0x37   :  { %401 = vmatpush1.msra.mxu1 %v961_v39  ;;  %293 = vmatprep.subr.mxu0 %v1263_v31  ;;  %v1291_v39 = vld [vmem:[%s1479_s1 + $0x238] sm:$0xff] }
  0x38   :  { %402 = vmatprep.subr.mxu1 %v973_v41  ;;  %294 = vmatpush1.msra.mxu0 %v1270_v33  ;;  %v1298_v41 = vld [vmem:[%s1479_s1 + $0x230] sm:$0xff] }
  0x39   :  { %403 = vmatpush1.msra.mxu1 %v985_v43  ;;  %295 = vmatprep.subr.mxu0 %v1277_v35  ;;  %1498 = vst [vmem:[#allocation8_spill] sm:$0xff] %v1298_v41  ;;  %v1307_v43 = vld [vmem:[%s1479_s1 + $0x228] sm:$0xff] }
  0x3a   :  { %404 = vmatprep.subr.mxu1 %v997_v45  ;;  %296 = vmatpush1.msra.mxu0 %v1284_v37  ;;  %v116_v45 = vld [vmem:[%s1480_s0 + $0x9] sm:$0xff] }
  0x3b   :  { %405 = vmatpush1.msra.mxu1 %v1009_v47  ;;  %297 = vmatprep.subr.mxu0 %v1291_v39  ;;  %v114_v47 = vld [vmem:[%s1480_s0 + $0x8] sm:$0xff] }
  0x3c   :  { %406 = vmatprep.subr.mxu1 %v1021_v49  ;;  %298 = vmatpush1.msra.mxu0 %v1298_v41  ;;  %v1322_v49 = vld [vmem:[%s1479_s1 + $0x220] sm:$0xff]  ;;  %v1334_v41 = vld [vmem:[%s1479_s1 + $0x210] sm:$0xff] }
  0x3d   :  { %407 = vmatpush1.msra.mxu1 %v1033_v51  ;;  %187 = vmatprep.mubr.f32.mxu0 %v1499_v58  ;;  %v1329_v51 = vld [vmem:[%s1479_s1 + $0x218] sm:$0xff] }
  0x3e   :  { %264 = vmatprep.mubr.f32.mxu1 %v1499_v58  ;;  %299 = vmatprep.subr.mxu0 %v1307_v43 }
  0x3f   :  { %408 = vmatprep.subr.mxu1 %v1045_v53  ;;  %188 = vmatmul.mubr.f32.gmra.mxu0 %v116_v45  ;;  %v1341_v53 = vld [vmem:[%s1479_s1 + $0x208] sm:$0xff]  ;;  %v1348_v45 = vld [vmem:[%s1479_s1 + $0x200] sm:$0xff] }
  0x40   :  { %265 = vmatmul.mubr.f32.gmra.mxu1 %v114_v47  ;;  %300 = vmatpush1.msra.mxu0 %v1322_v49 }
  0x41   :  { %409 = vmatpush1.msra.mxu1 %v1057_v55  ;;  %301 = vmatprep.subr.mxu0 %v1329_v51  ;;  %v271_v55 = vld [vmem:[%s1480_s0 + $0x2] sm:$0xff] }
  0x42   :  { %410 = vmatprep.subr.mxu1 %v1069_v57  ;;  %302 = vmatpush1.msra.mxu0 %v1334_v41  ;;  %v702_v57 = vld [vmem:[%s1480_s0 + $0x19] sm:$0xff] }
  0x43   :  { %411 = vmatpush1.msra.mxu1 %v1081_v59  ;;  %303 = vmatprep.subr.mxu0 %v1341_v53  ;;  %v272_v59 = vld [vmem:[%s1480_s0 + $0xa] sm:$0xff] }
  0x44   :  { %412 = vmatprep.subr.mxu1 %v1093_v61  ;;  %304 = vmatpush1.msra.mxu0 %v1348_v45 }
  0x45   :  { %337 = vmatprep.mubr.f32.mxu0 %v1499_v58  ;;  %413 = vmatpush1.msra.mxu1 %v1105_v63 }
  0x46   :  { %338 = vmatmul.mubr.f32.vlgmr.msra.gmra.mxu0 %v271_v55  ;;  %446 = vmatprep.mubr.f32.mxu1 %v1499_v58 }
  0x47   :  { %459 = vmatprep.subr.mxu0 %v740_v1  ;;  %538 = vmatprep.subr.mxu1 %v1125_v54  ;;  %v1500_v1 = vld [vmem:[#allocation8_spill] sm:$0xff] }
  0x48   :  { %447 = vmatmul.mubr.f32.vlgmr.msra.gmra.mxu1 %v702_v57  ;;  %460 = vmatpush1.msra.mxu0 %v754_v4  ;;  %v703_v4 = vld [vmem:[%s1480_s0 + $0x21] sm:$0xff] }
  0x49   :  { %539 = vmatpush1.msra.mxu1 %v1132_v60  ;;  %461 = vmatprep.subr.mxu0 %v764_v6  ;;  %v1502_v6 = vld [vmem:[#allocation3_spill] sm:$0xff] }
  0x4a   :  { %540 = vmatprep.subr.mxu1 %v1137_v62  ;;  %343 = vmatprep.mubr.f32.mxu0 %v1499_v58 }
  0x4b   :  { %462 = vmatpush1.msra.mxu0 %v776_v8  ;;  %541 = vmatpush1.msra.mxu1 %v1144_v3  ;;  %v1501_v3 = vld [vmem:[#allocation2_spill] sm:$0xff]  ;;  %v1503_v8 = vld [vmem:[#allocation4_spill] sm:$0xff] }
  0x4c   :  { %344 = vmatmul.mubr.f32.gmra.mxu0 %v272_v59  ;;  %463 = vmatprep.subr.mxu0 %v788_v10  ;;  %v1504_v10 = vld [vmem:[#allocation5_spill] sm:$0xff] }
  0x4d   :  { %542 = vmatprep.subr.mxu1 %v1151_v56  ;;  %464 = vmatpush1.msra.mxu0 %v798_v12  ;;  %v1505_v12 = vld [vmem:[#allocation6_spill] sm:$0xff] }
  0x4e   :  { %543 = vmatpush1.msra.mxu1 %v1158_v0  ;;  %465 = vmatprep.subr.mxu0 %v810_v14  ;;  %v700_v14 = vld [vmem:[%s1480_s0 + $0x18] sm:$0xff] }
  0x4f   :  { %544 = vmatprep.subr.mxu1 %v1165_v2  ;;  %466 = vmatpush1.msra.mxu0 %v822_v16  ;;  %v704_v16 = vld [vmem:[%s1480_s0 + $0x1a] sm:$0xff] }
  0x50   :  { %545 = vmatpush1.msra.mxu1 %v1172_v5  ;;  %467 = vmatprep.subr.mxu0 %v834_v18  ;;  %v1506_v18 = vld [vmem:[#allocation7_spill] sm:$0xff] }
  0x51   :  { %546 = vmatprep.subr.mxu1 %v1179_v7  ;;  %468 = vmatpush1.msra.mxu0 %v846_v20  ;;  %v701_v20 = vld [vmem:[%s1480_s0 + $0x20] sm:$0xff] }
  0x52   :  { %547 = vmatpush1.msra.mxu1 %v1186_v9  ;;  %469 = vmatprep.subr.mxu0 %v858_v22  ;;  %v705_v22 = vld [vmem:[%s1480_s0 + $0x22] sm:$0xff] }
  0x53   :  { %548 = vmatprep.subr.mxu1 %v1193_v11  ;;  %470 = vmatpush1.msra.mxu0 %v870_v24  ;;  %v355_v24 = vlaneseq }
  0x54   :  { %549 = vmatpush1.msra.mxu1 %v1200_v13  ;;  %471 = vmatprep.subr.mxu0 %v882_v26 }
  0x55   :  { %550 = vmatprep.subr.mxu1 %v1207_v15  ;;  %472 = vmatpush1.msra.mxu0 %v894_v28  ;;  %v356_v28 = vshrl.u32 %v355_v24, 7 }
  0x56   :  { %551 = vmatpush1.msra.mxu1 %v1214_v17  ;;  %473 = vmatprep.subr.mxu0 %v906_v30 }
  0x57   :  { %552 = vmatprep.subr.mxu1 %v1221_v19  ;;  %474 = vmatpush1.msra.mxu0 %v918_v32 }
  0x58   :  { %553 = vmatpush1.msra.mxu1 %v1228_v21  ;;  %475 = vmatprep.subr.mxu0 %v930_v34 }
  0x59   :  { %554 = vmatprep.subr.mxu1 %v1235_v23  ;;  %476 = vmatpush1.msra.mxu0 %v942_v36  ;;  %v357_v36 = vsub.s32 0, %v356_v28 }
  0x5a   :  { %555 = vmatpush1.msra.mxu1 %v1242_v25  ;;  %477 = vmatprep.subr.mxu0 %v954_v38 }
  0x5b   :  { %556 = vmatprep.subr.mxu1 %v1249_v27  ;;  %478 = vmatpush1.msra.mxu0 %v966_v40  ;;  %v112_v40 = vld [vmem:[%s1481_s2] sm:$0x3] }
  0x5c   :  { %557 = vmatpush1.msra.mxu1 %v1256_v29  ;;  %479 = vmatprep.subr.mxu0 %v978_v42  ;;  %v361_v42 = vsub.s32 1, %v356_v28 }
  0x5d   :  { %558 = vmatprep.subr.mxu1 %v1263_v31  ;;  %480 = vmatpush1.msra.mxu0 %v990_v44 }
  0x5e   :  { %559 = vmatpush1.msra.mxu1 %v1270_v33  ;;  %481 = vmatprep.subr.mxu0 %v1002_v46  ;;  %v362_v61 = vrot.slane %v112_v40, %v361_v42 }
  0x5f   :  { %560 = vmatprep.subr.mxu1 %v1277_v35  ;;  %482 = vmatpush1.msra.mxu0 %v1014_v48  ;;  %v358_v48 = vrot.slane %v112_v40, %v357_v36 }
  0x60   :  { %561 = vmatpush1.msra.mxu1 %v1284_v37  ;;  %483 = vmatprep.subr.mxu0 %v1026_v50 }
  0x61   :  { %562 = vmatprep.subr.mxu1 %v1291_v39  ;;  %484 = vmatpush1.msra.mxu0 %v1038_v52 }
  0x62   :  { %563 = vmatpush1.msra.mxu1 %v1500_v1  ;;  %485 = vmatprep.subr.mxu0 %v1501_v3 }
  0x63   :  { %564 = vmatprep.subr.mxu1 %v1307_v43  ;;  %452 = vmatprep.mubr.f32.mxu1 %v1499_v58 }
  0x64   :  { %486 = vmatpush1.msra.mxu0 %v1502_v6  ;;  %565 = vmatpush1.msra.mxu1 %v1322_v49 }
  0x65   :  { %487 = vmatprep.subr.mxu0 %v1503_v8  ;;  %453 = vmatmul.mubr.f32.gmra.mxu1 %v703_v4 }
  0x66   :  { %566 = vmatprep.subr.mxu1 %v1329_v51  ;;  %488 = vmatpush1.msra.mxu0 %v1504_v10 }
  0x67   :  { %567 = vmatpush1.msra.mxu1 %v1334_v41  ;;  %489 = vmatprep.subr.mxu0 %v1505_v12 }
  0x68   :  { %568 = vmatprep.subr.mxu1 %v1341_v53  ;;  %490 = vmatpush1.msra.mxu0 %v1506_v18 }
  0x69   :  { %523 = vmatprep.mubr.f32.mxu0 %v1499_v58  ;;  %569 = vmatpush1.msra.mxu1 %v1348_v45 }
  0x6a   :  { %602 = vmatprep.mubr.f32.mxu1 %v1499_v58  ;;  %524 = vmatmul.mubr.f32.vlgmr.msra.gmra.mxu0 %v700_v14 }
  0x6b   :  { %603 = vmatmul.mubr.f32.vlgmr.msra.gmra.mxu1 %v704_v16  ;;  %529 = vmatprep.mubr.f32.mxu0 %v1499_v58 }
  0x6c   :  { %608 = vmatprep.mubr.f32.mxu1 %v1499_v58 }
  0x6e   :  { %530 = vmatmul.mubr.f32.gmra.mxu0 %v701_v20 }
  0x6f   :  { %609 = vmatmul.mubr.f32.gmra.mxu1 %v705_v22 }
  0xe2   :  { %v183_v26 = vpop.f32.mrf.mxu0 }
  0xe3   :  { %v260_v32 = vpop.f32.mrf.mxu1 }
  0xe4   :  { %v185_v30 = vpop.f32.mrf.mxu0  ;;  %v261_v46 = vadd.f32 %v260_v32, %v183_v26 }
  0xe5   :  { %v262_v44 = vpop.f32.mrf.mxu1 }
  0xe6   :  { %v263_v54 = vadd.f32 %v262_v44, %v185_v30 }
  0xff   :  { %v189_v34 = vpop.f32.mrf.mxu0 }
 0x100   :  { %v266_v50 = vpop.f32.mrf.mxu1 }
 0x101   :  { %v191_v38 = vpop.f32.mrf.mxu0  ;;  %v267_v2 = vadd.f32 %v266_v50, %v189_v34 }
 0x102   :  { %v268_v0 = vpop.f32.mrf.mxu1 }
 0x103   :  { %v269_v11 = vadd.f32 %v268_v0, %v191_v38 }
 0x106   :  { %v339_v52 = vpop.f32.mrf.mxu0 }
 0x107   :  { %v350_v60 = vadd.f32 %v339_v52, %v261_v46 }
 0x108   :  { %v341_v62 = vpop.f32.mrf.mxu0  ;;  %v448_v29 = vpop.f32.mrf.mxu1 }
 0x109   :  { %v365_v63 = vadd.f32 %v358_v48, %v350_v60  ;;  %v351_v56 = vadd.f32 %v341_v62, %v263_v54 }
 0x10a   :  { %v450_v31 = vpop.f32.mrf.mxu1 }
 0x10b   :  { %v369_v5 = vmax.f32 %v365_v63, 0.0  ;;  %v366_v7 = vadd.f32 %v362_v61, %v351_v56 }
 0x10c   :  { %v345_v9 = vpop.f32.mrf.mxu0 }
 0x10d   :  { %373 = vst [vmem:[%s1482_s3] sm:$0xff] %v369_v5  ;;  %v370_v13 = vmax.f32 %v366_v7, 0.0  ;;  %v352_v15 = vadd.f32 %v345_v9, %v267_v2 }
 0x10e   :  { %v347_v17 = vpop.f32.mrf.mxu0 }
 0x10f   :  { %374 = vst [vmem:[%s1482_s3 + $0x8] sm:$0xff] %v370_v13  ;;  %v367_v19 = vadd.f32 %v358_v48, %v352_v15  ;;  %v353_v21 = vadd.f32 %v347_v17, %v269_v11 }
 0x111   :  { %v371_v23 = vmax.f32 %v367_v19, 0.0  ;;  %v368_v25 = vadd.f32 %v362_v61, %v353_v21 }
 0x113   :  { %375 = vst [vmem:[%s1482_s3 + $0x10] sm:$0xff] %v371_v23  ;;  %v372_v27 = vmax.f32 %v368_v25, 0.0 }
 0x115   :  { %376 = vst [vmem:[%s1482_s3 + $0x18] sm:$0xff] %v372_v27 }
 0x125   :  { %v454_v33 = vpop.f32.mrf.mxu1 }
 0x127   :  { %v456_v35 = vpop.f32.mrf.mxu1 }
 0x12a   :  { %v525_v37 = vpop.f32.mrf.mxu0 }
 0x12b   :  { %v604_v39 = vpop.f32.mrf.mxu1  ;;  %v526_v41 = vadd.f32 %v525_v37, %v448_v29 }
 0x12c   :  { %v527_v43 = vpop.f32.mrf.mxu0 }
 0x12d   :  { %v606_v47 = vpop.f32.mrf.mxu1  ;;  %v615_v58 = vadd.f32 %v604_v39, %v526_v41  ;;  %v528_v49 = vadd.f32 %v527_v43, %v450_v31 }
 0x12e   :  { %v531_v51 = vpop.f32.mrf.mxu0 }
 0x12f   :  { %v610_v53 = vpop.f32.mrf.mxu1  ;;  %v619_v45 = vadd.f32 %v615_v58, %v358_v48  ;;  %v616_v55 = vadd.f32 %v606_v47, %v528_v49  ;;  %v532_v57 = vadd.f32 %v531_v51, %v454_v33 }
 0x130   :  { %v533_v59 = vpop.f32.mrf.mxu0 }
 0x131   :  { %v623_v1 = vmax.f32 %v619_v45, 0.0  ;;  %v620_v3 = vadd.f32 %v616_v55, %v362_v61  ;;  %v617_v4 = vadd.f32 %v610_v53, %v532_v57  ;;  %v534_v6 = vadd.f32 %v533_v59, %v456_v35  ;;  %v612_v8 = vpop.f32.mrf.mxu1 }
 0x133   :  { %706 = vst [vmem:[%s1482_s3 + $0x20] sm:$0xff] %v623_v1  ;;  %v624_v10 = vmax.f32 %v620_v3, 0.0  ;;  %v621_v12 = vadd.f32 %v617_v4, %v358_v48  ;;  %v618_v14 = vadd.f32 %v612_v8, %v534_v6 }
 0x135   :  { %707 = vst [vmem:[%s1482_s3 + $0x28] sm:$0xff] %v624_v10  ;;  %v625_v16 = vmax.f32 %v621_v12, 0.0  ;;  %v622_v18 = vadd.f32 %v618_v14, %v362_v61 }
 0x137   :  { %708 = vst [vmem:[%s1482_s3 + $0x30] sm:$0xff] %v625_v16  ;;  %v626_v20 = vmax.f32 %v622_v18, 0.0 }
 0x139   :  { %709 = vst [vmem:[%s1482_s3 + $0x38] sm:$0xff] %v626_v20 }

// kernel: g_enc_forward.8
= control target key start
LH: loop header
LB: loop body
LE: loop exit
PB: predicated region body
PF: predicated region fallthrough
CT: control target
= control target key end

     0   :  { %vm155_vm0 = vcmask 785408   ;;  %s653_s2 = inlined_call_operand.vmem [shape: f32[256,96], index: 2, kind: input, shape index: {}]   ;;  %s654_s6 = inlined_call_operand.vmem [shape: f32[2,32], index: 6, kind: output, shape index: {}]   ;;  %s655_s0 = inlined_call_operand.vmem [shape: f32[32,256], index: 0, kind: input, shape index: {}]   ;;  %s656_s3 = inlined_call_operand.vmem [shape: f32[32,96], index: 3, kind: input, shape index: {}]   ;;  %s657_s1 = inlined_call_operand.vmem [shape: f32[8,32], index: 1, kind: input, shape index: {}]   ;;  %s658_s5 = inlined_call_operand.vmem [shape: f32[1,96], index: 5, kind: input, shape index: {}]   ;;  %s659_s4 = inlined_call_operand.vmem [shape: f32[1,96], index: 4, kind: input, shape index: {}]  }
   0x1   :  { %v62_v0 = vld [vmem:[%s653_s2 + $0xf8] sm:$0xff]  ;;  %v61_v2 = vld [vmem:[%s653_s2 + $0xf0] sm:$0xff]  ;;  %v60_v4 = vld [vmem:[%s653_s2 + $0xe8] sm:$0xff] }
   0x2   :  { %v46_v1 = vld [vmem:[%s653_s2 + $0x78] sm:$0xff]  ;;  %310 = vmatprep.subr.mxu0 %v62_v0  ;;  %370 = vmatprep.subr.mxu1 %v62_v0  ;;  %v45_v3 = vld [vmem:[%s653_s2 + $0x70] sm:$0xff]  ;;  %v44_v5 = vld [vmem:[%s653_s2 + $0x68] sm:$0xff] }
   0x3   :  { %311 = vmatpush3.msra.mxu0 %v46_v1  ;;  %386 = vmatpush3.msra.mxu1 %v46_v1  ;;  %v59_v6 = vld [vmem:[%s653_s2 + $0xe0] sm:$0xff]  ;;  %v58_v8 = vld [vmem:[%s653_s2 + $0xd8] sm:$0xff]  ;;  %v57_v10 = vld [vmem:[%s653_s2 + $0xd0] sm:$0xff] }
   0x4   :  { %312 = vmatprep.subr.mxu0 %v61_v2  ;;  %371 = vmatprep.subr.mxu1 %v61_v2  ;;  %v43_v7 = vld [vmem:[%s653_s2 + $0x60] sm:$0xff]  ;;  %v42_v9 = vld [vmem:[%s653_s2 + $0x58] sm:$0xff]  ;;  %v41_v11 = vld [vmem:[%s653_s2 + $0x50] sm:$0xff] }
   0x5   :  { %313 = vmatpush3.msra.mxu0 %v45_v3  ;;  %387 = vmatpush3.msra.mxu1 %v45_v3  ;;  %v56_v12 = vld [vmem:[%s653_s2 + $0xc8] sm:$0xff]  ;;  %v55_v14 = vld [vmem:[%s653_s2 + $0xc0] sm:$0xff]  ;;  %v54_v16 = vld [vmem:[%s653_s2 + $0xb8] sm:$0xff] }
   0x6   :  { %314 = vmatprep.subr.mxu0 %v60_v4  ;;  %372 = vmatprep.subr.mxu1 %v60_v4  ;;  %v40_v13 = vld [vmem:[%s653_s2 + $0x48] sm:$0xff]  ;;  %v39_v15 = vld [vmem:[%s653_s2 + $0x40] sm:$0xff]  ;;  %v38_v17 = vld [vmem:[%s653_s2 + $0x38] sm:$0xff] }
   0x7   :  { %315 = vmatpush3.msra.mxu0 %v44_v5  ;;  %388 = vmatpush3.msra.mxu1 %v44_v5  ;;  %v53_v18 = vld [vmem:[%s653_s2 + $0xb0] sm:$0xff]  ;;  %v52_v20 = vld [vmem:[%s653_s2 + $0xa8] sm:$0xff]  ;;  %v51_v22 = vld [vmem:[%s653_s2 + $0xa0] sm:$0xff] }
   0x8   :  { %316 = vmatprep.subr.mxu0 %v59_v6  ;;  %373 = vmatprep.subr.mxu1 %v59_v6  ;;  %v37_v19 = vld [vmem:[%s653_s2 + $0x30] sm:$0xff]  ;;  %v36_v21 = vld [vmem:[%s653_s2 + $0x28] sm:$0xff]  ;;  %v35_v23 = vld [vmem:[%s653_s2 + $0x20] sm:$0xff] }
   0x9   :  { %317 = vmatpush3.msra.mxu0 %v43_v7  ;;  %389 = vmatpush3.msra.mxu1 %v43_v7  ;;  %v50_v24 = vld [vmem:[%s653_s2 + $0x98] sm:$0xff]  ;;  %v49_v26 = vld [vmem:[%s653_s2 + $0x90] sm:$0xff]  ;;  %v48_v28 = vld [vmem:[%s653_s2 + $0x88] sm:$0xff] }
   0xa   :  { %318 = vmatprep.subr.mxu0 %v58_v8  ;;  %374 = vmatprep.subr.mxu1 %v58_v8  ;;  %v34_v25 = vld [vmem:[%s653_s2 + $0x18] sm:$0xff]  ;;  %v33_v27 = vld [vmem:[%s653_s2 + $0x10] sm:$0xff]  ;;  %v32_v29 = vld [vmem:[%s653_s2 + $0x8] sm:$0xff] }
   0xb   :  { %319 = vmatpush3.msra.mxu0 %v42_v9  ;;  %390 = vmatpush3.msra.mxu1 %v42_v9  ;;  %v47_v30 = vld [vmem:[%s653_s2 + $0x80] sm:$0xff]  ;;  %v24_v32 = vld [vmem:[%s655_s0 + $0x8] sm:$0xff]  ;;  %v26_v36 = vld [vmem:[%s655_s0 + $0x18] sm:$0xff] }
   0xc   :  { %320 = vmatprep.subr.mxu0 %v57_v10  ;;  %375 = vmatprep.subr.mxu1 %v57_v10  ;;  %v31_v31 = vld [vmem:[%s653_s2] sm:$0xff]  ;;  %v28_v33 = vld [vmem:[%s655_s0 + $0x28] sm:$0xff]  ;;  %v30_v37 = vld [vmem:[%s655_s0 + $0x38] sm:$0xff] }
   0xd   :  { %321 = vmatpush3.msra.mxu0 %v41_v11  ;;  %391 = vmatpush3.msra.mxu1 %v41_v11  ;;  %v23_v34 = vld [vmem:[%s655_s0] sm:$0xff]  ;;  %v25_v38 = vld [vmem:[%s655_s0 + $0x10] sm:$0xff]  ;;  %v613_v41 = vld [vmem:[%s656_s3 + $0x8] sm:$0xff] }
   0xe   :  { %322 = vmatprep.subr.mxu0 %v56_v12  ;;  %376 = vmatprep.subr.mxu1 %v56_v12  ;;  %v27_v35 = vld [vmem:[%s655_s0 + $0x20] sm:$0xff]  ;;  %v29_v39 = vld [vmem:[%s655_s0 + $0x30] sm:$0xff]  ;;  %v623_v43 = vld [vmem:[%s656_s3 + $0x18] sm:$0xff] }
   0xf   :  { %323 = vmatpush3.msra.mxu0 %v40_v13  ;;  %392 = vmatpush3.msra.mxu1 %v40_v13  ;;  %v608_v40 = vld [vmem:[%s656_s3] sm:$0xff]  ;;  %v618_v42 = vld [vmem:[%s656_s3 + $0x10] sm:$0xff] }
  0x10   :  { %324 = vmatprep.subr.mxu0 %v55_v14  ;;  %377 = vmatprep.subr.mxu1 %v55_v14  ;;  %v628_v44 = vld [vmem:[%s658_s5] ss:$0 sm:$0xff] }
  0x11   :  { %325 = vmatpush3.msra.mxu0 %v39_v15  ;;  %393 = vmatpush3.msra.mxu1 %v39_v15  ;;  %v165_v45 = vld [vmem:[%s657_s1] sm:$0xff]   ;;  %s636_s1 = smov 0  }
  0x12   :  { %326 = vmatprep.subr.mxu0 %v54_v16  ;;  %378 = vmatprep.subr.mxu1 %v54_v16  ;;  %v305_v48 = vld [vmem:[%s659_s4] ss:$0 sm:$0xff]  ;;  %v437_v63 = vmov %v165_v45  }
  0x13   :  { %327 = vmatpush3.msra.mxu0 %v38_v17  ;;  %394 = vmatpush3.msra.mxu1 %v38_v17 }
  0x14   :  { %328 = vmatprep.subr.mxu0 %v53_v18  ;;  %379 = vmatprep.subr.mxu1 %v53_v18 }
  0x15   :  { %329 = vmatpush3.msra.mxu0 %v37_v19  ;;  %395 = vmatpush3.msra.mxu1 %v37_v19 }
  0x16   :  { %330 = vmatprep.subr.mxu0 %v52_v20  ;;  %380 = vmatprep.subr.mxu1 %v52_v20 }
  0x17   :  { %331 = vmatpush3.msra.mxu0 %v36_v21  ;;  %396 = vmatpush3.msra.mxu1 %v36_v21 }
  0x18   :  { %332 = vmatprep.subr.mxu0 %v51_v22  ;;  %381 = vmatprep.subr.mxu1 %v51_v22 }
  0x19   :  { %333 = vmatpush3.msra.mxu0 %v35_v23  ;;  %397 = vmatpush3.msra.mxu1 %v35_v23 }
  0x1a   :  { %334 = vmatprep.subr.mxu0 %v50_v24  ;;  %382 = vmatprep.subr.mxu1 %v50_v24 }
  0x1b   :  { %335 = vmatpush3.msra.mxu0 %v34_v25  ;;  %398 = vmatpush3.msra.mxu1 %v34_v25 }
  0x1c   :  { %336 = vmatprep.subr.mxu0 %v49_v26  ;;  %383 = vmatprep.subr.mxu1 %v49_v26 }
  0x1d   :  { %337 = vmatpush3.msra.mxu0 %v33_v27  ;;  %399 = vmatpush3.msra.mxu1 %v33_v27 }
  0x1e   :  { %338 = vmatprep.subr.mxu0 %v48_v28  ;;  %384 = vmatprep.subr.mxu1 %v48_v28 }
  0x1f   :  { %339 = vmatpush3.msra.mxu0 %v32_v29  ;;  %400 = vmatpush3.msra.mxu1 %v32_v29 }
  0x20   :  { %340 = vmatprep.subr.mxu0 %v47_v30  ;;  %385 = vmatprep.subr.mxu1 %v47_v30 }
  0x21   :  { %341 = vmatpush3.msra.mxu0 %v31_v31  ;;  %401 = vmatpush3.msra.mxu1 %v31_v31 }
  0x22   :  { %134 = vmatprep.mubr.f32.mxu0 %v24_v32  ;;  %144 = vmatprep.mubr.f32.mxu1 %v28_v33 }
  0x23   :  { %135 = vmatmul.mubr.f32.vlgmr.msra.gmra.mxu0 %v23_v34  ;;  %145 = vmatmul.mubr.f32.vlgmr.msra.gmra.mxu1 %v27_v35 }
  0x24   :  { %139 = vmatprep.mubr.f32.mxu0 %v26_v36  ;;  %149 = vmatprep.mubr.f32.mxu1 %v30_v37 }
  0x27   :  { %140 = vmatmul.mubr.f32.gmra.mxu0 %v25_v38  ;;  %150 = vmatmul.mubr.f32.gmra.mxu1 %v29_v39 }
  0xe3   :  { %v342_v46 = vpop.f32.mrf.mxu0  ;;  %v348_v47 = vpop.f32.mrf.mxu1 }
  0xe5   :  { %v343_v49 = vpop.f32.mrf.mxu0  ;;  %v349_v50 = vpop.f32.mrf.mxu1 }
  0xe6   :  { %v344_v51 = vadd.f32 %v343_v49, %v342_v46  ;;  %v350_v52 = vadd.f32 %v349_v50, %v348_v47 }
  0xe7   :  { %v345_v53 = vpop.f32.mrf.mxu0  ;;  %v351_v54 = vpop.f32.mrf.mxu1 }
  0xe8   :  { %v137_v55 = vadd.f32 %v344_v51, %v305_v48  ;;  %v147_v56 = vadd.f32 %v350_v52, %v305_v48 }
  0xe9   :  { %v346_v57 = vpop.f32.mrf.mxu0  ;;  %v352_v58 = vpop.f32.mrf.mxu1 }
  0xea   :  { %156 = vst.msk [vmem:[#allocation2] sm:$0xff] %vm155_vm0, %v137_v55  ;;  %158 = vst.msk [vmem:[#allocation2 + $0x10] sm:$0xff] %vm155_vm0, %v147_v56  ;;  %v347_v59 = vadd.f32 %v346_v57, %v345_v53  ;;  %v353_v60 = vadd.f32 %v352_v58, %v351_v54 }
  0xec   :  { %v142_v61 = vadd.f32 %v347_v59, %v305_v48  ;;  %v152_v62 = vadd.f32 %v353_v60, %v305_v48 }
  0xee   :  { %157 = vst.msk [vmem:[#allocation2 + $0x8] sm:$0xff] %vm155_vm0, %v142_v61  ;;  %159 = vst.msk [vmem:[#allocation2 + $0x18] sm:$0xff] %vm155_vm0, %v152_v62 }
  0xef LB: > { %v445_v0 = vmov 0.0   ;;  %vm446_vm1 = vmmov 0   ;;  %vm182_vm2 = vcmask 261120   ;;  %s447_s3 = smov 64   ;;  %s306_s4 = sshll.u32 %s443_s1, 3  ;;  %s443_s1 = sphi %s636_s1, %s171_s1   ;;  %v439_v63 = vphi %v437_v63, %v438_v63  }
  0xf0   : > { %359 = vmatprep.subr.mxu0 %v445_v0  ;;  %367 = vmatprep.mubr.msk.f32.mxu0 %vm446_vm1, %v445_v0  ;;  %s174_s5 = scalar_lea.vmem [#allocation2], %s306_s4  ;;  %s448_s17 = smov 96  }
  0xf1   : > { %360 = vmatpush3.msra.mxu0 %v623_v43  ;;  %s449_s18 = smov 32   ;;  %s171_s1 = sadd.s32 1, %s443_s1  }
  0xf2   : > { %361 = vmatprep.subr.mxu0 %v445_v0  ;;  %p168_p0 = scmp.ge.s32.totalorder %s171_s1, 4  }
  0xf3   : > { %362 = vmatpush3.msra.mxu0 %v618_v42  ;;  %vm289_vm3 = vcmask (%p168_p0), 254976  }
  0xf4   : > { %363 = vmatprep.subr.mxu0 %v445_v0 }
  0xf5   : > { %364 = vmatpush3.msra.mxu0 %v613_v41  ;;  %v175_v4 = vld [vmem:[%s174_s5] sm:$0xff] }
  0xf6   : > { %365 = vmatprep.subr.mxu0 %v445_v0 }
  0xf7   : > { %366 = vmatpush3.msra.mxu0 %v608_v40 }
  0xf8   : > { %368 = vmatmul.mubr.msk.f32.vlgmr.msra.gmra.mxu0 %vm182_vm2, %v439_v63 }
 0x1b8   : > { %v252_v1 = vpop.f32.mrf.mxu0 }
 0x1b9   : > { %v253_v2 = vadd.f32 %v628_v44, %v252_v1 }
 0x1ba   : > { %v369_v3 = vpop.f32.mrf.mxu0 }
 0x1bb   : > { %264 = vrot.lane.b32.xlu0 %v253_v2, %s447_s3  ;;  %v256_v5 = vadd.f32 %v253_v2, %v175_v4 }
 0x1bd   : > { %v309_v6 = vmul.f32 -1.442695, %v256_v5 }
 0x1bf   : > { %423 = vpow2.f32 %v309_v6 }
 0x1cc   : > { %v424_v7 = vpop.eup %423 }
 0x1cd   : > { %v260_v8 = vadd.f32 1.0, %v424_v7 }
 0x1cf   : > { %425 = vrcp.f32 %v260_v8 }
 0x1dc   : > { %v426_v9 = vpop.eup %425 }
 0x1dd   : > { %v274_v16 = vsub.f32 1.0, %v426_v9 }
 0x22d   : > { %v265_v10 = vpop.permute.xlu0 %264 }
 0x22e   : > { %v267_v11 = vmul.f32 %v426_v9, %v265_v10 }
 0x230   : > { %269 = vrot.lane.b32.xlu0 %v267_v11, %s447_s3 }
 0x2a2   : > { %v270_v12 = vpop.permute.xlu0 %269 }
 0x2a3   : > { %v272_v13 = vadd.f32 %v270_v12, %v175_v4 }
 0x2a5   : > { %427 = vtanh.f32 %v272_v13 }
 0x2b2   : > { %v428_v14 = vpop.eup %427 }
 0x2b3   : > { %276 = vrot.lane.b32.xlu1 %v428_v14, %s448_s17 }
 0x2b7   : > { %280 = vrot.lane.b32.xlu1 %v439_v63, %s449_s18 }
 0x325   : > { %v277_v15 = vpop.permute.xlu1 %276 }
 0x326   : > { %v279_v18 = vmul.f32 %v277_v15, %v274_v16 }
 0x329   : > { %v281_v17 = vpop.permute.xlu1 %280 }
 0x32a   : > { %v283_v19 = vmul.f32 %v426_v9, %v281_v17 }
 0x32c   : > { %v284_v20 = vadd.f32 %v283_v19, %v279_v18 }
 0x32e   : > { %286 = vrot.lane.b32.xlu0 %v284_v20, %s448_s17 }
 0x39d   :  { %170 = sbr.rel (!%p168_p0) target bundleno = 239 (0xef), region = 52 }
 0x3a0   : > { %v287_v21 = vpop.permute.xlu0 %286  }
 0x3a1   : > { %v438_v63 = vmov %v287_v21   ;;  %290 = vst.msk [vmem:[%s654_s6] sm:$0x3] (%p168_p0), %vm289_vm3, %v287_v21 }

// kernel: g_enc_forward.9
= control target key start
LH: loop header
LB: loop body
LE: loop exit
PB: predicated region body
PF: predicated region fallthrough
CT: control target
= control target key end

     0   :  { %vm95_vm0 = vcmask 261120   ;;  %v1030_v17 = vmov 0.0   ;;  %s1290_s0 = inlined_call_operand.vmem [shape: f32[4,2,256], index: 0, kind: input, shape index: {}]   ;;  %s1291_s1 = inlined_call_operand.vmem [shape: f32[2,32], index: 1, kind: input, shape index: {}]   ;;  %s1292_s2 = inlined_call_operand.vmem [shape: f32[32,1024], index: 2, kind: input, shape index: {}]   ;;  %s1293_s3 = inlined_call_operand.vmem [shape: f32[1,1024], index: 3, kind: input, shape index: {}]   ;;  %s1294_s4 = inlined_call_operand.hbm [shape: f32[1,1], index: 4, kind: output, shape index: {0}]   ;;  %s1295_s5 = inlined_call_operand.vmem [shape: s32[4,1], index: 5, kind: output, shape index: {1}]  }
   0x1   :  { %v46_v0 = vld [vmem:[%s1292_s2 + $0xc8] sm:$0xff]  ;;  %v48_v1 = vld [vmem:[%s1292_s2 + $0xd8] sm:$0xff]  ;;  %v45_v2 = vld [vmem:[%s1292_s2 + $0xc0] sm:$0xff]  ;;  %163 = vmatprep.mubr.f32.mxu0 %v1030_v17  ;;  %234 = vmatprep.mubr.f32.mxu1 %v1030_v17 }
   0x2   :  { %123 = vmatprep.subr.mxu0 %v46_v0  ;;  %194 = vmatprep.subr.mxu1 %v48_v1  ;;  %v47_v3 = vld [vmem:[%s1292_s2 + $0xd0] sm:$0xff]  ;;  %v38_v4 = vld [vmem:[%s1292_s2 + $0x88] sm:$0xff]  ;;  %v40_v5 = vld [vmem:[%s1292_s2 + $0x98] sm:$0xff] }
   0x3   :  { %124 = vmatpush1.msra.mxu0 %v45_v2  ;;  %195 = vmatpush1.msra.mxu1 %v47_v3  ;;  %v37_v6 = vld [vmem:[%s1292_s2 + $0x80] sm:$0xff]  ;;  %v39_v7 = vld [vmem:[%s1292_s2 + $0x90] sm:$0xff]  ;;  %v30_v8 = vld [vmem:[%s1292_s2 + $0x48] sm:$0xff] }
   0x4   :  { %125 = vmatprep.subr.mxu0 %v38_v4  ;;  %196 = vmatprep.subr.mxu1 %v40_v5  ;;  %v32_v9 = vld [vmem:[%s1292_s2 + $0x58] sm:$0xff]  ;;  %v29_v10 = vld [vmem:[%s1292_s2 + $0x40] sm:$0xff]  ;;  %v31_v11 = vld [vmem:[%s1292_s2 + $0x50] sm:$0xff] }
   0x5   :  { %126 = vmatpush1.msra.mxu0 %v37_v6  ;;  %197 = vmatpush1.msra.mxu1 %v39_v7  ;;  %v22_v12 = vld [vmem:[%s1292_s2 + $0x8] sm:$0xff]  ;;  %v24_v13 = vld [vmem:[%s1292_s2 + $0x18] sm:$0xff]  ;;  %v21_v14 = vld [vmem:[%s1292_s2] sm:$0xff] }
   0x6   :  { %127 = vmatprep.subr.mxu0 %v30_v8  ;;  %198 = vmatprep.subr.mxu1 %v32_v9  ;;  %v23_v15 = vld [vmem:[%s1292_s2 + $0x10] sm:$0xff]  ;;  %v20_v16 = vld [vmem:[%s1291_s1] sm:$0x3]  ;;  %v50_v18 = vld [vmem:[%s1292_s2 + $0xe8] sm:$0xff] }
   0x7   :  { %128 = vmatpush1.msra.mxu0 %v29_v10  ;;  %199 = vmatpush1.msra.mxu1 %v31_v11  ;;  %v52_v19 = vld [vmem:[%s1292_s2 + $0xf8] sm:$0xff]  ;;  %v49_v20 = vld [vmem:[%s1292_s2 + $0xe0] sm:$0xff]  ;;  %v51_v21 = vld [vmem:[%s1292_s2 + $0xf0] sm:$0xff] }
   0x8   :  { %129 = vmatprep.subr.mxu0 %v22_v12  ;;  %200 = vmatprep.subr.mxu1 %v24_v13  ;;  %v42_v22 = vld [vmem:[%s1292_s2 + $0xa8] sm:$0xff]  ;;  %v44_v23 = vld [vmem:[%s1292_s2 + $0xb8] sm:$0xff]  ;;  %v41_v24 = vld [vmem:[%s1292_s2 + $0xa0] sm:$0xff] }
   0x9   :  { %130 = vmatpush1.msra.mxu0 %v21_v14  ;;  %201 = vmatpush1.msra.mxu1 %v23_v15  ;;  %v43_v25 = vld [vmem:[%s1292_s2 + $0xb0] sm:$0xff] }
   0xa   :  { %978 = vmatmul.mubr.msk.f32.vlgmr.msra.gmra.mxu0 %vm95_vm0, %v20_v16  ;;  %979 = vmatmul.mubr.msk.f32.vlgmr.msra.gmra.mxu1 %vm95_vm0, %v20_v16 }
   0xb   :  { %265 = vmatprep.subr.mxu0 %v50_v18  ;;  %336 = vmatprep.subr.mxu1 %v52_v19 }
   0xc   :  { %11 = vsyncpa [#allocation3], 0  ;;  %266 = vmatpush1.msra.mxu0 %v49_v20  ;;  %337 = vmatpush1.msra.mxu1 %v51_v21  ;;  %v34_v26 = vld [vmem:[%s1292_s2 + $0x68] sm:$0xff]  ;;  %v36_v27 = vld [vmem:[%s1292_s2 + $0x78] sm:$0xff]  ;;  %v55_v38 = vlaneseq  ;;  %vm469_vm1 = vcmask 9216   ;;  %s1032_s22 = smov [#allocation2]  }
   0xd   :  { %267 = vmatprep.subr.mxu0 %v42_v22  ;;  %338 = vmatprep.subr.mxu1 %v44_v23  ;;  %v33_v28 = vld [vmem:[%s1292_s2 + $0x60] sm:$0xff]  ;;  %v35_v29 = vld [vmem:[%s1292_s2 + $0x70] sm:$0xff]  ;;  %v26_v30 = vld [vmem:[%s1292_s2 + $0x28] sm:$0xff]  ;;  %s966_s23 = sshll.u32 %s1032_s22, 4  ;;  %s967_s23 = int_to_ptr.vmem [resolvable:$true] %s966_s23 }
   0xe   :  { %268 = vmatpush1.msra.mxu0 %v41_v24  ;;  %339 = vmatpush1.msra.mxu1 %v43_v25  ;;  %v28_v31 = vld [vmem:[%s1292_s2 + $0x38] sm:$0xff]  ;;  %v25_v32 = vld [vmem:[%s1292_s2 + $0x20] sm:$0xff]  ;;  %v27_v33 = vld [vmem:[%s1292_s2 + $0x30] sm:$0xff]  ;;  %v1173_v39 = vshrl.u32 %v55_v38, 7  ;;  %s1008_s24 = scalar_lea.vmem %s967_s23, 16  ;;  %s1012_s25 = scalar_lea.vmem %s967_s23, 32 }
   0xf   :  { %269 = vmatprep.subr.mxu0 %v34_v26  ;;  %340 = vmatprep.subr.mxu1 %v36_v27  ;;  %v982_v34 = vld.sshfl [vmem:[%s1290_s0] sm:$0x33 pattern:$0x76325410]  ;;  %p1009_p0 = scmp.ne.s32.totalorder %s967_s23, %s1008_s24  ;;  %p1013_p1 = scmp.lt.s32.totalorder %s967_s23, %s967_s23 }
  0x10   :  { %270 = vmatpush1.msra.mxu0 %v33_v28  ;;  %341 = vmatpush1.msra.mxu1 %v35_v29  ;;  %v396_v35 = vcombine.high %v982_v34, %v982_v34  ;;  %v984_v36 = vld.sshfl [vmem:[%s1290_s0 + $0x4] sm:$0x33 pattern:$0x76325410]  ;;  %v65_v40 = vsub.s32 2, %v1173_v39  ;;  %v61_v41 = vsub.s32 1, %v1173_v39  ;;  %p1014_p2 = scmp.lt.s32.totalorder %s1012_s25, %s1008_s24 }
  0x11   :  { %271 = vmatprep.subr.mxu0 %v26_v30  ;;  %342 = vmatprep.subr.mxu1 %v28_v31  ;;  %v543_v37 = vcombine.high %v984_v36, %v984_v36  ;;  %v69_v42 = vsub.s32 3, %v1173_v39  ;;  %v53_v43 = vld [vmem:[%s1293_s3] sm:$0xff]  ;;  %v57_v44 = vsub.s32 0, %v1173_v39  ;;  %v81_v59 = vsub.s32 6, %v1173_v39 }
  0x12   :  { %272 = vmatpush1.msra.mxu0 %v25_v32  ;;  %305 = vmatprep.mubr.f32.mxu0 %v1030_v17  ;;  %v66_v45 = vrot.slane %v53_v43, %v65_v40  ;;  %v62_v46 = vrot.slane %v53_v43, %v61_v41  ;;  %v986_v54 = vld.sshfl [vmem:[%s1290_s0 + $0x8] sm:$0x33 pattern:$0x76325410]  ;;  %v77_v60 = vsub.s32 5, %v1173_v39  ;;  %v85_v61 = vsub.s32 7, %v1173_v39  ;;  %p1015_p3 = por %p1014_p2, %p1013_p1 }
  0x13   :  { %343 = vmatpush1.msra.mxu1 %v27_v33  ;;  %376 = vmatprep.mubr.f32.mxu1 %v1030_v17  ;;  %v70_v47 = vrot.slane %v53_v43, %v69_v42  ;;  %v58_v48 = vrot.slane %v53_v43, %v57_v44  ;;  %v988_v57 = vld.sshfl [vmem:[%s1290_s0 + $0xc] sm:$0x33 pattern:$0x76325410]  ;;  %v73_v62 = vsub.s32 4, %v1173_v39  ;;  %v685_v63 = vcombine.high %v986_v54, %v986_v54 }
  0x14   :  { %980 = vmatmul.mubr.msk.f32.vlgmr.msra.gmra.mxu0 %vm95_vm0, %v20_v16  ;;  %981 = vmatmul.mubr.msk.f32.vlgmr.msra.gmra.mxu1 %vm95_vm0, %v20_v16  ;;  %v827_v0 = vcombine.high %v988_v57, %v988_v57  ;;  %v82_v1 = vrot.slane %v53_v43, %v81_v59  ;;  %v78_v2 = vrot.slane %v53_v43, %v77_v60  ;;  %p1016_p4 = pnand %p1015_p3, %p1009_p0 }
  0x15   :  { %463 = vmatprep.mubr.f32.mxu0 %v396_v35  ;;  %610 = vmatprep.mubr.f32.mxu1 %v543_v37  ;;  %v86_v3 = vrot.slane %v53_v43, %v85_v61  ;;  %v74_v4 = vrot.slane %v53_v43, %v73_v62 }
  0xca   :  { %v165_v49 = vpop.f32.mrf.mxu0  ;;  %v236_v50 = vpop.f32.mrf.mxu1 }
  0xcb   :  { %v237_v51 = vadd.f32 %v236_v50, %v66_v45  ;;  %v166_v58 = vadd.f32 %v165_v49, %v58_v48 }
  0xcc   :  { %v167_v52 = vpop.f32.mrf.mxu0  ;;  %v238_v53 = vpop.f32.mrf.mxu1 }
  0xcd   :  { %v168_v55 = vadd.f32 %v167_v52, %v62_v46  ;;  %v239_v56 = vadd.f32 %v238_v53, %v70_v47 }
  0xcf   :  { %429 = vmatprep.subr.mxu0 %v168_v55  ;;  %576 = vmatprep.subr.mxu1 %v239_v56 }
  0xd0   :  { %430 = vmatpush1.xpose.msra.mxu0 %v166_v58  ;;  %577 = vmatpush1.xpose.msra.mxu1 %v237_v51 }
  0xd3   :  { %464 = vmatmul.mubr.f32.vlgmr.msra.gmra.mxu0 %v982_v34  ;;  %611 = vmatmul.mubr.f32.vlgmr.msra.gmra.mxu1 %v984_v36 }
  0xd4   :  { %v307_v5 = vpop.f32.mrf.mxu0  ;;  %v378_v6 = vpop.f32.mrf.mxu1  ;;  %752 = vmatprep.mubr.f32.mxu0 %v685_v63  ;;  %894 = vmatprep.mubr.f32.mxu1 %v827_v0 }
  0xd5   :  { %v379_v7 = vadd.f32 %v378_v6, %v82_v1  ;;  %v308_v12 = vadd.f32 %v307_v5, %v74_v4 }
  0xd6   :  { %v309_v8 = vpop.f32.mrf.mxu0  ;;  %v380_v9 = vpop.f32.mrf.mxu1 }
  0xd7   :  { %v310_v10 = vadd.f32 %v309_v8, %v78_v2  ;;  %v381_v11 = vadd.f32 %v380_v9, %v86_v3 }
  0xd9   :  { %718 = vmatprep.subr.mxu0 %v310_v10  ;;  %860 = vmatprep.subr.mxu1 %v381_v11 }
  0xda   :  { %719 = vmatpush1.xpose.msra.mxu0 %v308_v12  ;;  %861 = vmatpush1.xpose.msra.mxu1 %v379_v7 }
  0xdd   :  { %753 = vmatmul.mubr.f32.vlgmr.msra.gmra.mxu0 %v986_v54  ;;  %895 = vmatmul.mubr.f32.vlgmr.msra.gmra.mxu1 %v988_v57 }
 0x193   :  { %v1192_v13 = vpop.f32.mrf.mxu0  ;;  %v1194_v14 = vpop.f32.mrf.mxu1 }
 0x194   :  { %v470_v15 = vsel %vm469_vm1, %v1192_v13, -inf  ;;  %v616_v18 = vsel %vm469_vm1, %v1194_v14, -inf }
 0x195   :  { %471 = vmax.xlane.f32.xlu0 %v470_v15  ;;  %v467_v16 = vpop.f32.mrf.mxu0  ;;  %v614_v17 = vpop.f32.mrf.mxu1  ;;  %v497_v25 = vrot.slane %v470_v15, 4  ;;  %v641_v26 = vrot.slane %v616_v18, 4 }
 0x197   :  { %v498_v27 = vmax.f32 %v470_v15, %v497_v25  ;;  %v642_v29 = vmax.f32 %v616_v18, %v641_v26 }
 0x199   :  { %617 = vmax.xlane.f32.xlu0 %v616_v18  ;;  %v499_v30 = vrot.slane %v498_v27, 2  ;;  %v643_v33 = vrot.slane %v642_v29, 2 }
 0x19b   :  { %v500_v34 = vmax.f32 %v498_v27, %v499_v30  ;;  %v644_v37 = vmax.f32 %v642_v29, %v643_v33 }
 0x19d   :  { %v1200_v19 = vpop.f32.mrf.mxu0  ;;  %v1202_v20 = vpop.f32.mrf.mxu1  ;;  %v501_v40 = vrot.slane %v500_v34, 1  ;;  %v645_v43 = vrot.slane %v644_v37, 1 }
 0x19e   :  { %v758_v21 = vsel %vm469_vm1, %v1200_v19, -inf  ;;  %v900_v24 = vsel %vm469_vm1, %v1202_v20, -inf }
 0x19f   :  { %759 = vmax.xlane.f32.xlu1 %v758_v21  ;;  %v756_v22 = vpop.f32.mrf.mxu0  ;;  %v898_v23 = vpop.f32.mrf.mxu1  ;;  %v783_v28 = vrot.slane %v758_v21, 4  ;;  %v925_v32 = vrot.slane %v900_v24, 4  ;;  %v502_v44 = vmax.f32 %v500_v34, %v501_v40  ;;  %v646_v47 = vmax.f32 %v644_v37, %v645_v43 }
 0x1a0   :  { %v386_v34 = vand.u32 127, %v55_v38  ;;  %v1031_v38 = vmov 0  }
 0x1a1   :  { %v784_v31 = vmax.f32 %v758_v21, %v783_v28  ;;  %v926_v36 = vmax.f32 %v900_v24, %v925_v32  ;;  %vm503_vm2 = vcmp.ge.f32.partialorder %v1192_v13, %v502_v44  ;;  %vm647_vm3 = vcmp.ge.f32.partialorder %v1194_v14, %v646_v47 }
 0x1a2   :  { %v504_v50 = vsel %vm503_vm2, %v1173_v39, 2  ;;  %v648_v53 = vsel %vm647_vm3, %v1173_v39, 2  ;;  %vm482_vm2 = vcmp.eq.s32.totalorder %v1173_v39, %v386_v34 }
 0x1a3   :  { %901 = vmax.xlane.f32.xlu1 %v900_v24  ;;  %v785_v35 = vrot.slane %v784_v31, 2  ;;  %v927_v42 = vrot.slane %v926_v36, 2  ;;  %v505_v52 = vsel %vm469_vm1, %v504_v50, 2147483647  ;;  %v649_v56 = vsel %vm469_vm1, %v648_v53, 2147483647 }
 0x1a4   :  { %v506_v55 = vrot.slane %v505_v52, 4  ;;  %v650_v59 = vrot.slane %v649_v56, 4  ;;  %v483_v43 = vsel %vm482_vm2, %v1192_v13, 0.0  ;;  %v770_v50 = vsel %vm482_vm2, %v1200_v19, 0.0 }
 0x1a5   :  { %v786_v41 = vmax.f32 %v784_v31, %v785_v35  ;;  %v928_v46 = vmax.f32 %v926_v36, %v927_v42  ;;  %v484_v47 = vsel %vm469_vm1, %v483_v43, 0.0 }
 0x1a6   :  { %vm507_vm6 = vcmp.lt.s32.totalorder %v505_v52, %v506_v55  ;;  %vm651_vm7 = vcmp.lt.s32.totalorder %v649_v56, %v650_v59 }
 0x1a7   :  { %v787_v45 = vrot.slane %v786_v41, 1  ;;  %v929_v49 = vrot.slane %v928_v46, 1  ;;  %v508_v2 = vsel %vm507_vm6, %v505_v52, %v506_v55  ;;  %v652_v7 = vsel %vm651_vm7, %v649_v56, %v650_v59 }
 0x1a8   :  { %v509_v6 = vrot.slane %v508_v2, 2  ;;  %v653_v10 = vrot.slane %v652_v7, 2 }
 0x1a9   :  { %v788_v48 = vmax.f32 %v786_v41, %v787_v45  ;;  %v930_v51 = vmax.f32 %v928_v46, %v929_v49 }
 0x1aa   :  { %vm510_vm10 = vcmp.lt.s32.totalorder %v508_v2, %v509_v6  ;;  %vm654_vm11 = vcmp.lt.s32.totalorder %v652_v7, %v653_v10 }
 0x1ab   :  { %vm789_vm4 = vcmp.ge.f32.partialorder %v1200_v19, %v788_v48  ;;  %vm931_vm5 = vcmp.ge.f32.partialorder %v1202_v20, %v930_v51  ;;  %v511_v18 = vsel %vm510_vm10, %v508_v2, %v509_v6  ;;  %v655_v26 = vsel %vm654_vm11, %v652_v7, %v653_v10 }
 0x1ac   :  { %v790_v54 = vsel %vm789_vm4, %v1173_v39, 2  ;;  %v932_v58 = vsel %vm931_vm5, %v1173_v39, 2  ;;  %v512_v24 = vrot.slane %v511_v18, 1  ;;  %v656_v29 = vrot.slane %v655_v26, 1 }
 0x1ad   :  { %v791_v57 = vsel %vm469_vm1, %v790_v54, 2147483647  ;;  %v933_v63 = vsel %vm469_vm1, %v932_v58, 2147483647  ;;  %vm517_vm5 = vcmask 15360   ;;  %v771_v54 = vsel %vm469_vm1, %v770_v50, 0.0 }
 0x1ae   :  { %v792_v61 = vrot.slane %v791_v57, 4  ;;  %v934_v3 = vrot.slane %v933_v63, 4  ;;  %vm513_vm14 = vcmp.lt.s32.totalorder %v511_v18, %v512_v24  ;;  %vm657_vm15 = vcmp.lt.s32.totalorder %v655_v26, %v656_v29 }
 0x1af   :  { %v514_v35 = vsel %vm513_vm14, %v511_v18, %v512_v24  ;;  %v658_v40 = vsel %vm657_vm15, %v655_v26, %v656_v29 }
 0x1b0   :  { %vm793_vm8 = vcmp.lt.s32.totalorder %v791_v57, %v792_v61  ;;  %vm935_vm9 = vcmp.lt.s32.totalorder %v933_v63, %v934_v3  ;;  %vm515_vm3 = vcmp.eq.s32.totalorder %v514_v35, %v386_v34  ;;  %vm659_vm6 = vcmp.eq.s32.totalorder %v658_v40, %v386_v34 }
 0x1b1   :  { %v794_v8 = vsel %vm793_vm8, %v791_v57, %v792_v61  ;;  %v936_v15 = vsel %vm935_vm9, %v933_v63, %v934_v3  ;;  %v516_v44 = vsel %vm515_vm3, 1, %v1031_v38  ;;  %v660_v51 = vsel %vm659_vm6, 1, %v1031_v38 }
 0x1b2   :  { %v795_v12 = vrot.slane %v794_v8, 2  ;;  %v937_v22 = vrot.slane %v936_v15, 2  ;;  %v518_v49 = vsel %vm517_vm5, %v516_v44, 0  ;;  %v661_v56 = vsel %vm517_vm5, %v660_v51, 0 }
 0x1b3   :  { %v520_v53 = vshrl.u32 %v518_v49, 16  ;;  %v663_v59 = vshrl.u32 %v661_v56, 16  ;;  %v662_v39 = vand.u32 65535, %v661_v56  ;;  %vm531_vm9 = vcmask 0  }
 0x1b4   :  { %vm796_vm12 = vcmp.lt.s32.totalorder %v794_v8, %v795_v12  ;;  %vm938_vm13 = vcmp.lt.s32.totalorder %v936_v15, %v937_v22 }
 0x1b5   :  { %v797_v27 = vsel %vm796_vm12, %v794_v8, %v795_v12  ;;  %v939_v32 = vsel %vm938_vm13, %v936_v15, %v937_v22  ;;  %v664_v7 = vcvt.s32.f32 %v662_v39 }
 0x1b6   :  { %v798_v30 = vrot.slane %v797_v27, 1  ;;  %v940_v36 = vrot.slane %v939_v32, 1 }
 0x1b8   :  { %vm799_vm0 = vcmp.lt.s32.totalorder %v797_v27, %v798_v30  ;;  %vm941_vm4 = vcmp.lt.s32.totalorder %v939_v32, %v940_v36 }
 0x1b9   :  { %v800_v41 = vsel %vm799_vm0, %v797_v27, %v798_v30  ;;  %v942_v46 = vsel %vm941_vm4, %v939_v32, %v940_v36 }
 0x1ba   :  { %vm801_vm7 = vcmp.eq.s32.totalorder %v800_v41, %v386_v34  ;;  %vm943_vm8 = vcmp.eq.s32.totalorder %v942_v46, %v386_v34 }
 0x1bb   :  { %v802_v52 = vsel %vm801_vm7, 1, %v1031_v38  ;;  %v944_v58 = vsel %vm943_vm8, 1, %v1031_v38 }
 0x1bc   :  { %v803_v57 = vsel %vm517_vm5, %v802_v52, 0  ;;  %v945_v63 = vsel %vm517_vm5, %v944_v58, 0 }
 0x1bd   :  { %v805_v61 = vshrl.u32 %v803_v57, 16  ;;  %v947_v3 = vshrl.u32 %v945_v63, 16  ;;  %v946_v10 = vand.u32 65535, %v945_v63 }
 0x1bf   :  { %v807_v2 = vcvt.s32.f32 %v805_v61 }
 0x21e   :  { %v1219_v60 = vpop.xlane.xlu0 %471 }
 0x21f   :  { %v473_v62 = vsub.f32 %v1192_v13, %v1219_v60  ;;  %v628_v13 = vsel %vm482_vm2, %v1194_v14, 0.0 }
 0x220   :  { %v629_v55 = vsel %vm469_vm1, %v628_v13, 0.0 }
 0x221   :  { %v474_v0 = vmul.f32 1.442695, %v473_v62 }
 0x222   :  { %v1224_v1 = vpop.xlane.xlu0 %617 }
 0x223   :  { %992 = vpow2.f32 %v474_v0  ;;  %v619_v4 = vsub.f32 %v1194_v14, %v1224_v1  ;;  %v522_v14 = vcvt.s32.f32 %v520_v53  ;;  %v665_v0 = vcvt.s32.f32 %v663_v59 }
 0x225   :  { %v620_v5 = vmul.f32 1.442695, %v619_v4  ;;  %v519_v4 = vand.u32 65535, %v518_v49 }
 0x227   :  { %994 = vpow2.f32 %v620_v5  ;;  %v949_v5 = vcvt.s32.f32 %v947_v3  ;;  %v521_v6 = vcvt.s32.f32 %v519_v4 }
 0x228   :  { %v1228_v9 = vpop.xlane.xlu1 %759 }
 0x229   :  { %v761_v11 = vsub.f32 %v1200_v19, %v1228_v9  ;;  %v912_v19 = vsel %vm482_vm2, %v1202_v20, 0.0 }
 0x22a   :  { %v913_v62 = vsel %vm469_vm1, %v912_v19, 0.0 }
 0x22b   :  { %v762_v16 = vmul.f32 1.442695, %v761_v11  ;;  %v948_v11 = vcvt.s32.f32 %v946_v10 }
 0x22c   :  { %v1232_v17 = vpop.xlane.xlu1 %901 }
 0x22d   :  { %996 = vpow2.f32 %v762_v16  ;;  %v903_v21 = vsub.f32 %v1202_v20, %v1232_v17  ;;  %v804_v20 = vand.u32 65535, %v803_v57 }
 0x22f   :  { %v904_v23 = vmul.f32 1.442695, %v903_v21  ;;  %v806_v8 = vcvt.s32.f32 %v804_v20 }
 0x230   :  { %v993_v25 = vpop.eup %992 }
 0x231   :  { %998 = vpow2.f32 %v904_v23  ;;  %v476_v28 = vsel %vm469_vm1, %v993_v25, 0.0 }
 0x232   :  { %477 = vadd.xlane.f32.xlu0 %v476_v28 }
 0x234   :  { %v995_v31 = vpop.eup %994 }
 0x235   :  { %v622_v33 = vsel %vm469_vm1, %v995_v31, 0.0 }
 0x236   :  { %623 = vadd.xlane.f32.xlu1 %v622_v33 }
 0x23a   :  { %v997_v37 = vpop.eup %996 }
 0x23b   :  { %v764_v42 = vsel %vm469_vm1, %v997_v37, 0.0 }
 0x23c   :  { %765 = vadd.xlane.f32.xlu0 %v764_v42 }
 0x23e   :  { %v999_v45 = vpop.eup %998 }
 0x23f   :  { %v906_v48 = vsel %vm469_vm1, %v999_v45, 0.0  ;;  %vm488_vm1 = vcmask 1041408  }
 0x240   :  { %485 = vadd.xlane.f32.xlu0 %v484_v47  ;;  %907 = vadd.xlane.f32.xlu1 %v906_v48 }
 0x244   :  { %772 = vadd.xlane.f32.xlu0 %v771_v54  ;;  %630 = vadd.xlane.f32.xlu1 %v629_v55 }
 0x248   :  { %525 = vadd.xlane.f32.xlu0 %v522_v14  ;;  %914 = vadd.xlane.f32.xlu1 %v913_v62 }
 0x24c   :  { %668 = vadd.xlane.f32.xlu1 %v665_v0  ;;  %810 = vadd.xlane.f32.xlu0 %v807_v2 }
 0x250   :  { %952 = vadd.xlane.f32.xlu1 %v949_v5  ;;  %523 = vadd.xlane.f32.xlu0 %v521_v6 }
 0x254   :  { %666 = vadd.xlane.f32.xlu1 %v664_v7  ;;  %808 = vadd.xlane.f32.xlu0 %v806_v8 }
 0x258   :  { %950 = vadd.xlane.f32.xlu1 %v948_v11 }
 0x2bb   :  { %v478_v12 = vpop.xlane.xlu0 %477 }
 0x2bc   :  { %1000 = vlog2.f32 %v478_v12 }
 0x2bf   :  { %v624_v15 = vpop.xlane.xlu1 %623 }
 0x2c0   :  { %1002 = vlog2.f32 %v624_v15 }
 0x2c5   :  { %v766_v16 = vpop.xlane.xlu0 %765 }
 0x2c6   :  { %1004 = vlog2.f32 %v766_v16 }
 0x2c9   :  { %v1001_v18 = vpop.eup %1000  ;;  %v486_v21 = vpop.xlane.xlu0 %485 }
 0x2ca   :  { %v908_v22 = vpop.xlane.xlu1 %907  ;;  %v480_v23 = vmul.f32 0.6931472, %v1001_v18 }
 0x2cb   :  { %1006 = vlog2.f32 %v908_v22 }
 0x2cc   :  { %v481_v24 = vadd.f32 %v480_v23, %v1219_v60 }
 0x2cd   :  { %v1003_v25 = vpop.eup %1002  ;;  %v773_v26 = vpop.xlane.xlu0 %772 }
 0x2ce   :  { %v631_v27 = vpop.xlane.xlu1 %630  ;;  %v626_v28 = vmul.f32 0.6931472, %v1003_v25  ;;  %v487_v29 = vsub.f32 %v486_v21, %v481_v24 }
 0x2d0   :  { %v489_v30 = vsel %vm488_vm1, %v487_v29, 0.0  ;;  %v627_v31 = vadd.f32 %v626_v28, %v1224_v1 }
 0x2d1   :  { %v490_v32 = vrot.slane %v489_v30, 4  ;;  %v526_v33 = vpop.xlane.xlu0 %525 }
 0x2d2   :  { %v915_v34 = vpop.xlane.xlu1 %914  ;;  %v632_v35 = vsub.f32 %v631_v27, %v627_v31  ;;  %v528_v44 = vcvt.f32.s32 %v526_v33 }
 0x2d3   :  { %v1005_v36 = vpop.eup %1004  ;;  %v491_v41 = vadd.f32 %v490_v32, %v489_v30 }
 0x2d4   :  { %v768_v37 = vmul.f32 0.6931472, %v1005_v36  ;;  %v633_v40 = vsel %vm488_vm1, %v632_v35, 0.0  ;;  %v529_v54 = vshll.u32 %v528_v44, 16 }
 0x2d5   :  { %v634_v60 = vrot.slane %v633_v40, 4  ;;  %v811_v43 = vpop.xlane.xlu0 %810  ;;  %v492_v1 = vrot.slane %v491_v41, 2 }
 0x2d6   :  { %v669_v42 = vpop.xlane.xlu1 %668  ;;  %v769_v38 = vadd.f32 %v768_v37, %v1228_v9  ;;  %v813_v13 = vcvt.f32.s32 %v811_v43 }
 0x2d7   :  { %v635_v46 = vadd.f32 %v634_v60, %v633_v40  ;;  %v671_v50 = vcvt.f32.s32 %v669_v42  ;;  %v493_v14 = vadd.f32 %v492_v1, %v491_v41 }
 0x2d8   :  { %v1007_v45 = vpop.eup %1006  ;;  %v774_v48 = vsub.f32 %v773_v26, %v769_v38  ;;  %v814_v62 = vshll.u32 %v813_v13, 16 }
 0x2d9   :  { %v910_v47 = vmul.f32 0.6931472, %v1007_v45  ;;  %v636_v49 = vrot.slane %v635_v46, 2  ;;  %v524_v52 = vpop.xlane.xlu0 %523  ;;  %v672_v61 = vshll.u32 %v671_v50, 16  ;;  %v494_v8 = vrot.slane %v493_v14, 1 }
 0x2da   :  { %v953_v51 = vpop.xlane.xlu1 %952  ;;  %v775_v53 = vsel %vm488_vm1, %v774_v48, 0.0  ;;  %v527_v56 = vcvt.f32.s32 %v524_v52 }
 0x2db   :  { %v911_v55 = vadd.f32 %v910_v47, %v1232_v17  ;;  %v776_v57 = vrot.slane %v775_v53, 4  ;;  %v637_v19 = vadd.f32 %v636_v49, %v635_v46  ;;  %v955_v3 = vcvt.f32.s32 %v953_v51 }
 0x2dc   :  { %v530_v58 = vadd.s32 %v529_v54, %v527_v56  ;;  %v495_v24 = vadd.f32 %v494_v8, %v493_v14 }
 0x2dd   :  { %v916_v9 = vsub.f32 %v915_v34, %v911_v55  ;;  %v777_v59 = vadd.f32 %v776_v57, %v775_v53  ;;  %v809_v0 = vpop.xlane.xlu0 %808  ;;  %v638_v6 = vrot.slane %v637_v19, 1  ;;  %v956_v15 = vshll.u32 %v955_v3, 16 }
 0x2de   :  { %v667_v63 = vpop.xlane.xlu1 %666  ;;  %532 = vst.msk [vmem:[%s1295_s5] sm:$0x1] %vm531_vm9, %v530_v58  ;;  %v812_v4 = vcvt.f32.s32 %v809_v0 }
 0x2df   :  { %v917_v2 = vsel %vm488_vm1, %v916_v9, 0.0  ;;  %v670_v17 = vcvt.f32.s32 %v667_v63  ;;  %v778_v5 = vrot.slane %v777_v59, 2  ;;  %v639_v21 = vadd.f32 %v638_v6, %v637_v19 }
 0x2e0   :  { %v918_v39 = vrot.slane %v917_v2, 4  ;;  %v815_v7 = vadd.s32 %v814_v62, %v812_v4 }
 0x2e1   :  { %v673_v20 = vadd.s32 %v672_v61, %v670_v17  ;;  %v779_v10 = vadd.f32 %v778_v5, %v777_v59  ;;  %v640_v28 = vadd.f32 %v639_v21, %v495_v24 }
 0x2e2   :  { %v919_v11 = vadd.f32 %v918_v39, %v917_v2  ;;  %v951_v12 = vpop.xlane.xlu1 %950  ;;  %816 = vst.msk [vmem:[%s1295_s5 + $0x2] sm:$0x1] %vm531_vm9, %v815_v7 }
 0x2e3   :  { %674 = vst.msk [vmem:[%s1295_s5 + $0x1] sm:$0x1] %vm531_vm9, %v673_v20  ;;  %v954_v16 = vcvt.f32.s32 %v951_v12  ;;  %v780_v18 = vrot.slane %v779_v10, 1 }
 0x2e4   :  { %v920_v22 = vrot.slane %v919_v11, 2 }
 0x2e5   :  { %v957_v23 = vadd.s32 %v956_v15, %v954_v16  ;;  %v781_v25 = vadd.f32 %v780_v18, %v779_v10 }
 0x2e6   :  { %v921_v26 = vadd.f32 %v920_v22, %v919_v11 }
 0x2e7   :  { %958 = vst.msk [vmem:[%s1295_s5 + $0x3] sm:$0x1] %vm531_vm9, %v957_v23  ;;  %v782_v29 = vadd.f32 %v781_v25, %v640_v28 }
 0x2e8   :  { %v922_v27 = vrot.slane %v921_v26, 1 }
 0x2ea   :  { %v923_v30 = vadd.f32 %v922_v27, %v921_v26 }
 0x2ec   :  { %v924_v31 = vadd.f32 %v923_v30, %v782_v29 }
 0x2ee   :  { %959 = vst.msk [vmem:[#allocation2] sm:$0x1] %vm531_vm9, %v924_v31 }
 0x2ef   :  { %1019 = shalt.err (!%p1016_p4)
}
 0x2f0   :  { %969 = dma.vmem_to_hbm [thread:$0]  %s967_s23, 16, %s1294_s4, [#allocation3]  }
 0x2f1   :  { %1028 = dma.done.wait [#allocation3], 16  }
 0x2f2   :  { %1029 = vsyncadd [#allocation3], 4294967280 }
 0x2f3   :  { %977 = vsyncpa [#allocation3], 1 }

</bundles_post_ra>
